<compile_context>
chip_gen: v7x
topology: tpu7x:2x2x1
jax: 0.10.0
libtpu: 0.0.40
codegen_flags: <defaults>
</compile_context>

<pallas_src>
import functools

import jax
import jax.numpy as jnp
import numpy as np
from jax.experimental import pallas as pl
from jax.experimental.pallas import tpu as pltpu

LN_EPS = 1e-5  # nn.LayerNorm default


# --------------------------------------------------------------------------- #
# Fused whole-model kernel
# --------------------------------------------------------------------------- #

def _fused_forward_kernel(*refs, treedef, n_params, B, seq, window):
    x_ref = refs[n_params]
    dec_in_ref = refs[n_params + 1]
    out_ref = refs[n_params + 2]
    # Dict-of-REFS (no loads here): each weight is read at its use site.
    tree = jax.tree_util.tree_unflatten(treedef, list(refs[:n_params]))
    W, C = tree["w"], tree["c"]          # weights / shape-derived constants

    def mm(a, b):  # MXU matmul: bf16 operands (weights pre-cast), f32 accumulate
        return jnp.dot(a.astype(jnp.bfloat16), b.astype(jnp.bfloat16),
                       preferred_element_type=jnp.float32)

    def lin(x, w_ref, b_ref, relu=False):
        y = mm(x, w_ref[...]) + b_ref[...]
        return jnp.maximum(y, 0.0) if relu else y

    def layernorm(x, p):                 # f32 VPU math (v5e has no bf16 VPU)
        mu = jnp.mean(x, axis=-1, keepdims=True)
        c = x - mu
        var = jnp.mean(c * c, axis=-1, keepdims=True)
        return c * jax.lax.rsqrt(var + LN_EPS) * p["g"][...] + p["b"][...]

    def ffn(x, p):
        return lin(lin(x, p["ff1_w"], p["ff1_b"], relu=True),
                   p["ff2_w"], p["ff2_b"])

    # ---- feature extractor + encoder --------------------------------------
    # The encoder memory is exactly ONE token per sample (x has no seq dim),
    # so self-attention over it is softmax of a single logit == 1 and
    # collapses exactly to the host-prefolded (Wv @ Wo) linear map.
    mem = lin(x_ref[...], W["feat"]["w"], W["feat"]["b"])                 # (B, D)
    for p in W["enc"]:
        mem = mem + lin(layernorm(mem, p["ln1"]), p["sa_w"], p["sa_b"])
        mem = mem + ffn(layernorm(mem, p["ln2"]), p)

    # Broadcast each sample's memory token onto its seq decoder rows (1 push).
    mem_exp = mm(C["expand_b"][...], mem)                                 # (L, D)

    # ---- decoder, batch folded into rows (row order = (s, b)) -------------
    dec = lin(dec_in_ref[...], W["dec_feat"]["w"], W["dec_feat"]["b"])    # (L, D)

    def self_attn(xn, p):
        # 1/sqrt(Dh) is pre-folded into q_w / q_b.
        q = lin(xn, p["q_w"], p["q_b"])
        k = lin(xn, p["k_w"], p["k_b"])
        v = lin(xn, p["v_w"], p["v_b"])
        # Heads stacked along sublanes: row (h*L + i) = query i masked to head h.
        q_blk = mm(C["tile_m"][...], q) * C["head_mask"][...]             # (H*L, D)
        s = jax.lax.dot_general(                                          # (H*L, L)
            q_blk.astype(jnp.bfloat16), k.astype(jnp.bfloat16),
            dimension_numbers=(((1,), (1,)), ((), ())),
            preferred_element_type=jnp.float32)
        # Cross-batch keys removed by a multiplicative 0/1 mask on exp().
        # Max-subtraction dropped (tiny post-LN logits; minor numerics delta).
        e = jnp.exp(s) * C["keep_mask"][...]
        prob = e * pl.reciprocal(jnp.sum(e, axis=-1, keepdims=True), approx=True)
        o_blk = mm(prob, v) * C["head_mask"][...]                         # (H*L, D)
        cat = mm(C["collapse_m"][...], o_blk)                             # (L, D) == concat(heads)
        return lin(cat, p["o_w"], p["o_b"])

    for p in W["dec"]:
        dec = dec + self_attn(layernorm(dec, p["ln1"]), p)
        # Cross-attention over the single-token memory: exact algebraic fold,
        # the query (norm2(dec)) is irrelevant and is not computed.
        dec = dec + lin(mem_exp, p["ca_w"], p["ca_b"])
        dec = dec + ffn(layernorm(dec, p["ln3"]), p)

    # ---- predict head + unflatten + out1, folded into per-(s, w) blocks ---
    blocks = []
    for w in range(window):
        acc = W["pred_b"][w][...]                                         # (1, 2D)
        for s in range(seq):
            acc = acc + mm(dec[s * B:(s + 1) * B, :], W["pred_w"][s][w][...])
        blocks.append(acc)                                                # (B, 2D)
    h = jnp.concatenate(blocks, axis=0)                                   # (window*B, 2D), rows (w, b)

    # ---- output decoder (Dropout == identity, inference) ------------------
    # TODO(synk): training-mode dropout is not implemented.
    h = jnp.maximum(layernorm(h, W["out_ln"]), 0.0)
    h = lin(h, W["out2_w"], W["out2_b"], relu=True)
    out_ref[...] = lin(h, W["out3_w"], W["out3_b"]).astype(out_ref.dtype)


# --------------------------------------------------------------------------- #
# Shape-derived constant matrices (built host-side, passed as operands)
# --------------------------------------------------------------------------- #

def _make_constants(B, seq, nhead, d_model):
    L = B * seq
    dh = d_model // nhead
    eye = np.eye(L, dtype=np.float32)
    tile = np.concatenate([eye] * nhead, axis=0)                  # (H*L, L)
    headmask = np.zeros((nhead * L, d_model), np.float32)
    for hh in range(nhead):
        headmask[hh * L:(hh + 1) * L, hh * dh:(hh + 1) * dh] = 1.0
    b_of_row = np.arange(L) % B                                   # rows ordered (s, b)
    same_batch = (b_of_row[:, None] == b_of_row[None, :]).astype(np.float32)
    keep = np.concatenate([same_batch] * nhead, axis=0)           # (H*L, L)
    expand_b = (b_of_row[:, None] == np.arange(B)[None, :]).astype(np.float32)
    return {
        "tile_m": jnp.asarray(tile, jnp.bfloat16),
        "collapse_m": jnp.asarray(tile.T, jnp.bfloat16),
        "head_mask": jnp.asarray(headmask, jnp.float32),
        "keep_mask": jnp.asarray(keep, jnp.float32),
        "expand_b": jnp.asarray(expand_b, jnp.bfloat16),
    }


# --------------------------------------------------------------------------- #
# Wrapper
# --------------------------------------------------------------------------- #

def forward(prepared, x, decoder_input, *, nhead, window_size):
    B, _ = x.shape
    assert x.ndim == 2  # encoder memory is a single token per sample (exact fold)
    _, seq, jd = decoder_input.shape
    d_model = prepared["feat"]["w"].shape[1]

    operands = {"w": prepared, "c": _make_constants(B, seq, nhead, d_model)}
    leaves, treedef = jax.tree_util.tree_flatten(operands)

    # Decoder rows ordered (s, b) so per-step blocks are contiguous sublanes.
    dec_in = jnp.transpose(decoder_input, (1, 0, 2)).reshape(seq * B, jd)

    kernel = functools.partial(_fused_forward_kernel, treedef=treedef,
                               n_params=len(leaves), B=B, seq=seq,
                               window=window_size)
    vmem = pl.BlockSpec(memory_space=pltpu.MemorySpace.VMEM)
    out = pl.pallas_call(
        kernel,
        out_shape=jax.ShapeDtypeStruct((window_size * B, jd), jnp.float32),
        in_specs=[vmem] * (len(leaves) + 2),
        out_specs=vmem,
    )(*leaves, x, dec_in)
    # Kernel emits rows in (w, b) order -> (B, window, jd).
    return jnp.transpose(out.reshape(window_size, B, jd), (1, 0, 2))


# --------------------------------------------------------------------------- #
# Parameters: PyTorch-equivalent init + host-side folding / bf16 pre-cast
# --------------------------------------------------------------------------- #

def init_params(key, input_dim, d_model, num_layers, num_joints, num_dims,
                seq_length, window_size):
    """PyTorch-equivalent parameters (f32, Linear weights stored as (in, out))."""
    keys = iter(jax.random.split(key, 512))

    def dense(din, dout):
        return {"w": jax.random.normal(next(keys), (din, dout), jnp.float32) * 0.02,
                "b": jax.random.normal(next(keys), (1, dout), jnp.float32) * 0.02}

    def ln(d):
        return {"g": jnp.ones((1, d), jnp.float32),
                "b": jnp.zeros((1, d), jnp.float32)}

    def mha(d):  # q/k/v/out projections of nn.MultiheadAttention
        return {"q": dense(d, d), "k": dense(d, d), "v": dense(d, d),
                "o": dense(d, d)}

    def enc_layer(d):
        return {"ln1": ln(d), "sa": mha(d), "ln2": ln(d),
                "ff1": dense(d, 4 * d), "ff2": dense(4 * d, d)}

    def dec_layer(d):
        return {"ln1": ln(d), "sa": mha(d), "ln2": ln(d), "ca": mha(d),
                "ln3": ln(d), "ff1": dense(d, 4 * d), "ff2": dense(4 * d, d)}

    jd = num_joints * num_dims
    return {
        "feat": dense(input_dim, d_model),
        "dec_feat": dense(jd, d_model),
        "enc": [enc_layer(d_model) for _ in range(num_layers)],
        "dec": [dec_layer(d_model) for _ in range(num_layers)],
        "predict": dense(d_model * seq_length, d_model * window_size),
        "out1": dense(d_model, 2 * d_model),
        "out_ln": ln(2 * d_model),
        "out2": dense(2 * d_model, d_model),
        "out3": dense(d_model, jd),
        "output_scale": jnp.ones((1, 1), jnp.float32),
    }


def prepare_params(raw, *, nhead, d_model):
    """Host-side algebraic folds + bf16 pre-cast of all matmul weights."""
    D = d_model
    bf = lambda a: a.astype(jnp.bfloat16)
    scale = 1.0 / float(D // nhead) ** 0.5

    def ln(p):
        return {"g": p["g"], "b": p["b"]}

    def enc_layer(p):
        sa_w = p["sa"]["v"]["w"] @ p["sa"]["o"]["w"]                 # single-token fold
        sa_b = p["sa"]["v"]["b"] @ p["sa"]["o"]["w"] + p["sa"]["o"]["b"]
        return {"ln1": ln(p["ln1"]), "sa_w": bf(sa_w), "sa_b": sa_b,
                "ln2": ln(p["ln2"]),
                "ff1_w": bf(p["ff1"]["w"]), "ff1_b": p["ff1"]["b"],
                "ff2_w": bf(p["ff2"]["w"]), "ff2_b": p["ff2"]["b"]}

    def dec_layer(p):
        ca_w = p["ca"]["v"]["w"] @ p["ca"]["o"]["w"]                 # single-key fold
        ca_b = p["ca"]["v"]["b"] @ p["ca"]["o"]["w"] + p["ca"]["o"]["b"]
        # Decoder norm2 + cross-attn Q/K are algebraically dead (1-token memory).
        return {"ln1": ln(p["ln1"]),
                "q_w": bf(p["sa"]["q"]["w"] * scale), "q_b": p["sa"]["q"]["b"] * scale,
                "k_w": bf(p["sa"]["k"]["w"]), "k_b": p["sa"]["k"]["b"],
                "v_w": bf(p["sa"]["v"]["w"]), "v_b": p["sa"]["v"]["b"],
                "o_w": bf(p["sa"]["o"]["w"]), "o_b": p["sa"]["o"]["b"],
                "ca_w": bf(ca_w), "ca_b": ca_b,
                "ln3": ln(p["ln3"]),
                "ff1_w": bf(p["ff1"]["w"]), "ff1_b": p["ff1"]["b"],
                "ff2_w": bf(p["ff2"]["w"]), "ff2_b": p["ff2"]["b"]}

    # predict + (reshape) + out1 fold: per-(s, w) blocks G = Wp_block @ W1.
    Wp, bp = raw["predict"]["w"], raw["predict"]["b"]
    W1, b1 = raw["out1"]["w"], raw["out1"]["b"]
    seq = Wp.shape[0] // D
    window = Wp.shape[1] // D
    pred_w = [[bf(Wp[s * D:(s + 1) * D, w * D:(w + 1) * D] @ W1)
               for w in range(window)] for s in range(seq)]
    pred_b = [bp[:, w * D:(w + 1) * D] @ W1 + b1 for w in range(window)]

    scale_out = raw["output_scale"]
    return {
        "feat": {"w": bf(raw["feat"]["w"]), "b": raw["feat"]["b"]},
        "dec_feat": {"w": bf(raw["dec_feat"]["w"]), "b": raw["dec_feat"]["b"]},
        "enc": [enc_layer(p) for p in raw["enc"]],
        "dec": [dec_layer(p) for p in raw["dec"]],
        "pred_w": pred_w, "pred_b": pred_b,
        "out_ln": ln(raw["out_ln"]),
        "out2_w": bf(raw["out2"]["w"]), "out2_b": raw["out2"]["b"],
        "out3_w": bf(raw["out3"]["w"] * scale_out),     # output_scale folded in
        "out3_b": raw["out3"]["b"] * scale_out,
    }


# --------------------------------------------------------------------------- #
# Main
# --------------------------------------------------------------------------- #

if __name__ == "__main__":
    input_dim = 12
    d_model = 32
    nhead = 4
    num_encoder_layers = 2
    num_joints = 4
    num_dims = 3
    seq_length = 3
    window_size = 5
    B = 2

    key = jax.random.PRNGKey(0)
    kp, kx, kd = jax.random.split(key, 3)
    raw = init_params(kp, input_dim, d_model, num_encoder_layers,
                      num_joints, num_dims, seq_length, window_size)
    params = prepare_params(raw, nhead=nhead, d_model=d_model)

    x = jax.random.normal(kx, (B, input_dim), jnp.float32)
    decoder_input = jax.random.normal(
        kd, (B, seq_length, num_joints * num_dims), jnp.float32)

    fwd = jax.jit(functools.partial(forward, nhead=nhead,
                                    window_size=window_size))
    out = fwd(params, x, decoder_input)
    jax.block_until_ready(out)

    assert out.shape == (B, window_size, num_joints * num_dims), out.shape
    assert out.dtype == jnp.float32
    print("KERNEL_OK")
</pallas_src>

<mosaic_0001>
module attributes {stable_mosaic.version = 11 : i64} {
  func.func @_fused_forward_kernel(%arg0: memref<6x24xbf16, #tpu.memory_space<vmem>>, %arg1: memref<6x2xbf16, #tpu.memory_space<vmem>>, %arg2: memref<24x32xf32, #tpu.memory_space<vmem>>, %arg3: memref<24x6xf32, #tpu.memory_space<vmem>>, %arg4: memref<24x6xbf16, #tpu.memory_space<vmem>>, %arg5: memref<1x32xf32, #tpu.memory_space<vmem>>, %arg6: memref<32x32xbf16, #tpu.memory_space<vmem>>, %arg7: memref<1x128xf32, #tpu.memory_space<vmem>>, %arg8: memref<32x128xbf16, #tpu.memory_space<vmem>>, %arg9: memref<1x32xf32, #tpu.memory_space<vmem>>, %arg10: memref<128x32xbf16, #tpu.memory_space<vmem>>, %arg11: memref<1x32xf32, #tpu.memory_space<vmem>>, %arg12: memref<32x32xbf16, #tpu.memory_space<vmem>>, %arg13: memref<1x32xf32, #tpu.memory_space<vmem>>, %arg14: memref<1x32xf32, #tpu.memory_space<vmem>>, %arg15: memref<1x32xf32, #tpu.memory_space<vmem>>, %arg16: memref<1x32xf32, #tpu.memory_space<vmem>>, %arg17: memref<1x32xf32, #tpu.memory_space<vmem>>, %arg18: memref<32x32xbf16, #tpu.memory_space<vmem>>, %arg19: memref<1x32xf32, #tpu.memory_space<vmem>>, %arg20: memref<32x32xbf16, #tpu.memory_space<vmem>>, %arg21: memref<1x32xf32, #tpu.memory_space<vmem>>, %arg22: memref<32x32xbf16, #tpu.memory_space<vmem>>, %arg23: memref<1x32xf32, #tpu.memory_space<vmem>>, %arg24: memref<32x32xbf16, #tpu.memory_space<vmem>>, %arg25: memref<1x128xf32, #tpu.memory_space<vmem>>, %arg26: memref<32x128xbf16, #tpu.memory_space<vmem>>, %arg27: memref<1x32xf32, #tpu.memory_space<vmem>>, %arg28: memref<128x32xbf16, #tpu.memory_space<vmem>>, %arg29: memref<1x32xf32, #tpu.memory_space<vmem>>, %arg30: memref<32x32xbf16, #tpu.memory_space<vmem>>, %arg31: memref<1x32xf32, #tpu.memory_space<vmem>>, %arg32: memref<1x32xf32, #tpu.memory_space<vmem>>, %arg33: memref<1x32xf32, #tpu.memory_space<vmem>>, %arg34: memref<1x32xf32, #tpu.memory_space<vmem>>, %arg35: memref<1x32xf32, #tpu.memory_space<vmem>>, %arg36: memref<32x32xbf16, #tpu.memory_space<vmem>>, %arg37: memref<1x32xf32, #tpu.memory_space<vmem>>, %arg38: memref<32x32xbf16, #tpu.memory_space<vmem>>, %arg39: memref<1x32xf32, #tpu.memory_space<vmem>>, %arg40: memref<32x32xbf16, #tpu.memory_space<vmem>>, %arg41: memref<1x32xf32, #tpu.memory_space<vmem>>, %arg42: memref<12x32xbf16, #tpu.memory_space<vmem>>, %arg43: memref<1x128xf32, #tpu.memory_space<vmem>>, %arg44: memref<32x128xbf16, #tpu.memory_space<vmem>>, %arg45: memref<1x32xf32, #tpu.memory_space<vmem>>, %arg46: memref<128x32xbf16, #tpu.memory_space<vmem>>, %arg47: memref<1x32xf32, #tpu.memory_space<vmem>>, %arg48: memref<1x32xf32, #tpu.memory_space<vmem>>, %arg49: memref<1x32xf32, #tpu.memory_space<vmem>>, %arg50: memref<1x32xf32, #tpu.memory_space<vmem>>, %arg51: memref<1x32xf32, #tpu.memory_space<vmem>>, %arg52: memref<32x32xbf16, #tpu.memory_space<vmem>>, %arg53: memref<1x128xf32, #tpu.memory_space<vmem>>, %arg54: memref<32x128xbf16, #tpu.memory_space<vmem>>, %arg55: memref<1x32xf32, #tpu.memory_space<vmem>>, %arg56: memref<128x32xbf16, #tpu.memory_space<vmem>>, %arg57: memref<1x32xf32, #tpu.memory_space<vmem>>, %arg58: memref<1x32xf32, #tpu.memory_space<vmem>>, %arg59: memref<1x32xf32, #tpu.memory_space<vmem>>, %arg60: memref<1x32xf32, #tpu.memory_space<vmem>>, %arg61: memref<1x32xf32, #tpu.memory_space<vmem>>, %arg62: memref<32x32xbf16, #tpu.memory_space<vmem>>, %arg63: memref<1x32xf32, #tpu.memory_space<vmem>>, %arg64: memref<12x32xbf16, #tpu.memory_space<vmem>>, %arg65: memref<1x32xf32, #tpu.memory_space<vmem>>, %arg66: memref<64x32xbf16, #tpu.memory_space<vmem>>, %arg67: memref<1x12xf32, #tpu.memory_space<vmem>>, %arg68: memref<32x12xbf16, #tpu.memory_space<vmem>>, %arg69: memref<1x64xf32, #tpu.memory_space<vmem>>, %arg70: memref<1x64xf32, #tpu.memory_space<vmem>>, %arg71: memref<1x64xf32, #tpu.memory_space<vmem>>, %arg72: memref<1x64xf32, #tpu.memory_space<vmem>>, %arg73: memref<1x64xf32, #tpu.memory_space<vmem>>, %arg74: memref<1x64xf32, #tpu.memory_space<vmem>>, %arg75: memref<1x64xf32, #tpu.memory_space<vmem>>, %arg76: memref<32x64xbf16, #tpu.memory_space<vmem>>, %arg77: memref<32x64xbf16, #tpu.memory_space<vmem>>, %arg78: memref<32x64xbf16, #tpu.memory_space<vmem>>, %arg79: memref<32x64xbf16, #tpu.memory_space<vmem>>, %arg80: memref<32x64xbf16, #tpu.memory_space<vmem>>, %arg81: memref<32x64xbf16, #tpu.memory_space<vmem>>, %arg82: memref<32x64xbf16, #tpu.memory_space<vmem>>, %arg83: memref<32x64xbf16, #tpu.memory_space<vmem>>, %arg84: memref<32x64xbf16, #tpu.memory_space<vmem>>, %arg85: memref<32x64xbf16, #tpu.memory_space<vmem>>, %arg86: memref<32x64xbf16, #tpu.memory_space<vmem>>, %arg87: memref<32x64xbf16, #tpu.memory_space<vmem>>, %arg88: memref<32x64xbf16, #tpu.memory_space<vmem>>, %arg89: memref<32x64xbf16, #tpu.memory_space<vmem>>, %arg90: memref<32x64xbf16, #tpu.memory_space<vmem>>, %arg91: memref<2x12xf32, #tpu.memory_space<vmem>>, %arg92: memref<6x12xf32, #tpu.memory_space<vmem>>, %arg93: memref<10x12xf32, #tpu.memory_space<vmem>>) attributes {dimension_semantics = [], scalar_prefetch = 0 : i64, scratch_operands = 0 : i64, tpu.core_type = #tpu.core_type<tc>} {
    %c0 = arith.constant 0 : index
    %c0_0 = arith.constant 0 : index
    %0 = vector.load %arg91[%c0, %c0_0] : memref<2x12xf32, #tpu.memory_space<vmem>>, vector<2x12xf32>
    %c0_1 = arith.constant 0 : index
    %c0_2 = arith.constant 0 : index
    %1 = vector.load %arg64[%c0_1, %c0_2] : memref<12x32xbf16, #tpu.memory_space<vmem>>, vector<12x32xbf16>
    %2 = arith.truncf %0 : vector<2x12xf32> to vector<2x12xbf16>
    %cst = arith.constant dense<0.000000e+00> : vector<2x32xf32>
    %3 = tpu.matmul %2, %1, %cst {dimension_numbers = #tpu.dot_dimension_numbers<[1], [0], [0], [1], [0, 0, 1, 1], [], []>} : vector<2x12xbf16>, vector<12x32xbf16>, vector<2x32xf32> -> vector<2x32xf32>
    %c0_3 = arith.constant 0 : index
    %c0_4 = arith.constant 0 : index
    %4 = vector.load %arg63[%c0_3, %c0_4] : memref<1x32xf32, #tpu.memory_space<vmem>>, vector<1x32xf32>
    %5 = vector.broadcast %4 : vector<1x32xf32> to vector<2x32xf32>
    %6 = arith.addf %3, %5 : vector<2x32xf32>
    %cst_5 = arith.constant dense<0.000000e+00> : vector<2xf32>
    %7 = vector.multi_reduction <add>, %6, %cst_5 [1] : vector<2x32xf32> to vector<2xf32>
    %8 = vector.shape_cast %7 : vector<2xf32> to vector<2x1xf32>
    %cst_6 = arith.constant 3.200000e+01 : f32
    %9 = vector.broadcast %cst_6 : f32 to vector<2x1xf32>
    %10 = arith.divf %8, %9 : vector<2x1xf32>
    %11 = vector.broadcast %10 : vector<2x1xf32> to vector<2x32xf32>
    %12 = arith.subf %6, %11 : vector<2x32xf32>
    %13 = arith.mulf %12, %12 : vector<2x32xf32>
    %cst_7 = arith.constant dense<0.000000e+00> : vector<2xf32>
    %14 = vector.multi_reduction <add>, %13, %cst_7 [1] : vector<2x32xf32> to vector<2xf32>
    %15 = vector.shape_cast %14 : vector<2xf32> to vector<2x1xf32>
    %cst_8 = arith.constant 3.200000e+01 : f32
    %16 = vector.broadcast %cst_8 : f32 to vector<2x1xf32>
    %17 = arith.divf %15, %16 : vector<2x1xf32>
    %cst_9 = arith.constant 9.99999974E-6 : f32
    %18 = vector.broadcast %cst_9 : f32 to vector<2x1xf32>
    %19 = arith.addf %17, %18 : vector<2x1xf32>
    %20 = math.rsqrt %19 : vector<2x1xf32>
    %21 = vector.broadcast %20 : vector<2x1xf32> to vector<2x32xf32>
    %22 = arith.mulf %12, %21 : vector<2x32xf32>
    %c0_10 = arith.constant 0 : index
    %c0_11 = arith.constant 0 : index
    %23 = vector.load %arg48[%c0_10, %c0_11] : memref<1x32xf32, #tpu.memory_space<vmem>>, vector<1x32xf32>
    %24 = vector.broadcast %23 : vector<1x32xf32> to vector<2x32xf32>
    %25 = arith.mulf %22, %24 : vector<2x32xf32>
    %c0_12 = arith.constant 0 : index
    %c0_13 = arith.constant 0 : index
    %26 = vector.load %arg47[%c0_12, %c0_13] : memref<1x32xf32, #tpu.memory_space<vmem>>, vector<1x32xf32>
    %27 = vector.broadcast %26 : vector<1x32xf32> to vector<2x32xf32>
    %28 = arith.addf %25, %27 : vector<2x32xf32>
    %c0_14 = arith.constant 0 : index
    %c0_15 = arith.constant 0 : index
    %29 = vector.load %arg52[%c0_14, %c0_15] : memref<32x32xbf16, #tpu.memory_space<vmem>>, vector<32x32xbf16>
    %30 = arith.truncf %28 : vector<2x32xf32> to vector<2x32xbf16>
    %cst_16 = arith.constant dense<0.000000e+00> : vector<2x32xf32>
    %31 = tpu.matmul %30, %29, %cst_16 {dimension_numbers = #tpu.dot_dimension_numbers<[1], [0], [0], [1], [0, 0, 1, 1], [], []>} : vector<2x32xbf16>, vector<32x32xbf16>, vector<2x32xf32> -> vector<2x32xf32>
    %c0_17 = arith.constant 0 : index
    %c0_18 = arith.constant 0 : index
    %32 = vector.load %arg51[%c0_17, %c0_18] : memref<1x32xf32, #tpu.memory_space<vmem>>, vector<1x32xf32>
    %33 = vector.broadcast %32 : vector<1x32xf32> to vector<2x32xf32>
    %34 = arith.addf %31, %33 : vector<2x32xf32>
    %35 = arith.addf %6, %34 : vector<2x32xf32>
    %cst_19 = arith.constant dense<0.000000e+00> : vector<2xf32>
    %36 = vector.multi_reduction <add>, %35, %cst_19 [1] : vector<2x32xf32> to vector<2xf32>
    %37 = vector.shape_cast %36 : vector<2xf32> to vector<2x1xf32>
    %cst_20 = arith.constant 3.200000e+01 : f32
    %38 = vector.broadcast %cst_20 : f32 to vector<2x1xf32>
    %39 = arith.divf %37, %38 : vector<2x1xf32>
    %40 = vector.broadcast %39 : vector<2x1xf32> to vector<2x32xf32>
    %41 = arith.subf %35, %40 : vector<2x32xf32>
    %42 = arith.mulf %41, %41 : vector<2x32xf32>
    %cst_21 = arith.constant dense<0.000000e+00> : vector<2xf32>
    %43 = vector.multi_reduction <add>, %42, %cst_21 [1] : vector<2x32xf32> to vector<2xf32>
    %44 = vector.shape_cast %43 : vector<2xf32> to vector<2x1xf32>
    %cst_22 = arith.constant 3.200000e+01 : f32
    %45 = vector.broadcast %cst_22 : f32 to vector<2x1xf32>
    %46 = arith.divf %44, %45 : vector<2x1xf32>
    %cst_23 = arith.constant 9.99999974E-6 : f32
    %47 = vector.broadcast %cst_23 : f32 to vector<2x1xf32>
    %48 = arith.addf %46, %47 : vector<2x1xf32>
    %49 = math.rsqrt %48 : vector<2x1xf32>
    %50 = vector.broadcast %49 : vector<2x1xf32> to vector<2x32xf32>
    %51 = arith.mulf %41, %50 : vector<2x32xf32>
    %c0_24 = arith.constant 0 : index
    %c0_25 = arith.constant 0 : index
    %52 = vector.load %arg50[%c0_24, %c0_25] : memref<1x32xf32, #tpu.memory_space<vmem>>, vector<1x32xf32>
    %53 = vector.broadcast %52 : vector<1x32xf32> to vector<2x32xf32>
    %54 = arith.mulf %51, %53 : vector<2x32xf32>
    %c0_26 = arith.constant 0 : index
    %c0_27 = arith.constant 0 : index
    %55 = vector.load %arg49[%c0_26, %c0_27] : memref<1x32xf32, #tpu.memory_space<vmem>>, vector<1x32xf32>
    %56 = vector.broadcast %55 : vector<1x32xf32> to vector<2x32xf32>
    %57 = arith.addf %54, %56 : vector<2x32xf32>
    %c0_28 = arith.constant 0 : index
    %c0_29 = arith.constant 0 : index
    %58 = vector.load %arg44[%c0_28, %c0_29] : memref<32x128xbf16, #tpu.memory_space<vmem>>, vector<32x128xbf16>
    %59 = arith.truncf %57 : vector<2x32xf32> to vector<2x32xbf16>
    %cst_30 = arith.constant dense<0.000000e+00> : vector<2x128xf32>
    %60 = tpu.matmul %59, %58, %cst_30 {dimension_numbers = #tpu.dot_dimension_numbers<[1], [0], [0], [1], [0, 0, 1, 1], [], []>} : vector<2x32xbf16>, vector<32x128xbf16>, vector<2x128xf32> -> vector<2x128xf32>
    %c0_31 = arith.constant 0 : index
    %c0_32 = arith.constant 0 : index
    %61 = vector.load %arg43[%c0_31, %c0_32] : memref<1x128xf32, #tpu.memory_space<vmem>>, vector<1x128xf32>
    %62 = vector.broadcast %61 : vector<1x128xf32> to vector<2x128xf32>
    %63 = arith.addf %60, %62 : vector<2x128xf32>
    %cst_33 = arith.constant 0.000000e+00 : f32
    %64 = vector.broadcast %cst_33 : f32 to vector<2x128xf32>
    %65 = arith.maximumf %63, %64 : vector<2x128xf32>
    %c0_34 = arith.constant 0 : index
    %c0_35 = arith.constant 0 : index
    %66 = vector.load %arg46[%c0_34, %c0_35] : memref<128x32xbf16, #tpu.memory_space<vmem>>, vector<128x32xbf16>
    %67 = arith.truncf %65 : vector<2x128xf32> to vector<2x128xbf16>
    %cst_36 = arith.constant dense<0.000000e+00> : vector<2x32xf32>
    %68 = tpu.matmul %67, %66, %cst_36 {dimension_numbers = #tpu.dot_dimension_numbers<[1], [0], [0], [1], [0, 0, 1, 1], [], []>} : vector<2x128xbf16>, vector<128x32xbf16>, vector<2x32xf32> -> vector<2x32xf32>
    %c0_37 = arith.constant 0 : index
    %c0_38 = arith.constant 0 : index
    %69 = vector.load %arg45[%c0_37, %c0_38] : memref<1x32xf32, #tpu.memory_space<vmem>>, vector<1x32xf32>
    %70 = vector.broadcast %69 : vector<1x32xf32> to vector<2x32xf32>
    %71 = arith.addf %68, %70 : vector<2x32xf32>
    %72 = arith.addf %35, %71 : vector<2x32xf32>
    %cst_39 = arith.constant dense<0.000000e+00> : vector<2xf32>
    %73 = vector.multi_reduction <add>, %72, %cst_39 [1] : vector<2x32xf32> to vector<2xf32>
    %74 = vector.shape_cast %73 : vector<2xf32> to vector<2x1xf32>
    %cst_40 = arith.constant 3.200000e+01 : f32
    %75 = vector.broadcast %cst_40 : f32 to vector<2x1xf32>
    %76 = arith.divf %74, %75 : vector<2x1xf32>
    %77 = vector.broadcast %76 : vector<2x1xf32> to vector<2x32xf32>
    %78 = arith.subf %72, %77 : vector<2x32xf32>
    %79 = arith.mulf %78, %78 : vector<2x32xf32>
    %cst_41 = arith.constant dense<0.000000e+00> : vector<2xf32>
    %80 = vector.multi_reduction <add>, %79, %cst_41 [1] : vector<2x32xf32> to vector<2xf32>
    %81 = vector.shape_cast %80 : vector<2xf32> to vector<2x1xf32>
    %cst_42 = arith.constant 3.200000e+01 : f32
    %82 = vector.broadcast %cst_42 : f32 to vector<2x1xf32>
    %83 = arith.divf %81, %82 : vector<2x1xf32>
    %cst_43 = arith.constant 9.99999974E-6 : f32
    %84 = vector.broadcast %cst_43 : f32 to vector<2x1xf32>
    %85 = arith.addf %83, %84 : vector<2x1xf32>
    %86 = math.rsqrt %85 : vector<2x1xf32>
    %87 = vector.broadcast %86 : vector<2x1xf32> to vector<2x32xf32>
    %88 = arith.mulf %78, %87 : vector<2x32xf32>
    %c0_44 = arith.constant 0 : index
    %c0_45 = arith.constant 0 : index
    %89 = vector.load %arg58[%c0_44, %c0_45] : memref<1x32xf32, #tpu.memory_space<vmem>>, vector<1x32xf32>
    %90 = vector.broadcast %89 : vector<1x32xf32> to vector<2x32xf32>
    %91 = arith.mulf %88, %90 : vector<2x32xf32>
    %c0_46 = arith.constant 0 : index
    %c0_47 = arith.constant 0 : index
    %92 = vector.load %arg57[%c0_46, %c0_47] : memref<1x32xf32, #tpu.memory_space<vmem>>, vector<1x32xf32>
    %93 = vector.broadcast %92 : vector<1x32xf32> to vector<2x32xf32>
    %94 = arith.addf %91, %93 : vector<2x32xf32>
    %c0_48 = arith.constant 0 : index
    %c0_49 = arith.constant 0 : index
    %95 = vector.load %arg62[%c0_48, %c0_49] : memref<32x32xbf16, #tpu.memory_space<vmem>>, vector<32x32xbf16>
    %96 = arith.truncf %94 : vector<2x32xf32> to vector<2x32xbf16>
    %cst_50 = arith.constant dense<0.000000e+00> : vector<2x32xf32>
    %97 = tpu.matmul %96, %95, %cst_50 {dimension_numbers = #tpu.dot_dimension_numbers<[1], [0], [0], [1], [0, 0, 1, 1], [], []>} : vector<2x32xbf16>, vector<32x32xbf16>, vector<2x32xf32> -> vector<2x32xf32>
    %c0_51 = arith.constant 0 : index
    %c0_52 = arith.constant 0 : index
    %98 = vector.load %arg61[%c0_51, %c0_52] : memref<1x32xf32, #tpu.memory_space<vmem>>, vector<1x32xf32>
    %99 = vector.broadcast %98 : vector<1x32xf32> to vector<2x32xf32>
    %100 = arith.addf %97, %99 : vector<2x32xf32>
    %101 = arith.addf %72, %100 : vector<2x32xf32>
    %cst_53 = arith.constant dense<0.000000e+00> : vector<2xf32>
    %102 = vector.multi_reduction <add>, %101, %cst_53 [1] : vector<2x32xf32> to vector<2xf32>
    %103 = vector.shape_cast %102 : vector<2xf32> to vector<2x1xf32>
    %cst_54 = arith.constant 3.200000e+01 : f32
    %104 = vector.broadcast %cst_54 : f32 to vector<2x1xf32>
    %105 = arith.divf %103, %104 : vector<2x1xf32>
    %106 = vector.broadcast %105 : vector<2x1xf32> to vector<2x32xf32>
    %107 = arith.subf %101, %106 : vector<2x32xf32>
    %108 = arith.mulf %107, %107 : vector<2x32xf32>
    %cst_55 = arith.constant dense<0.000000e+00> : vector<2xf32>
    %109 = vector.multi_reduction <add>, %108, %cst_55 [1] : vector<2x32xf32> to vector<2xf32>
    %110 = vector.shape_cast %109 : vector<2xf32> to vector<2x1xf32>
    %cst_56 = arith.constant 3.200000e+01 : f32
    %111 = vector.broadcast %cst_56 : f32 to vector<2x1xf32>
    %112 = arith.divf %110, %111 : vector<2x1xf32>
    %cst_57 = arith.constant 9.99999974E-6 : f32
    %113 = vector.broadcast %cst_57 : f32 to vector<2x1xf32>
    %114 = arith.addf %112, %113 : vector<2x1xf32>
    %115 = math.rsqrt %114 : vector<2x1xf32>
    %116 = vector.broadcast %115 : vector<2x1xf32> to vector<2x32xf32>
    %117 = arith.mulf %107, %116 : vector<2x32xf32>
    %c0_58 = arith.constant 0 : index
    %c0_59 = arith.constant 0 : index
    %118 = vector.load %arg60[%c0_58, %c0_59] : memref<1x32xf32, #tpu.memory_space<vmem>>, vector<1x32xf32>
    %119 = vector.broadcast %118 : vector<1x32xf32> to vector<2x32xf32>
    %120 = arith.mulf %117, %119 : vector<2x32xf32>
    %c0_60 = arith.constant 0 : index
    %c0_61 = arith.constant 0 : index
    %121 = vector.load %arg59[%c0_60, %c0_61] : memref<1x32xf32, #tpu.memory_space<vmem>>, vector<1x32xf32>
    %122 = vector.broadcast %121 : vector<1x32xf32> to vector<2x32xf32>
    %123 = arith.addf %120, %122 : vector<2x32xf32>
    %c0_62 = arith.constant 0 : index
    %c0_63 = arith.constant 0 : index
    %124 = vector.load %arg54[%c0_62, %c0_63] : memref<32x128xbf16, #tpu.memory_space<vmem>>, vector<32x128xbf16>
    %125 = arith.truncf %123 : vector<2x32xf32> to vector<2x32xbf16>
    %cst_64 = arith.constant dense<0.000000e+00> : vector<2x128xf32>
    %126 = tpu.matmul %125, %124, %cst_64 {dimension_numbers = #tpu.dot_dimension_numbers<[1], [0], [0], [1], [0, 0, 1, 1], [], []>} : vector<2x32xbf16>, vector<32x128xbf16>, vector<2x128xf32> -> vector<2x128xf32>
    %c0_65 = arith.constant 0 : index
    %c0_66 = arith.constant 0 : index
    %127 = vector.load %arg53[%c0_65, %c0_66] : memref<1x128xf32, #tpu.memory_space<vmem>>, vector<1x128xf32>
    %128 = vector.broadcast %127 : vector<1x128xf32> to vector<2x128xf32>
    %129 = arith.addf %126, %128 : vector<2x128xf32>
    %cst_67 = arith.constant 0.000000e+00 : f32
    %130 = vector.broadcast %cst_67 : f32 to vector<2x128xf32>
    %131 = arith.maximumf %129, %130 : vector<2x128xf32>
    %c0_68 = arith.constant 0 : index
    %c0_69 = arith.constant 0 : index
    %132 = vector.load %arg56[%c0_68, %c0_69] : memref<128x32xbf16, #tpu.memory_space<vmem>>, vector<128x32xbf16>
    %133 = arith.truncf %131 : vector<2x128xf32> to vector<2x128xbf16>
    %cst_70 = arith.constant dense<0.000000e+00> : vector<2x32xf32>
    %134 = tpu.matmul %133, %132, %cst_70 {dimension_numbers = #tpu.dot_dimension_numbers<[1], [0], [0], [1], [0, 0, 1, 1], [], []>} : vector<2x128xbf16>, vector<128x32xbf16>, vector<2x32xf32> -> vector<2x32xf32>
    %c0_71 = arith.constant 0 : index
    %c0_72 = arith.constant 0 : index
    %135 = vector.load %arg55[%c0_71, %c0_72] : memref<1x32xf32, #tpu.memory_space<vmem>>, vector<1x32xf32>
    %136 = vector.broadcast %135 : vector<1x32xf32> to vector<2x32xf32>
    %137 = arith.addf %134, %136 : vector<2x32xf32>
    %138 = arith.addf %101, %137 : vector<2x32xf32>
    %c0_73 = arith.constant 0 : index
    %c0_74 = arith.constant 0 : index
    %139 = vector.load %arg1[%c0_73, %c0_74] : memref<6x2xbf16, #tpu.memory_space<vmem>>, vector<6x2xbf16>
    %140 = arith.truncf %138 : vector<2x32xf32> to vector<2x32xbf16>
    %cst_75 = arith.constant dense<0.000000e+00> : vector<6x32xf32>
    %141 = tpu.matmul %139, %140, %cst_75 {dimension_numbers = #tpu.dot_dimension_numbers<[1], [0], [0], [1], [0, 0, 1, 1], [], []>} : vector<6x2xbf16>, vector<2x32xbf16>, vector<6x32xf32> -> vector<6x32xf32>
    %c0_76 = arith.constant 0 : index
    %c0_77 = arith.constant 0 : index
    %142 = vector.load %arg92[%c0_76, %c0_77] : memref<6x12xf32, #tpu.memory_space<vmem>>, vector<6x12xf32>
    %c0_78 = arith.constant 0 : index
    %c0_79 = arith.constant 0 : index
    %143 = vector.load %arg42[%c0_78, %c0_79] : memref<12x32xbf16, #tpu.memory_space<vmem>>, vector<12x32xbf16>
    %144 = arith.truncf %142 : vector<6x12xf32> to vector<6x12xbf16>
    %cst_80 = arith.constant dense<0.000000e+00> : vector<6x32xf32>
    %145 = tpu.matmul %144, %143, %cst_80 {dimension_numbers = #tpu.dot_dimension_numbers<[1], [0], [0], [1], [0, 0, 1, 1], [], []>} : vector<6x12xbf16>, vector<12x32xbf16>, vector<6x32xf32> -> vector<6x32xf32>
    %c0_81 = arith.constant 0 : index
    %c0_82 = arith.constant 0 : index
    %146 = vector.load %arg41[%c0_81, %c0_82] : memref<1x32xf32, #tpu.memory_space<vmem>>, vector<1x32xf32>
    %147 = vector.broadcast %146 : vector<1x32xf32> to vector<6x32xf32>
    %148 = arith.addf %145, %147 : vector<6x32xf32>
    %cst_83 = arith.constant dense<0.000000e+00> : vector<6xf32>
    %149 = vector.multi_reduction <add>, %148, %cst_83 [1] : vector<6x32xf32> to vector<6xf32>
    %150 = vector.shape_cast %149 : vector<6xf32> to vector<6x1xf32>
    %cst_84 = arith.constant 3.200000e+01 : f32
    %151 = vector.broadcast %cst_84 : f32 to vector<6x1xf32>
    %152 = arith.divf %150, %151 : vector<6x1xf32>
    %153 = vector.broadcast %152 : vector<6x1xf32> to vector<6x32xf32>
    %154 = arith.subf %148, %153 : vector<6x32xf32>
    %155 = arith.mulf %154, %154 : vector<6x32xf32>
    %cst_85 = arith.constant dense<0.000000e+00> : vector<6xf32>
    %156 = vector.multi_reduction <add>, %155, %cst_85 [1] : vector<6x32xf32> to vector<6xf32>
    %157 = vector.shape_cast %156 : vector<6xf32> to vector<6x1xf32>
    %cst_86 = arith.constant 3.200000e+01 : f32
    %158 = vector.broadcast %cst_86 : f32 to vector<6x1xf32>
    %159 = arith.divf %157, %158 : vector<6x1xf32>
    %cst_87 = arith.constant 9.99999974E-6 : f32
    %160 = vector.broadcast %cst_87 : f32 to vector<6x1xf32>
    %161 = arith.addf %159, %160 : vector<6x1xf32>
    %162 = math.rsqrt %161 : vector<6x1xf32>
    %163 = vector.broadcast %162 : vector<6x1xf32> to vector<6x32xf32>
    %164 = arith.mulf %154, %163 : vector<6x32xf32>
    %c0_88 = arith.constant 0 : index
    %c0_89 = arith.constant 0 : index
    %165 = vector.load %arg14[%c0_88, %c0_89] : memref<1x32xf32, #tpu.memory_space<vmem>>, vector<1x32xf32>
    %166 = vector.broadcast %165 : vector<1x32xf32> to vector<6x32xf32>
    %167 = arith.mulf %164, %166 : vector<6x32xf32>
    %c0_90 = arith.constant 0 : index
    %c0_91 = arith.constant 0 : index
    %168 = vector.load %arg13[%c0_90, %c0_91] : memref<1x32xf32, #tpu.memory_space<vmem>>, vector<1x32xf32>
    %169 = vector.broadcast %168 : vector<1x32xf32> to vector<6x32xf32>
    %170 = arith.addf %167, %169 : vector<6x32xf32>
    %c0_92 = arith.constant 0 : index
    %c0_93 = arith.constant 0 : index
    %171 = vector.load %arg20[%c0_92, %c0_93] : memref<32x32xbf16, #tpu.memory_space<vmem>>, vector<32x32xbf16>
    %172 = arith.truncf %170 : vector<6x32xf32> to vector<6x32xbf16>
    %cst_94 = arith.constant dense<0.000000e+00> : vector<6x32xf32>
    %173 = tpu.matmul %172, %171, %cst_94 {dimension_numbers = #tpu.dot_dimension_numbers<[1], [0], [0], [1], [0, 0, 1, 1], [], []>} : vector<6x32xbf16>, vector<32x32xbf16>, vector<6x32xf32> -> vector<6x32xf32>
    %c0_95 = arith.constant 0 : index
    %c0_96 = arith.constant 0 : index
    %174 = vector.load %arg19[%c0_95, %c0_96] : memref<1x32xf32, #tpu.memory_space<vmem>>, vector<1x32xf32>
    %175 = vector.broadcast %174 : vector<1x32xf32> to vector<6x32xf32>
    %176 = arith.addf %173, %175 : vector<6x32xf32>
    %c0_97 = arith.constant 0 : index
    %c0_98 = arith.constant 0 : index
    %177 = vector.load %arg12[%c0_97, %c0_98] : memref<32x32xbf16, #tpu.memory_space<vmem>>, vector<32x32xbf16>
    %178 = arith.truncf %170 : vector<6x32xf32> to vector<6x32xbf16>
    %cst_99 = arith.constant dense<0.000000e+00> : vector<6x32xf32>
    %179 = tpu.matmul %178, %177, %cst_99 {dimension_numbers = #tpu.dot_dimension_numbers<[1], [0], [0], [1], [0, 0, 1, 1], [], []>} : vector<6x32xbf16>, vector<32x32xbf16>, vector<6x32xf32> -> vector<6x32xf32>
    %c0_100 = arith.constant 0 : index
    %c0_101 = arith.constant 0 : index
    %180 = vector.load %arg11[%c0_100, %c0_101] : memref<1x32xf32, #tpu.memory_space<vmem>>, vector<1x32xf32>
    %181 = vector.broadcast %180 : vector<1x32xf32> to vector<6x32xf32>
    %182 = arith.addf %179, %181 : vector<6x32xf32>
    %c0_102 = arith.constant 0 : index
    %c0_103 = arith.constant 0 : index
    %183 = vector.load %arg22[%c0_102, %c0_103] : memref<32x32xbf16, #tpu.memory_space<vmem>>, vector<32x32xbf16>
    %184 = arith.truncf %170 : vector<6x32xf32> to vector<6x32xbf16>
    %cst_104 = arith.constant dense<0.000000e+00> : vector<6x32xf32>
    %185 = tpu.matmul %184, %183, %cst_104 {dimension_numbers = #tpu.dot_dimension_numbers<[1], [0], [0], [1], [0, 0, 1, 1], [], []>} : vector<6x32xbf16>, vector<32x32xbf16>, vector<6x32xf32> -> vector<6x32xf32>
    %c0_105 = arith.constant 0 : index
    %c0_106 = arith.constant 0 : index
    %186 = vector.load %arg21[%c0_105, %c0_106] : memref<1x32xf32, #tpu.memory_space<vmem>>, vector<1x32xf32>
    %187 = vector.broadcast %186 : vector<1x32xf32> to vector<6x32xf32>
    %188 = arith.addf %185, %187 : vector<6x32xf32>
    %c0_107 = arith.constant 0 : index
    %c0_108 = arith.constant 0 : index
    %189 = vector.load %arg4[%c0_107, %c0_108] : memref<24x6xbf16, #tpu.memory_space<vmem>>, vector<24x6xbf16>
    %190 = arith.truncf %176 : vector<6x32xf32> to vector<6x32xbf16>
    %cst_109 = arith.constant dense<0.000000e+00> : vector<24x32xf32>
    %191 = tpu.matmul %189, %190, %cst_109 {dimension_numbers = #tpu.dot_dimension_numbers<[1], [0], [0], [1], [0, 0, 1, 1], [], []>} : vector<24x6xbf16>, vector<6x32xbf16>, vector<24x32xf32> -> vector<24x32xf32>
    %c0_110 = arith.constant 0 : index
    %c0_111 = arith.constant 0 : index
    %192 = vector.load %arg2[%c0_110, %c0_111] : memref<24x32xf32, #tpu.memory_space<vmem>>, vector<24x32xf32>
    %193 = arith.mulf %191, %192 : vector<24x32xf32>
    %194 = arith.truncf %193 : vector<24x32xf32> to vector<24x32xbf16>
    %195 = arith.truncf %182 : vector<6x32xf32> to vector<6x32xbf16>
    %cst_112 = arith.constant dense<0.000000e+00> : vector<24x6xf32>
    %196 = tpu.matmul %194, %195, %cst_112 {dimension_numbers = #tpu.dot_dimension_numbers<[1], [1], [0], [0], [0, 0, 1, 0], [], []>} : vector<24x32xbf16>, vector<6x32xbf16>, vector<24x6xf32> -> vector<24x6xf32>
    %197 = math.exp %196 : vector<24x6xf32>
    %c0_113 = arith.constant 0 : index
    %c0_114 = arith.constant 0 : index
    %198 = vector.load %arg3[%c0_113, %c0_114] : memref<24x6xf32, #tpu.memory_space<vmem>>, vector<24x6xf32>
    %199 = arith.mulf %197, %198 : vector<24x6xf32>
    %cst_115 = arith.constant dense<0.000000e+00> : vector<24xf32>
    %200 = vector.multi_reduction <add>, %199, %cst_115 [1] : vector<24x6xf32> to vector<24xf32>
    %201 = vector.shape_cast %200 : vector<24xf32> to vector<24x1xf32>
    %202 = tpu.reciprocal %201 {approx = true} : vector<24x1xf32> -> vector<24x1xf32>
    %203 = vector.broadcast %202 : vector<24x1xf32> to vector<24x6xf32>
    %204 = arith.mulf %199, %203 : vector<24x6xf32>
    %205 = arith.truncf %204 : vector<24x6xf32> to vector<24x6xbf16>
    %206 = arith.truncf %188 : vector<6x32xf32> to vector<6x32xbf16>
    %cst_116 = arith.constant dense<0.000000e+00> : vector<24x32xf32>
    %207 = tpu.matmul %205, %206, %cst_116 {dimension_numbers = #tpu.dot_dimension_numbers<[1], [0], [0], [1], [0, 0, 1, 1], [], []>} : vector<24x6xbf16>, vector<6x32xbf16>, vector<24x32xf32> -> vector<24x32xf32>
    %c0_117 = arith.constant 0 : index
    %c0_118 = arith.constant 0 : index
    %208 = vector.load %arg2[%c0_117, %c0_118] : memref<24x32xf32, #tpu.memory_space<vmem>>, vector<24x32xf32>
    %209 = arith.mulf %207, %208 : vector<24x32xf32>
    %c0_119 = arith.constant 0 : index
    %c0_120 = arith.constant 0 : index
    %210 = vector.load %arg0[%c0_119, %c0_120] : memref<6x24xbf16, #tpu.memory_space<vmem>>, vector<6x24xbf16>
    %211 = arith.truncf %209 : vector<24x32xf32> to vector<24x32xbf16>
    %cst_121 = arith.constant dense<0.000000e+00> : vector<6x32xf32>
    %212 = tpu.matmul %210, %211, %cst_121 {dimension_numbers = #tpu.dot_dimension_numbers<[1], [0], [0], [1], [0, 0, 1, 1], [], []>} : vector<6x24xbf16>, vector<24x32xbf16>, vector<6x32xf32> -> vector<6x32xf32>
    %c0_122 = arith.constant 0 : index
    %c0_123 = arith.constant 0 : index
    %213 = vector.load %arg18[%c0_122, %c0_123] : memref<32x32xbf16, #tpu.memory_space<vmem>>, vector<32x32xbf16>
    %214 = arith.truncf %212 : vector<6x32xf32> to vector<6x32xbf16>
    %cst_124 = arith.constant dense<0.000000e+00> : vector<6x32xf32>
    %215 = tpu.matmul %214, %213, %cst_124 {dimension_numbers = #tpu.dot_dimension_numbers<[1], [0], [0], [1], [0, 0, 1, 1], [], []>} : vector<6x32xbf16>, vector<32x32xbf16>, vector<6x32xf32> -> vector<6x32xf32>
    %c0_125 = arith.constant 0 : index
    %c0_126 = arith.constant 0 : index
    %216 = vector.load %arg17[%c0_125, %c0_126] : memref<1x32xf32, #tpu.memory_space<vmem>>, vector<1x32xf32>
    %217 = vector.broadcast %216 : vector<1x32xf32> to vector<6x32xf32>
    %218 = arith.addf %215, %217 : vector<6x32xf32>
    %219 = arith.addf %148, %218 : vector<6x32xf32>
    %c0_127 = arith.constant 0 : index
    %c0_128 = arith.constant 0 : index
    %220 = vector.load %arg6[%c0_127, %c0_128] : memref<32x32xbf16, #tpu.memory_space<vmem>>, vector<32x32xbf16>
    %221 = arith.truncf %141 : vector<6x32xf32> to vector<6x32xbf16>
    %cst_129 = arith.constant dense<0.000000e+00> : vector<6x32xf32>
    %222 = tpu.matmul %221, %220, %cst_129 {dimension_numbers = #tpu.dot_dimension_numbers<[1], [0], [0], [1], [0, 0, 1, 1], [], []>} : vector<6x32xbf16>, vector<32x32xbf16>, vector<6x32xf32> -> vector<6x32xf32>
    %c0_130 = arith.constant 0 : index
    %c0_131 = arith.constant 0 : index
    %223 = vector.load %arg5[%c0_130, %c0_131] : memref<1x32xf32, #tpu.memory_space<vmem>>, vector<1x32xf32>
    %224 = vector.broadcast %223 : vector<1x32xf32> to vector<6x32xf32>
    %225 = arith.addf %222, %224 : vector<6x32xf32>
    %226 = arith.addf %219, %225 : vector<6x32xf32>
    %cst_132 = arith.constant dense<0.000000e+00> : vector<6xf32>
    %227 = vector.multi_reduction <add>, %226, %cst_132 [1] : vector<6x32xf32> to vector<6xf32>
    %228 = vector.shape_cast %227 : vector<6xf32> to vector<6x1xf32>
    %cst_133 = arith.constant 3.200000e+01 : f32
    %229 = vector.broadcast %cst_133 : f32 to vector<6x1xf32>
    %230 = arith.divf %228, %229 : vector<6x1xf32>
    %231 = vector.broadcast %230 : vector<6x1xf32> to vector<6x32xf32>
    %232 = arith.subf %226, %231 : vector<6x32xf32>
    %233 = arith.mulf %232, %232 : vector<6x32xf32>
    %cst_134 = arith.constant dense<0.000000e+00> : vector<6xf32>
    %234 = vector.multi_reduction <add>, %233, %cst_134 [1] : vector<6x32xf32> to vector<6xf32>
    %235 = vector.shape_cast %234 : vector<6xf32> to vector<6x1xf32>
    %cst_135 = arith.constant 3.200000e+01 : f32
    %236 = vector.broadcast %cst_135 : f32 to vector<6x1xf32>
    %237 = arith.divf %235, %236 : vector<6x1xf32>
    %cst_136 = arith.constant 9.99999974E-6 : f32
    %238 = vector.broadcast %cst_136 : f32 to vector<6x1xf32>
    %239 = arith.addf %237, %238 : vector<6x1xf32>
    %240 = math.rsqrt %239 : vector<6x1xf32>
    %241 = vector.broadcast %240 : vector<6x1xf32> to vector<6x32xf32>
    %242 = arith.mulf %232, %241 : vector<6x32xf32>
    %c0_137 = arith.constant 0 : index
    %c0_138 = arith.constant 0 : index
    %243 = vector.load %arg16[%c0_137, %c0_138] : memref<1x32xf32, #tpu.memory_space<vmem>>, vector<1x32xf32>
    %244 = vector.broadcast %243 : vector<1x32xf32> to vector<6x32xf32>
    %245 = arith.mulf %242, %244 : vector<6x32xf32>
    %c0_139 = arith.constant 0 : index
    %c0_140 = arith.constant 0 : index
    %246 = vector.load %arg15[%c0_139, %c0_140] : memref<1x32xf32, #tpu.memory_space<vmem>>, vector<1x32xf32>
    %247 = vector.broadcast %246 : vector<1x32xf32> to vector<6x32xf32>
    %248 = arith.addf %245, %247 : vector<6x32xf32>
    %c0_141 = arith.constant 0 : index
    %c0_142 = arith.constant 0 : index
    %249 = vector.load %arg8[%c0_141, %c0_142] : memref<32x128xbf16, #tpu.memory_space<vmem>>, vector<32x128xbf16>
    %250 = arith.truncf %248 : vector<6x32xf32> to vector<6x32xbf16>
    %cst_143 = arith.constant dense<0.000000e+00> : vector<6x128xf32>
    %251 = tpu.matmul %250, %249, %cst_143 {dimension_numbers = #tpu.dot_dimension_numbers<[1], [0], [0], [1], [0, 0, 1, 1], [], []>} : vector<6x32xbf16>, vector<32x128xbf16>, vector<6x128xf32> -> vector<6x128xf32>
    %c0_144 = arith.constant 0 : index
    %c0_145 = arith.constant 0 : index
    %252 = vector.load %arg7[%c0_144, %c0_145] : memref<1x128xf32, #tpu.memory_space<vmem>>, vector<1x128xf32>
    %253 = vector.broadcast %252 : vector<1x128xf32> to vector<6x128xf32>
    %254 = arith.addf %251, %253 : vector<6x128xf32>
    %cst_146 = arith.constant 0.000000e+00 : f32
    %255 = vector.broadcast %cst_146 : f32 to vector<6x128xf32>
    %256 = arith.maximumf %254, %255 : vector<6x128xf32>
    %c0_147 = arith.constant 0 : index
    %c0_148 = arith.constant 0 : index
    %257 = vector.load %arg10[%c0_147, %c0_148] : memref<128x32xbf16, #tpu.memory_space<vmem>>, vector<128x32xbf16>
    %258 = arith.truncf %256 : vector<6x128xf32> to vector<6x128xbf16>
    %cst_149 = arith.constant dense<0.000000e+00> : vector<6x32xf32>
    %259 = tpu.matmul %258, %257, %cst_149 {dimension_numbers = #tpu.dot_dimension_numbers<[1], [0], [0], [1], [0, 0, 1, 1], [], []>} : vector<6x128xbf16>, vector<128x32xbf16>, vector<6x32xf32> -> vector<6x32xf32>
    %c0_150 = arith.constant 0 : index
    %c0_151 = arith.constant 0 : index
    %260 = vector.load %arg9[%c0_150, %c0_151] : memref<1x32xf32, #tpu.memory_space<vmem>>, vector<1x32xf32>
    %261 = vector.broadcast %260 : vector<1x32xf32> to vector<6x32xf32>
    %262 = arith.addf %259, %261 : vector<6x32xf32>
    %263 = arith.addf %226, %262 : vector<6x32xf32>
    %cst_152 = arith.constant dense<0.000000e+00> : vector<6xf32>
    %264 = vector.multi_reduction <add>, %263, %cst_152 [1] : vector<6x32xf32> to vector<6xf32>
    %265 = vector.shape_cast %264 : vector<6xf32> to vector<6x1xf32>
    %cst_153 = arith.constant 3.200000e+01 : f32
    %266 = vector.broadcast %cst_153 : f32 to vector<6x1xf32>
    %267 = arith.divf %265, %266 : vector<6x1xf32>
    %268 = vector.broadcast %267 : vector<6x1xf32> to vector<6x32xf32>
    %269 = arith.subf %263, %268 : vector<6x32xf32>
    %270 = arith.mulf %269, %269 : vector<6x32xf32>
    %cst_154 = arith.constant dense<0.000000e+00> : vector<6xf32>
    %271 = vector.multi_reduction <add>, %270, %cst_154 [1] : vector<6x32xf32> to vector<6xf32>
    %272 = vector.shape_cast %271 : vector<6xf32> to vector<6x1xf32>
    %cst_155 = arith.constant 3.200000e+01 : f32
    %273 = vector.broadcast %cst_155 : f32 to vector<6x1xf32>
    %274 = arith.divf %272, %273 : vector<6x1xf32>
    %cst_156 = arith.constant 9.99999974E-6 : f32
    %275 = vector.broadcast %cst_156 : f32 to vector<6x1xf32>
    %276 = arith.addf %274, %275 : vector<6x1xf32>
    %277 = math.rsqrt %276 : vector<6x1xf32>
    %278 = vector.broadcast %277 : vector<6x1xf32> to vector<6x32xf32>
    %279 = arith.mulf %269, %278 : vector<6x32xf32>
    %c0_157 = arith.constant 0 : index
    %c0_158 = arith.constant 0 : index
    %280 = vector.load %arg32[%c0_157, %c0_158] : memref<1x32xf32, #tpu.memory_space<vmem>>, vector<1x32xf32>
    %281 = vector.broadcast %280 : vector<1x32xf32> to vector<6x32xf32>
    %282 = arith.mulf %279, %281 : vector<6x32xf32>
    %c0_159 = arith.constant 0 : index
    %c0_160 = arith.constant 0 : index
    %283 = vector.load %arg31[%c0_159, %c0_160] : memref<1x32xf32, #tpu.memory_space<vmem>>, vector<1x32xf32>
    %284 = vector.broadcast %283 : vector<1x32xf32> to vector<6x32xf32>
    %285 = arith.addf %282, %284 : vector<6x32xf32>
    %c0_161 = arith.constant 0 : index
    %c0_162 = arith.constant 0 : index
    %286 = vector.load %arg38[%c0_161, %c0_162] : memref<32x32xbf16, #tpu.memory_space<vmem>>, vector<32x32xbf16>
    %287 = arith.truncf %285 : vector<6x32xf32> to vector<6x32xbf16>
    %cst_163 = arith.constant dense<0.000000e+00> : vector<6x32xf32>
    %288 = tpu.matmul %287, %286, %cst_163 {dimension_numbers = #tpu.dot_dimension_numbers<[1], [0], [0], [1], [0, 0, 1, 1], [], []>} : vector<6x32xbf16>, vector<32x32xbf16>, vector<6x32xf32> -> vector<6x32xf32>
    %c0_164 = arith.constant 0 : index
    %c0_165 = arith.constant 0 : index
    %289 = vector.load %arg37[%c0_164, %c0_165] : memref<1x32xf32, #tpu.memory_space<vmem>>, vector<1x32xf32>
    %290 = vector.broadcast %289 : vector<1x32xf32> to vector<6x32xf32>
    %291 = arith.addf %288, %290 : vector<6x32xf32>
    %c0_166 = arith.constant 0 : index
    %c0_167 = arith.constant 0 : index
    %292 = vector.load %arg30[%c0_166, %c0_167] : memref<32x32xbf16, #tpu.memory_space<vmem>>, vector<32x32xbf16>
    %293 = arith.truncf %285 : vector<6x32xf32> to vector<6x32xbf16>
    %cst_168 = arith.constant dense<0.000000e+00> : vector<6x32xf32>
    %294 = tpu.matmul %293, %292, %cst_168 {dimension_numbers = #tpu.dot_dimension_numbers<[1], [0], [0], [1], [0, 0, 1, 1], [], []>} : vector<6x32xbf16>, vector<32x32xbf16>, vector<6x32xf32> -> vector<6x32xf32>
    %c0_169 = arith.constant 0 : index
    %c0_170 = arith.constant 0 : index
    %295 = vector.load %arg29[%c0_169, %c0_170] : memref<1x32xf32, #tpu.memory_space<vmem>>, vector<1x32xf32>
    %296 = vector.broadcast %295 : vector<1x32xf32> to vector<6x32xf32>
    %297 = arith.addf %294, %296 : vector<6x32xf32>
    %c0_171 = arith.constant 0 : index
    %c0_172 = arith.constant 0 : index
    %298 = vector.load %arg40[%c0_171, %c0_172] : memref<32x32xbf16, #tpu.memory_space<vmem>>, vector<32x32xbf16>
    %299 = arith.truncf %285 : vector<6x32xf32> to vector<6x32xbf16>
    %cst_173 = arith.constant dense<0.000000e+00> : vector<6x32xf32>
    %300 = tpu.matmul %299, %298, %cst_173 {dimension_numbers = #tpu.dot_dimension_numbers<[1], [0], [0], [1], [0, 0, 1, 1], [], []>} : vector<6x32xbf16>, vector<32x32xbf16>, vector<6x32xf32> -> vector<6x32xf32>
    %c0_174 = arith.constant 0 : index
    %c0_175 = arith.constant 0 : index
    %301 = vector.load %arg39[%c0_174, %c0_175] : memref<1x32xf32, #tpu.memory_space<vmem>>, vector<1x32xf32>
    %302 = vector.broadcast %301 : vector<1x32xf32> to vector<6x32xf32>
    %303 = arith.addf %300, %302 : vector<6x32xf32>
    %c0_176 = arith.constant 0 : index
    %c0_177 = arith.constant 0 : index
    %304 = vector.load %arg4[%c0_176, %c0_177] : memref<24x6xbf16, #tpu.memory_space<vmem>>, vector<24x6xbf16>
    %305 = arith.truncf %291 : vector<6x32xf32> to vector<6x32xbf16>
    %cst_178 = arith.constant dense<0.000000e+00> : vector<24x32xf32>
    %306 = tpu.matmul %304, %305, %cst_178 {dimension_numbers = #tpu.dot_dimension_numbers<[1], [0], [0], [1], [0, 0, 1, 1], [], []>} : vector<24x6xbf16>, vector<6x32xbf16>, vector<24x32xf32> -> vector<24x32xf32>
    %c0_179 = arith.constant 0 : index
    %c0_180 = arith.constant 0 : index
    %307 = vector.load %arg2[%c0_179, %c0_180] : memref<24x32xf32, #tpu.memory_space<vmem>>, vector<24x32xf32>
    %308 = arith.mulf %306, %307 : vector<24x32xf32>
    %309 = arith.truncf %308 : vector<24x32xf32> to vector<24x32xbf16>
    %310 = arith.truncf %297 : vector<6x32xf32> to vector<6x32xbf16>
    %cst_181 = arith.constant dense<0.000000e+00> : vector<24x6xf32>
    %311 = tpu.matmul %309, %310, %cst_181 {dimension_numbers = #tpu.dot_dimension_numbers<[1], [1], [0], [0], [0, 0, 1, 0], [], []>} : vector<24x32xbf16>, vector<6x32xbf16>, vector<24x6xf32> -> vector<24x6xf32>
    %312 = math.exp %311 : vector<24x6xf32>
    %c0_182 = arith.constant 0 : index
    %c0_183 = arith.constant 0 : index
    %313 = vector.load %arg3[%c0_182, %c0_183] : memref<24x6xf32, #tpu.memory_space<vmem>>, vector<24x6xf32>
    %314 = arith.mulf %312, %313 : vector<24x6xf32>
    %cst_184 = arith.constant dense<0.000000e+00> : vector<24xf32>
    %315 = vector.multi_reduction <add>, %314, %cst_184 [1] : vector<24x6xf32> to vector<24xf32>
    %316 = vector.shape_cast %315 : vector<24xf32> to vector<24x1xf32>
    %317 = tpu.reciprocal %316 {approx = true} : vector<24x1xf32> -> vector<24x1xf32>
    %318 = vector.broadcast %317 : vector<24x1xf32> to vector<24x6xf32>
    %319 = arith.mulf %314, %318 : vector<24x6xf32>
    %320 = arith.truncf %319 : vector<24x6xf32> to vector<24x6xbf16>
    %321 = arith.truncf %303 : vector<6x32xf32> to vector<6x32xbf16>
    %cst_185 = arith.constant dense<0.000000e+00> : vector<24x32xf32>
    %322 = tpu.matmul %320, %321, %cst_185 {dimension_numbers = #tpu.dot_dimension_numbers<[1], [0], [0], [1], [0, 0, 1, 1], [], []>} : vector<24x6xbf16>, vector<6x32xbf16>, vector<24x32xf32> -> vector<24x32xf32>
    %c0_186 = arith.constant 0 : index
    %c0_187 = arith.constant 0 : index
    %323 = vector.load %arg2[%c0_186, %c0_187] : memref<24x32xf32, #tpu.memory_space<vmem>>, vector<24x32xf32>
    %324 = arith.mulf %322, %323 : vector<24x32xf32>
    %c0_188 = arith.constant 0 : index
    %c0_189 = arith.constant 0 : index
    %325 = vector.load %arg0[%c0_188, %c0_189] : memref<6x24xbf16, #tpu.memory_space<vmem>>, vector<6x24xbf16>
    %326 = arith.truncf %324 : vector<24x32xf32> to vector<24x32xbf16>
    %cst_190 = arith.constant dense<0.000000e+00> : vector<6x32xf32>
    %327 = tpu.matmul %325, %326, %cst_190 {dimension_numbers = #tpu.dot_dimension_numbers<[1], [0], [0], [1], [0, 0, 1, 1], [], []>} : vector<6x24xbf16>, vector<24x32xbf16>, vector<6x32xf32> -> vector<6x32xf32>
    %c0_191 = arith.constant 0 : index
    %c0_192 = arith.constant 0 : index
    %328 = vector.load %arg36[%c0_191, %c0_192] : memref<32x32xbf16, #tpu.memory_space<vmem>>, vector<32x32xbf16>
    %329 = arith.truncf %327 : vector<6x32xf32> to vector<6x32xbf16>
    %cst_193 = arith.constant dense<0.000000e+00> : vector<6x32xf32>
    %330 = tpu.matmul %329, %328, %cst_193 {dimension_numbers = #tpu.dot_dimension_numbers<[1], [0], [0], [1], [0, 0, 1, 1], [], []>} : vector<6x32xbf16>, vector<32x32xbf16>, vector<6x32xf32> -> vector<6x32xf32>
    %c0_194 = arith.constant 0 : index
    %c0_195 = arith.constant 0 : index
    %331 = vector.load %arg35[%c0_194, %c0_195] : memref<1x32xf32, #tpu.memory_space<vmem>>, vector<1x32xf32>
    %332 = vector.broadcast %331 : vector<1x32xf32> to vector<6x32xf32>
    %333 = arith.addf %330, %332 : vector<6x32xf32>
    %334 = arith.addf %263, %333 : vector<6x32xf32>
    %c0_196 = arith.constant 0 : index
    %c0_197 = arith.constant 0 : index
    %335 = vector.load %arg24[%c0_196, %c0_197] : memref<32x32xbf16, #tpu.memory_space<vmem>>, vector<32x32xbf16>
    %336 = arith.truncf %141 : vector<6x32xf32> to vector<6x32xbf16>
    %cst_198 = arith.constant dense<0.000000e+00> : vector<6x32xf32>
    %337 = tpu.matmul %336, %335, %cst_198 {dimension_numbers = #tpu.dot_dimension_numbers<[1], [0], [0], [1], [0, 0, 1, 1], [], []>} : vector<6x32xbf16>, vector<32x32xbf16>, vector<6x32xf32> -> vector<6x32xf32>
    %c0_199 = arith.constant 0 : index
    %c0_200 = arith.constant 0 : index
    %338 = vector.load %arg23[%c0_199, %c0_200] : memref<1x32xf32, #tpu.memory_space<vmem>>, vector<1x32xf32>
    %339 = vector.broadcast %338 : vector<1x32xf32> to vector<6x32xf32>
    %340 = arith.addf %337, %339 : vector<6x32xf32>
    %341 = arith.addf %334, %340 : vector<6x32xf32>
    %cst_201 = arith.constant dense<0.000000e+00> : vector<6xf32>
    %342 = vector.multi_reduction <add>, %341, %cst_201 [1] : vector<6x32xf32> to vector<6xf32>
    %343 = vector.shape_cast %342 : vector<6xf32> to vector<6x1xf32>
    %cst_202 = arith.constant 3.200000e+01 : f32
    %344 = vector.broadcast %cst_202 : f32 to vector<6x1xf32>
    %345 = arith.divf %343, %344 : vector<6x1xf32>
    %346 = vector.broadcast %345 : vector<6x1xf32> to vector<6x32xf32>
    %347 = arith.subf %341, %346 : vector<6x32xf32>
    %348 = arith.mulf %347, %347 : vector<6x32xf32>
    %cst_203 = arith.constant dense<0.000000e+00> : vector<6xf32>
    %349 = vector.multi_reduction <add>, %348, %cst_203 [1] : vector<6x32xf32> to vector<6xf32>
    %350 = vector.shape_cast %349 : vector<6xf32> to vector<6x1xf32>
    %cst_204 = arith.constant 3.200000e+01 : f32
    %351 = vector.broadcast %cst_204 : f32 to vector<6x1xf32>
    %352 = arith.divf %350, %351 : vector<6x1xf32>
    %cst_205 = arith.constant 9.99999974E-6 : f32
    %353 = vector.broadcast %cst_205 : f32 to vector<6x1xf32>
    %354 = arith.addf %352, %353 : vector<6x1xf32>
    %355 = math.rsqrt %354 : vector<6x1xf32>
    %356 = vector.broadcast %355 : vector<6x1xf32> to vector<6x32xf32>
    %357 = arith.mulf %347, %356 : vector<6x32xf32>
    %c0_206 = arith.constant 0 : index
    %c0_207 = arith.constant 0 : index
    %358 = vector.load %arg34[%c0_206, %c0_207] : memref<1x32xf32, #tpu.memory_space<vmem>>, vector<1x32xf32>
    %359 = vector.broadcast %358 : vector<1x32xf32> to vector<6x32xf32>
    %360 = arith.mulf %357, %359 : vector<6x32xf32>
    %c0_208 = arith.constant 0 : index
    %c0_209 = arith.constant 0 : index
    %361 = vector.load %arg33[%c0_208, %c0_209] : memref<1x32xf32, #tpu.memory_space<vmem>>, vector<1x32xf32>
    %362 = vector.broadcast %361 : vector<1x32xf32> to vector<6x32xf32>
    %363 = arith.addf %360, %362 : vector<6x32xf32>
    %c0_210 = arith.constant 0 : index
    %c0_211 = arith.constant 0 : index
    %364 = vector.load %arg26[%c0_210, %c0_211] : memref<32x128xbf16, #tpu.memory_space<vmem>>, vector<32x128xbf16>
    %365 = arith.truncf %363 : vector<6x32xf32> to vector<6x32xbf16>
    %cst_212 = arith.constant dense<0.000000e+00> : vector<6x128xf32>
    %366 = tpu.matmul %365, %364, %cst_212 {dimension_numbers = #tpu.dot_dimension_numbers<[1], [0], [0], [1], [0, 0, 1, 1], [], []>} : vector<6x32xbf16>, vector<32x128xbf16>, vector<6x128xf32> -> vector<6x128xf32>
    %c0_213 = arith.constant 0 : index
    %c0_214 = arith.constant 0 : index
    %367 = vector.load %arg25[%c0_213, %c0_214] : memref<1x128xf32, #tpu.memory_space<vmem>>, vector<1x128xf32>
    %368 = vector.broadcast %367 : vector<1x128xf32> to vector<6x128xf32>
    %369 = arith.addf %366, %368 : vector<6x128xf32>
    %cst_215 = arith.constant 0.000000e+00 : f32
    %370 = vector.broadcast %cst_215 : f32 to vector<6x128xf32>
    %371 = arith.maximumf %369, %370 : vector<6x128xf32>
    %c0_216 = arith.constant 0 : index
    %c0_217 = arith.constant 0 : index
    %372 = vector.load %arg28[%c0_216, %c0_217] : memref<128x32xbf16, #tpu.memory_space<vmem>>, vector<128x32xbf16>
    %373 = arith.truncf %371 : vector<6x128xf32> to vector<6x128xbf16>
    %cst_218 = arith.constant dense<0.000000e+00> : vector<6x32xf32>
    %374 = tpu.matmul %373, %372, %cst_218 {dimension_numbers = #tpu.dot_dimension_numbers<[1], [0], [0], [1], [0, 0, 1, 1], [], []>} : vector<6x128xbf16>, vector<128x32xbf16>, vector<6x32xf32> -> vector<6x32xf32>
    %c0_219 = arith.constant 0 : index
    %c0_220 = arith.constant 0 : index
    %375 = vector.load %arg27[%c0_219, %c0_220] : memref<1x32xf32, #tpu.memory_space<vmem>>, vector<1x32xf32>
    %376 = vector.broadcast %375 : vector<1x32xf32> to vector<6x32xf32>
    %377 = arith.addf %374, %376 : vector<6x32xf32>
    %378 = arith.addf %341, %377 : vector<6x32xf32>
    %c0_221 = arith.constant 0 : index
    %c0_222 = arith.constant 0 : index
    %379 = vector.load %arg71[%c0_221, %c0_222] : memref<1x64xf32, #tpu.memory_space<vmem>>, vector<1x64xf32>
    %380 = vector.extract_strided_slice %378 {offsets = [0, 0], sizes = [2, 32], strides = [1, 1]} : vector<6x32xf32> to vector<2x32xf32>
    %c0_223 = arith.constant 0 : index
    %c0_224 = arith.constant 0 : index
    %381 = vector.load %arg76[%c0_223, %c0_224] : memref<32x64xbf16, #tpu.memory_space<vmem>>, vector<32x64xbf16>
    %382 = arith.truncf %380 : vector<2x32xf32> to vector<2x32xbf16>
    %cst_225 = arith.constant dense<0.000000e+00> : vector<2x64xf32>
    %383 = tpu.matmul %382, %381, %cst_225 {dimension_numbers = #tpu.dot_dimension_numbers<[1], [0], [0], [1], [0, 0, 1, 1], [], []>} : vector<2x32xbf16>, vector<32x64xbf16>, vector<2x64xf32> -> vector<2x64xf32>
    %384 = vector.broadcast %379 : vector<1x64xf32> to vector<2x64xf32>
    %385 = arith.addf %384, %383 : vector<2x64xf32>
    %386 = vector.extract_strided_slice %378 {offsets = [2, 0], sizes = [2, 32], strides = [1, 1]} : vector<6x32xf32> to vector<2x32xf32>
    %c0_226 = arith.constant 0 : index
    %c0_227 = arith.constant 0 : index
    %387 = vector.load %arg81[%c0_226, %c0_227] : memref<32x64xbf16, #tpu.memory_space<vmem>>, vector<32x64xbf16>
    %388 = arith.truncf %386 : vector<2x32xf32> to vector<2x32xbf16>
    %cst_228 = arith.constant dense<0.000000e+00> : vector<2x64xf32>
    %389 = tpu.matmul %388, %387, %cst_228 {dimension_numbers = #tpu.dot_dimension_numbers<[1], [0], [0], [1], [0, 0, 1, 1], [], []>} : vector<2x32xbf16>, vector<32x64xbf16>, vector<2x64xf32> -> vector<2x64xf32>
    %390 = arith.addf %385, %389 : vector<2x64xf32>
    %391 = vector.extract_strided_slice %378 {offsets = [4, 0], sizes = [2, 32], strides = [1, 1]} : vector<6x32xf32> to vector<2x32xf32>
    %c0_229 = arith.constant 0 : index
    %c0_230 = arith.constant 0 : index
    %392 = vector.load %arg86[%c0_229, %c0_230] : memref<32x64xbf16, #tpu.memory_space<vmem>>, vector<32x64xbf16>
    %393 = arith.truncf %391 : vector<2x32xf32> to vector<2x32xbf16>
    %cst_231 = arith.constant dense<0.000000e+00> : vector<2x64xf32>
    %394 = tpu.matmul %393, %392, %cst_231 {dimension_numbers = #tpu.dot_dimension_numbers<[1], [0], [0], [1], [0, 0, 1, 1], [], []>} : vector<2x32xbf16>, vector<32x64xbf16>, vector<2x64xf32> -> vector<2x64xf32>
    %395 = arith.addf %390, %394 : vector<2x64xf32>
    %c0_232 = arith.constant 0 : index
    %c0_233 = arith.constant 0 : index
    %396 = vector.load %arg72[%c0_232, %c0_233] : memref<1x64xf32, #tpu.memory_space<vmem>>, vector<1x64xf32>
    %397 = vector.extract_strided_slice %378 {offsets = [0, 0], sizes = [2, 32], strides = [1, 1]} : vector<6x32xf32> to vector<2x32xf32>
    %c0_234 = arith.constant 0 : index
    %c0_235 = arith.constant 0 : index
    %398 = vector.load %arg77[%c0_234, %c0_235] : memref<32x64xbf16, #tpu.memory_space<vmem>>, vector<32x64xbf16>
    %399 = arith.truncf %397 : vector<2x32xf32> to vector<2x32xbf16>
    %cst_236 = arith.constant dense<0.000000e+00> : vector<2x64xf32>
    %400 = tpu.matmul %399, %398, %cst_236 {dimension_numbers = #tpu.dot_dimension_numbers<[1], [0], [0], [1], [0, 0, 1, 1], [], []>} : vector<2x32xbf16>, vector<32x64xbf16>, vector<2x64xf32> -> vector<2x64xf32>
    %401 = vector.broadcast %396 : vector<1x64xf32> to vector<2x64xf32>
    %402 = arith.addf %401, %400 : vector<2x64xf32>
    %403 = vector.extract_strided_slice %378 {offsets = [2, 0], sizes = [2, 32], strides = [1, 1]} : vector<6x32xf32> to vector<2x32xf32>
    %c0_237 = arith.constant 0 : index
    %c0_238 = arith.constant 0 : index
    %404 = vector.load %arg82[%c0_237, %c0_238] : memref<32x64xbf16, #tpu.memory_space<vmem>>, vector<32x64xbf16>
    %405 = arith.truncf %403 : vector<2x32xf32> to vector<2x32xbf16>
    %cst_239 = arith.constant dense<0.000000e+00> : vector<2x64xf32>
    %406 = tpu.matmul %405, %404, %cst_239 {dimension_numbers = #tpu.dot_dimension_numbers<[1], [0], [0], [1], [0, 0, 1, 1], [], []>} : vector<2x32xbf16>, vector<32x64xbf16>, vector<2x64xf32> -> vector<2x64xf32>
    %407 = arith.addf %402, %406 : vector<2x64xf32>
    %408 = vector.extract_strided_slice %378 {offsets = [4, 0], sizes = [2, 32], strides = [1, 1]} : vector<6x32xf32> to vector<2x32xf32>
    %c0_240 = arith.constant 0 : index
    %c0_241 = arith.constant 0 : index
    %409 = vector.load %arg87[%c0_240, %c0_241] : memref<32x64xbf16, #tpu.memory_space<vmem>>, vector<32x64xbf16>
    %410 = arith.truncf %408 : vector<2x32xf32> to vector<2x32xbf16>
    %cst_242 = arith.constant dense<0.000000e+00> : vector<2x64xf32>
    %411 = tpu.matmul %410, %409, %cst_242 {dimension_numbers = #tpu.dot_dimension_numbers<[1], [0], [0], [1], [0, 0, 1, 1], [], []>} : vector<2x32xbf16>, vector<32x64xbf16>, vector<2x64xf32> -> vector<2x64xf32>
    %412 = arith.addf %407, %411 : vector<2x64xf32>
    %c0_243 = arith.constant 0 : index
    %c0_244 = arith.constant 0 : index
    %413 = vector.load %arg73[%c0_243, %c0_244] : memref<1x64xf32, #tpu.memory_space<vmem>>, vector<1x64xf32>
    %414 = vector.extract_strided_slice %378 {offsets = [0, 0], sizes = [2, 32], strides = [1, 1]} : vector<6x32xf32> to vector<2x32xf32>
    %c0_245 = arith.constant 0 : index
    %c0_246 = arith.constant 0 : index
    %415 = vector.load %arg78[%c0_245, %c0_246] : memref<32x64xbf16, #tpu.memory_space<vmem>>, vector<32x64xbf16>
    %416 = arith.truncf %414 : vector<2x32xf32> to vector<2x32xbf16>
    %cst_247 = arith.constant dense<0.000000e+00> : vector<2x64xf32>
    %417 = tpu.matmul %416, %415, %cst_247 {dimension_numbers = #tpu.dot_dimension_numbers<[1], [0], [0], [1], [0, 0, 1, 1], [], []>} : vector<2x32xbf16>, vector<32x64xbf16>, vector<2x64xf32> -> vector<2x64xf32>
    %418 = vector.broadcast %413 : vector<1x64xf32> to vector<2x64xf32>
    %419 = arith.addf %418, %417 : vector<2x64xf32>
    %420 = vector.extract_strided_slice %378 {offsets = [2, 0], sizes = [2, 32], strides = [1, 1]} : vector<6x32xf32> to vector<2x32xf32>
    %c0_248 = arith.constant 0 : index
    %c0_249 = arith.constant 0 : index
    %421 = vector.load %arg83[%c0_248, %c0_249] : memref<32x64xbf16, #tpu.memory_space<vmem>>, vector<32x64xbf16>
    %422 = arith.truncf %420 : vector<2x32xf32> to vector<2x32xbf16>
    %cst_250 = arith.constant dense<0.000000e+00> : vector<2x64xf32>
    %423 = tpu.matmul %422, %421, %cst_250 {dimension_numbers = #tpu.dot_dimension_numbers<[1], [0], [0], [1], [0, 0, 1, 1], [], []>} : vector<2x32xbf16>, vector<32x64xbf16>, vector<2x64xf32> -> vector<2x64xf32>
    %424 = arith.addf %419, %423 : vector<2x64xf32>
    %425 = vector.extract_strided_slice %378 {offsets = [4, 0], sizes = [2, 32], strides = [1, 1]} : vector<6x32xf32> to vector<2x32xf32>
    %c0_251 = arith.constant 0 : index
    %c0_252 = arith.constant 0 : index
    %426 = vector.load %arg88[%c0_251, %c0_252] : memref<32x64xbf16, #tpu.memory_space<vmem>>, vector<32x64xbf16>
    %427 = arith.truncf %425 : vector<2x32xf32> to vector<2x32xbf16>
    %cst_253 = arith.constant dense<0.000000e+00> : vector<2x64xf32>
    %428 = tpu.matmul %427, %426, %cst_253 {dimension_numbers = #tpu.dot_dimension_numbers<[1], [0], [0], [1], [0, 0, 1, 1], [], []>} : vector<2x32xbf16>, vector<32x64xbf16>, vector<2x64xf32> -> vector<2x64xf32>
    %429 = arith.addf %424, %428 : vector<2x64xf32>
    %c0_254 = arith.constant 0 : index
    %c0_255 = arith.constant 0 : index
    %430 = vector.load %arg74[%c0_254, %c0_255] : memref<1x64xf32, #tpu.memory_space<vmem>>, vector<1x64xf32>
    %431 = vector.extract_strided_slice %378 {offsets = [0, 0], sizes = [2, 32], strides = [1, 1]} : vector<6x32xf32> to vector<2x32xf32>
    %c0_256 = arith.constant 0 : index
    %c0_257 = arith.constant 0 : index
    %432 = vector.load %arg79[%c0_256, %c0_257] : memref<32x64xbf16, #tpu.memory_space<vmem>>, vector<32x64xbf16>
    %433 = arith.truncf %431 : vector<2x32xf32> to vector<2x32xbf16>
    %cst_258 = arith.constant dense<0.000000e+00> : vector<2x64xf32>
    %434 = tpu.matmul %433, %432, %cst_258 {dimension_numbers = #tpu.dot_dimension_numbers<[1], [0], [0], [1], [0, 0, 1, 1], [], []>} : vector<2x32xbf16>, vector<32x64xbf16>, vector<2x64xf32> -> vector<2x64xf32>
    %435 = vector.broadcast %430 : vector<1x64xf32> to vector<2x64xf32>
    %436 = arith.addf %435, %434 : vector<2x64xf32>
    %437 = vector.extract_strided_slice %378 {offsets = [2, 0], sizes = [2, 32], strides = [1, 1]} : vector<6x32xf32> to vector<2x32xf32>
    %c0_259 = arith.constant 0 : index
    %c0_260 = arith.constant 0 : index
    %438 = vector.load %arg84[%c0_259, %c0_260] : memref<32x64xbf16, #tpu.memory_space<vmem>>, vector<32x64xbf16>
    %439 = arith.truncf %437 : vector<2x32xf32> to vector<2x32xbf16>
    %cst_261 = arith.constant dense<0.000000e+00> : vector<2x64xf32>
    %440 = tpu.matmul %439, %438, %cst_261 {dimension_numbers = #tpu.dot_dimension_numbers<[1], [0], [0], [1], [0, 0, 1, 1], [], []>} : vector<2x32xbf16>, vector<32x64xbf16>, vector<2x64xf32> -> vector<2x64xf32>
    %441 = arith.addf %436, %440 : vector<2x64xf32>
    %442 = vector.extract_strided_slice %378 {offsets = [4, 0], sizes = [2, 32], strides = [1, 1]} : vector<6x32xf32> to vector<2x32xf32>
    %c0_262 = arith.constant 0 : index
    %c0_263 = arith.constant 0 : index
    %443 = vector.load %arg89[%c0_262, %c0_263] : memref<32x64xbf16, #tpu.memory_space<vmem>>, vector<32x64xbf16>
    %444 = arith.truncf %442 : vector<2x32xf32> to vector<2x32xbf16>
    %cst_264 = arith.constant dense<0.000000e+00> : vector<2x64xf32>
    %445 = tpu.matmul %444, %443, %cst_264 {dimension_numbers = #tpu.dot_dimension_numbers<[1], [0], [0], [1], [0, 0, 1, 1], [], []>} : vector<2x32xbf16>, vector<32x64xbf16>, vector<2x64xf32> -> vector<2x64xf32>
    %446 = arith.addf %441, %445 : vector<2x64xf32>
    %c0_265 = arith.constant 0 : index
    %c0_266 = arith.constant 0 : index
    %447 = vector.load %arg75[%c0_265, %c0_266] : memref<1x64xf32, #tpu.memory_space<vmem>>, vector<1x64xf32>
    %448 = vector.extract_strided_slice %378 {offsets = [0, 0], sizes = [2, 32], strides = [1, 1]} : vector<6x32xf32> to vector<2x32xf32>
    %c0_267 = arith.constant 0 : index
    %c0_268 = arith.constant 0 : index
    %449 = vector.load %arg80[%c0_267, %c0_268] : memref<32x64xbf16, #tpu.memory_space<vmem>>, vector<32x64xbf16>
    %450 = arith.truncf %448 : vector<2x32xf32> to vector<2x32xbf16>
    %cst_269 = arith.constant dense<0.000000e+00> : vector<2x64xf32>
    %451 = tpu.matmul %450, %449, %cst_269 {dimension_numbers = #tpu.dot_dimension_numbers<[1], [0], [0], [1], [0, 0, 1, 1], [], []>} : vector<2x32xbf16>, vector<32x64xbf16>, vector<2x64xf32> -> vector<2x64xf32>
    %452 = vector.broadcast %447 : vector<1x64xf32> to vector<2x64xf32>
    %453 = arith.addf %452, %451 : vector<2x64xf32>
    %454 = vector.extract_strided_slice %378 {offsets = [2, 0], sizes = [2, 32], strides = [1, 1]} : vector<6x32xf32> to vector<2x32xf32>
    %c0_270 = arith.constant 0 : index
    %c0_271 = arith.constant 0 : index
    %455 = vector.load %arg85[%c0_270, %c0_271] : memref<32x64xbf16, #tpu.memory_space<vmem>>, vector<32x64xbf16>
    %456 = arith.truncf %454 : vector<2x32xf32> to vector<2x32xbf16>
    %cst_272 = arith.constant dense<0.000000e+00> : vector<2x64xf32>
    %457 = tpu.matmul %456, %455, %cst_272 {dimension_numbers = #tpu.dot_dimension_numbers<[1], [0], [0], [1], [0, 0, 1, 1], [], []>} : vector<2x32xbf16>, vector<32x64xbf16>, vector<2x64xf32> -> vector<2x64xf32>
    %458 = arith.addf %453, %457 : vector<2x64xf32>
    %459 = vector.extract_strided_slice %378 {offsets = [4, 0], sizes = [2, 32], strides = [1, 1]} : vector<6x32xf32> to vector<2x32xf32>
    %c0_273 = arith.constant 0 : index
    %c0_274 = arith.constant 0 : index
    %460 = vector.load %arg90[%c0_273, %c0_274] : memref<32x64xbf16, #tpu.memory_space<vmem>>, vector<32x64xbf16>
    %461 = arith.truncf %459 : vector<2x32xf32> to vector<2x32xbf16>
    %cst_275 = arith.constant dense<0.000000e+00> : vector<2x64xf32>
    %462 = tpu.matmul %461, %460, %cst_275 {dimension_numbers = #tpu.dot_dimension_numbers<[1], [0], [0], [1], [0, 0, 1, 1], [], []>} : vector<2x32xbf16>, vector<32x64xbf16>, vector<2x64xf32> -> vector<2x64xf32>
    %463 = arith.addf %458, %462 : vector<2x64xf32>
    %464 = tpu.concatenate %395, %412, %429, %446, %463 in 0 : vector<2x64xf32>, vector<2x64xf32>, vector<2x64xf32>, vector<2x64xf32>, vector<2x64xf32> -> vector<10x64xf32>
    %cst_276 = arith.constant dense<0.000000e+00> : vector<10xf32>
    %465 = vector.multi_reduction <add>, %464, %cst_276 [1] : vector<10x64xf32> to vector<10xf32>
    %466 = vector.shape_cast %465 : vector<10xf32> to vector<10x1xf32>
    %cst_277 = arith.constant 6.400000e+01 : f32
    %467 = vector.broadcast %cst_277 : f32 to vector<10x1xf32>
    %468 = arith.divf %466, %467 : vector<10x1xf32>
    %469 = vector.broadcast %468 : vector<10x1xf32> to vector<10x64xf32>
    %470 = arith.subf %464, %469 : vector<10x64xf32>
    %471 = arith.mulf %470, %470 : vector<10x64xf32>
    %cst_278 = arith.constant dense<0.000000e+00> : vector<10xf32>
    %472 = vector.multi_reduction <add>, %471, %cst_278 [1] : vector<10x64xf32> to vector<10xf32>
    %473 = vector.shape_cast %472 : vector<10xf32> to vector<10x1xf32>
    %cst_279 = arith.constant 6.400000e+01 : f32
    %474 = vector.broadcast %cst_279 : f32 to vector<10x1xf32>
    %475 = arith.divf %473, %474 : vector<10x1xf32>
    %cst_280 = arith.constant 9.99999974E-6 : f32
    %476 = vector.broadcast %cst_280 : f32 to vector<10x1xf32>
    %477 = arith.addf %475, %476 : vector<10x1xf32>
    %478 = math.rsqrt %477 : vector<10x1xf32>
    %479 = vector.broadcast %478 : vector<10x1xf32> to vector<10x64xf32>
    %480 = arith.mulf %470, %479 : vector<10x64xf32>
    %c0_281 = arith.constant 0 : index
    %c0_282 = arith.constant 0 : index
    %481 = vector.load %arg70[%c0_281, %c0_282] : memref<1x64xf32, #tpu.memory_space<vmem>>, vector<1x64xf32>
    %482 = vector.broadcast %481 : vector<1x64xf32> to vector<10x64xf32>
    %483 = arith.mulf %480, %482 : vector<10x64xf32>
    %c0_283 = arith.constant 0 : index
    %c0_284 = arith.constant 0 : index
    %484 = vector.load %arg69[%c0_283, %c0_284] : memref<1x64xf32, #tpu.memory_space<vmem>>, vector<1x64xf32>
    %485 = vector.broadcast %484 : vector<1x64xf32> to vector<10x64xf32>
    %486 = arith.addf %483, %485 : vector<10x64xf32>
    %cst_285 = arith.constant 0.000000e+00 : f32
    %487 = vector.broadcast %cst_285 : f32 to vector<10x64xf32>
    %488 = arith.maximumf %486, %487 : vector<10x64xf32>
    %c0_286 = arith.constant 0 : index
    %c0_287 = arith.constant 0 : index
    %489 = vector.load %arg66[%c0_286, %c0_287] : memref<64x32xbf16, #tpu.memory_space<vmem>>, vector<64x32xbf16>
    %490 = arith.truncf %488 : vector<10x64xf32> to vector<10x64xbf16>
    %cst_288 = arith.constant dense<0.000000e+00> : vector<10x32xf32>
    %491 = tpu.matmul %490, %489, %cst_288 {dimension_numbers = #tpu.dot_dimension_numbers<[1], [0], [0], [1], [0, 0, 1, 1], [], []>} : vector<10x64xbf16>, vector<64x32xbf16>, vector<10x32xf32> -> vector<10x32xf32>
    %c0_289 = arith.constant 0 : index
    %c0_290 = arith.constant 0 : index
    %492 = vector.load %arg65[%c0_289, %c0_290] : memref<1x32xf32, #tpu.memory_space<vmem>>, vector<1x32xf32>
    %493 = vector.broadcast %492 : vector<1x32xf32> to vector<10x32xf32>
    %494 = arith.addf %491, %493 : vector<10x32xf32>
    %cst_291 = arith.constant 0.000000e+00 : f32
    %495 = vector.broadcast %cst_291 : f32 to vector<10x32xf32>
    %496 = arith.maximumf %494, %495 : vector<10x32xf32>
    %c0_292 = arith.constant 0 : index
    %c0_293 = arith.constant 0 : index
    %497 = vector.load %arg68[%c0_292, %c0_293] : memref<32x12xbf16, #tpu.memory_space<vmem>>, vector<32x12xbf16>
    %498 = arith.truncf %496 : vector<10x32xf32> to vector<10x32xbf16>
    %cst_294 = arith.constant dense<0.000000e+00> : vector<10x12xf32>
    %499 = tpu.matmul %498, %497, %cst_294 {dimension_numbers = #tpu.dot_dimension_numbers<[1], [0], [0], [1], [0, 0, 1, 1], [], []>} : vector<10x32xbf16>, vector<32x12xbf16>, vector<10x12xf32> -> vector<10x12xf32>
    %c0_295 = arith.constant 0 : index
    %c0_296 = arith.constant 0 : index
    %500 = vector.load %arg67[%c0_295, %c0_296] : memref<1x12xf32, #tpu.memory_space<vmem>>, vector<1x12xf32>
    %501 = vector.broadcast %500 : vector<1x12xf32> to vector<10x12xf32>
    %502 = arith.addf %499, %501 : vector<10x12xf32>
    %c0_297 = arith.constant 0 : index
    %c0_298 = arith.constant 0 : index
    %503 = vector.load %arg93[%c0_297, %c0_298] : memref<10x12xf32, #tpu.memory_space<vmem>>, vector<10x12xf32>
    tpu.vector_store %arg93[%c0_297, %c0_298], %502 {strides = array<i32>} : memref<10x12xf32, #tpu.memory_space<vmem>>, vector<10x12xf32>,
    return
  }
}

</mosaic_0001>

<bundles_post_ra>
// kernel: forward.1
= control target key start
LH: loop header
LB: loop body
LE: loop exit
PB: predicated region body
PF: predicated region fallthrough
CT: control target
= control target key end

     0   :  { %s6951_s6 = smov 1   ;;  %s6952_s10 = smov 2   ;;  %s8274_s0 = inlined_call_operand.smem [shape: u32[94], index: -1, kind: input, shape index: {}] }
   0x1   :  { %s7106_s5 = sld [smem:[%s8274_s0]]   ;;  %s6953_s14 = smov 3  }
   0x2   :  { %s7111_s9 = sld [smem:[%s8274_s0 + %s6951_s6]]   ;;  %s6954_s18 = smov 4  }
   0x3   :  { %s7116_s13 = sld [smem:[%s8274_s0 + %s6952_s10]]   ;;  %s6955_s22 = smov 5  }
   0x4   :  { %s7121_s17 = sld [smem:[%s8274_s0 + %s6953_s14]]   ;;  %s6956_s26 = smov 6  }
   0x5   :  { %s7126_s21 = sld [smem:[%s8274_s0 + %s6954_s18]]   ;;  %s6957_s30 = smov 7  }
   0x6   :  { %s7131_s25 = sld [smem:[%s8274_s0 + %s6955_s22]]   ;;  %s6958_s4 = smov 8  }
   0x7   :  { %8349 = sst [smem:[#allocation104_spill]] %s7106_s5  ;;  %s6959_s10 = smov 9  }
   0x8   :  { %8350 = sst [smem:[#allocation105_spill]] %s7111_s9  ;;  %s6960_s15 = smov 10  }
   0x9   :  { %8351 = sst [smem:[#allocation106_spill]] %s7116_s13  ;;  %s6961_s20 = smov 11  }
   0xa   :  { %8352 = sst [smem:[#allocation107_spill]] %s7121_s17  ;;  %s6963_s1 = smov 13  }
   0xb   :  { %8353 = sst [smem:[#allocation108_spill]] %s7126_s21  ;;  %s6964_s7 = smov 14  }
   0xc   :  { %s7136_s29 = sld [smem:[%s8274_s0 + %s6956_s26]]   ;;  %s6962_s26 = smov 12  }
   0xd   :  { %s7141_s3 = sld [smem:[%s8274_s0 + %s6957_s30]]   ;;  %s6966_s22 = smov 16  }
   0xe   :  { %s7146_s8 = sld [smem:[%s8274_s0 + %s6958_s4]]   ;;  %s6967_s28 = smov 17  }
   0xf   :  { %s7151_s14 = sld [smem:[%s8274_s0 + %s6959_s10]]  }
  0x10   :  { %s7156_s19 = sld [smem:[%s8274_s0 + %s6960_s15]]   ;;  %s6965_s15 = smov 15  }
  0x11   :  { %s7161_s24 = sld [smem:[%s8274_s0 + %s6961_s20]]  }
  0x12   :  { %8354 = sst [smem:[#allocation109_spill]] %s7136_s29 }
  0x13   :  { %8355 = sst [smem:[#allocation110_spill]] %s7141_s3 }
  0x14   :  { %8356 = sst [smem:[#allocation111_spill]] %s7146_s8 }
  0x15   :  { %s7166_s30 = sld [smem:[%s8274_s0 + %s6962_s26]]  }
  0x16   :  { %8357 = sst [smem:[#allocation112_spill]] %s7156_s19 }
  0x17   :  { %8358 = sst [smem:[#allocation113_spill]] %s7161_s24 }
  0x18   :  { %s7171_s6 = sld [smem:[%s8274_s0 + %s6963_s1]]  }
  0x19   :  { %s7176_s12 = sld [smem:[%s8274_s0 + %s6964_s7]]   ;;  %s6968_s7 = smov 18  }
  0x1a   :  { %s7181_s20 = sld [smem:[%s8274_s0 + %s6965_s15]]   ;;  %s6969_s15 = smov 19  }
  0x1b   :  { %8359 = sst [smem:[#allocation114_spill]] %s7166_s30 }
  0x1c   :  { %s7186_s27 = sld [smem:[%s8274_s0 + %s6966_s22]]   ;;  %s6970_s22 = smov 20  }
  0x1d   :  { %s7191_s4 = sld [smem:[%s8274_s0 + %s6967_s28]]   ;;  %s6971_s28 = smov 21  }
  0x1e   :  { %s7196_s19 = sld [smem:[%s8274_s0 + %s6968_s7]]   ;;  %s6972_s7 = smov 22  }
  0x1f   :  { %8360 = sst [smem:[#allocation115_spill]] %s7176_s12 }
  0x20   :  { %s7201_s8 = sld [smem:[%s8274_s0 + %s6969_s15]]   ;;  %s6973_s15 = smov 23  }
  0x21   :  { %s7206_s29 = sld [smem:[%s8274_s0 + %s6970_s22]]   ;;  %s6974_s22 = smov 24  }
  0x22   :  { %8361 = sst [smem:[#allocation116_spill]] %s7186_s27 }
  0x23   :  { %s7211_s17 = sld [smem:[%s8274_s0 + %s6971_s28]]   ;;  %s6975_s28 = smov 25  }
  0x24   :  { %8362 = sst [smem:[#allocation117_spill]] %s7196_s19 }
  0x25   :  { %s7216_s19 = sld [smem:[%s8274_s0 + %s6972_s7]]   ;;  %s6976_s7 = smov 26  }
  0x26   :  { %8363 = sst [smem:[#allocation118_spill]] %s7201_s8 }
  0x27   :  { %8364 = sst [smem:[#allocation119_spill]] %s7206_s29 }
  0x28   :  { %s7221_s13 = sld [smem:[%s8274_s0 + %s6973_s15]]   ;;  %s6977_s15 = smov 27  }
  0x29   :  { %s7226_s21 = sld [smem:[%s8274_s0 + %s6974_s22]]   ;;  %s6978_s22 = smov 28  }
  0x2a   :  { %s7231_s30 = sld [smem:[%s8274_s0 + %s6975_s28]]   ;;  %s6979_s28 = smov 29  }
  0x2b   :  { %8365 = sst [smem:[#allocation120_spill]] %s7216_s19 }
  0x2c   :  { %s7236_s19 = sld [smem:[%s8274_s0 + %s6976_s7]]   ;;  %s6980_s7 = smov 30  }
  0x2d   :  { %s7241_s29 = sld [smem:[%s8274_s0 + %s6977_s15]]   ;;  %s6981_s15 = smov 31  }
  0x2e   :  { %8366 = sst [smem:[#allocation121_spill]] %s7221_s13 }
  0x2f   :  { %8367 = sst [smem:[#allocation122_spill]] %s7226_s21 }
  0x30   :  { %s7246_s21 = sld [smem:[%s8274_s0 + %s6978_s22]]   ;;  %s6982_s22 = smov 32  }
  0x31   :  { %s7251_s9 = sld [smem:[%s8274_s0 + %s6979_s28]]   ;;  %s6983_s28 = smov 33  }
  0x32   :  { %8368 = sst [smem:[#allocation123_spill]] %s7236_s19 }
  0x33   :  { %8369 = sst [smem:[#allocation124_spill]] %s7241_s29 }
  0x34   :  { %s7256_s19 = sld [smem:[%s8274_s0 + %s6980_s7]]   ;;  %s6984_s7 = smov 34  }
  0x35   :  { %s7261_s29 = sld [smem:[%s8274_s0 + %s6981_s15]]   ;;  %s6985_s15 = smov 35  }
  0x36   :  { %8370 = sst [smem:[#allocation125_spill]] %s7246_s21 }
  0x37   :  { %s7266_s21 = sld [smem:[%s8274_s0 + %s6982_s22]]   ;;  %s6986_s22 = smov 36  }
  0x38   :  { %s7271_s13 = sld [smem:[%s8274_s0 + %s6983_s28]]   ;;  %s6987_s28 = smov 37  }
  0x39   :  { %s7286_s8 = sld [smem:[%s8274_s0 + %s6986_s22]]   ;;  %s6990_s22 = smov 40  }
  0x3a   :  { %8371 = sst [smem:[#allocation126_spill]] %s7256_s19 }
  0x3b   :  { %8372 = sst [smem:[#allocation127_spill]] %s7261_s29 }
  0x3c   :  { %s7276_s19 = sld [smem:[%s8274_s0 + %s6984_s7]]   ;;  %s6988_s7 = smov 38  }
  0x3d   :  { %s7281_s29 = sld [smem:[%s8274_s0 + %s6985_s15]]   ;;  %s6989_s15 = smov 39  }
  0x3e   :  { %8373 = sst [smem:[#allocation128_spill]] %s7271_s13 }
  0x3f   :  { %8375 = sst [smem:[#allocation130_spill]] %s7286_s8 }
  0x40   :  { %s7291_s13 = sld [smem:[%s8274_s0 + %s6987_s28]]   ;;  %s6991_s28 = smov 41  }
  0x41   :  { %s7296_s27 = sld [smem:[%s8274_s0 + %s6988_s7]]   ;;  %s6992_s7 = smov 42  }
  0x42   :  { %s7306_s8 = sld [smem:[%s8274_s0 + %s6990_s22]]   ;;  %s6994_s22 = smov 44  }
  0x43   :  { %8374 = sst [smem:[#allocation129_spill]] %s7281_s29 }
  0x44   :  { %s7301_s29 = sld [smem:[%s8274_s0 + %s6989_s15]]   ;;  %s6993_s15 = smov 43  }
  0x45   :  { %s7311_s12 = sld [smem:[%s8274_s0 + %s6991_s28]]   ;;  %s6995_s28 = smov 45  }
  0x46   :  { %s7331_s24 = sld [smem:[%s8274_s0 + %s6995_s28]]   ;;  %s6999_s28 = smov 49  }
  0x47   :  { %8376 = sst [smem:[#allocation131_spill]] %s7296_s27 }
  0x48   :  { %8378 = sst [smem:[#allocation133_spill]] %s7306_s8 }
  0x49   :  { %s7316_s27 = sld [smem:[%s8274_s0 + %s6992_s7]]   ;;  %s6996_s7 = smov 46  }
  0x4a   :  { %8377 = sst [smem:[#allocation132_spill]] %s7301_s29 }
  0x4b   :  { %s7321_s29 = sld [smem:[%s8274_s0 + %s6993_s15]]   ;;  %s6997_s15 = smov 47  }
  0x4c   :  { %s7326_s8 = sld [smem:[%s8274_s0 + %s6994_s22]]   ;;  %s6998_s22 = smov 48  }
  0x4d   :  { %8381 = sst [smem:[#allocation136_spill]] %s7331_s24 }
  0x4e   :  { %s7341_s3 = sld [smem:[%s8274_s0 + %s6997_s15]]   ;;  %s7001_s15 = smov 51  }
  0x4f   :  { %8379 = sst [smem:[#allocation134_spill]] %s7316_s27 }
  0x50   :  { %s7336_s27 = sld [smem:[%s8274_s0 + %s6996_s7]]   ;;  %s7000_s7 = smov 50  }
  0x51   :  { %s7351_s24 = sld [smem:[%s8274_s0 + %s6999_s28]]   ;;  %s7003_s28 = smov 53  }
  0x52   :  { %8380 = sst [smem:[#allocation135_spill]] %s7326_s8 }
  0x53   :  { %s7346_s8 = sld [smem:[%s8274_s0 + %s6998_s22]]   ;;  %s7002_s22 = smov 52  }
  0x54   :  { %s7361_s5 = sld [smem:[%s8274_s0 + %s7001_s15]]   ;;  %s7005_s15 = smov 55  }
  0x56   :  { %8382 = sst [smem:[#allocation137_spill]] %s7336_s27 }
  0x57   :  { %8384 = sst [smem:[#allocation139_spill]] %s7351_s24 }
  0x58   :  { %s7356_s27 = sld [smem:[%s8274_s0 + %s7000_s7]]   ;;  %s7004_s7 = smov 54  }
  0x59   :  { %8383 = sst [smem:[#allocation138_spill]] %s7346_s8 }
  0x5a   :  { %8386 = sst [smem:[#allocation141_spill]] %s7361_s5 }
  0x5b   :  { %s7366_s8 = sld [smem:[%s8274_s0 + %s7002_s22]]   ;;  %s7006_s22 = smov 56  }
  0x5c   :  { %s7371_s24 = sld [smem:[%s8274_s0 + %s7003_s28]]   ;;  %s7007_s28 = smov 57  }
  0x5d   :  { %s7381_s5 = sld [smem:[%s8274_s0 + %s7005_s15]]   ;;  %s7009_s15 = smov 59  }
  0x5e   :  { %8385 = sst [smem:[#allocation140_spill]] %s7356_s27 }
  0x5f   :  { %s7376_s27 = sld [smem:[%s8274_s0 + %s7004_s7]]   ;;  %s7008_s7 = smov 58  }
  0x61   :  { %8387 = sst [smem:[#allocation142_spill]] %s7366_s8 }
  0x62   :  { %8388 = sst [smem:[#allocation143_spill]] %s7371_s24 }
  0x63   :  { %8390 = sst [smem:[#allocation145_spill]] %s7381_s5 }
  0x64   :  { %s7386_s8 = sld [smem:[%s8274_s0 + %s7006_s22]]   ;;  %s7010_s22 = smov 60  }
  0x65   :  { %8389 = sst [smem:[#allocation144_spill]] %s7376_s27 }
  0x66   :  { %s7391_s24 = sld [smem:[%s8274_s0 + %s7007_s28]]   ;;  %s7011_s28 = smov 61  }
  0x67   :  { %s7396_s27 = sld [smem:[%s8274_s0 + %s7008_s7]]   ;;  %s7012_s7 = smov 62  }
  0x68   :  { %s7401_s5 = sld [smem:[%s8274_s0 + %s7009_s15]]   ;;  %s7013_s15 = smov 63  }
  0x6a   :  { %8391 = sst [smem:[#allocation146_spill]] %s7386_s8 }
  0x6b   :  { %s7406_s8 = sld [smem:[%s8274_s0 + %s7010_s22]]   ;;  %s7014_s22 = smov 64  }
  0x6c   :  { %8392 = sst [smem:[#allocation147_spill]] %s7391_s24 }
  0x6d   :  { %8393 = sst [smem:[#allocation148_spill]] %s7396_s27 }
  0x6e   :  { %8394 = sst [smem:[#allocation149_spill]] %s7401_s5 }
  0x6f   :  { %s7411_s24 = sld [smem:[%s8274_s0 + %s7011_s28]]   ;;  %s7015_s28 = smov 65  }
  0x70   :  { %s7416_s27 = sld [smem:[%s8274_s0 + %s7012_s7]]   ;;  %s7016_s7 = smov 66  }
  0x71   :  { %8395 = sst [smem:[#allocation150_spill]] %s7406_s8 }
  0x72   :  { %s7421_s5 = sld [smem:[%s8274_s0 + %s7013_s15]]   ;;  %s7017_s15 = smov 67  }
  0x73   :  { %s7426_s8 = sld [smem:[%s8274_s0 + %s7014_s22]]   ;;  %s7018_s22 = smov 68  }
  0x75   :  { %8396 = sst [smem:[#allocation151_spill]] %s7411_s24 }
  0x76   :  { %8397 = sst [smem:[#allocation152_spill]] %s7416_s27 }
  0x77   :  { %s7431_s24 = sld [smem:[%s8274_s0 + %s7015_s28]]   ;;  %s7019_s28 = smov 69  }
  0x78   :  { %8398 = sst [smem:[#allocation153_spill]] %s7421_s5 }
  0x79   :  { %8399 = sst [smem:[#allocation154_spill]] %s7426_s8 }
  0x7a   :  { %s7436_s27 = sld [smem:[%s8274_s0 + %s7016_s7]]   ;;  %s7020_s7 = smov 70  }
  0x7b   :  { %s7441_s5 = sld [smem:[%s8274_s0 + %s7017_s15]]   ;;  %s7021_s15 = smov 71  }
  0x7c   :  { %s7446_s8 = sld [smem:[%s8274_s0 + %s7018_s22]]   ;;  %s7022_s22 = smov 72  }
  0x7d   :  { %8400 = sst [smem:[#allocation155_spill]] %s7431_s24 }
  0x7e   :  { %s7451_s24 = sld [smem:[%s8274_s0 + %s7019_s28]]   ;;  %s7023_s28 = smov 73  }
  0x80   :  { %8401 = sst [smem:[#allocation156_spill]] %s7436_s27 }
  0x81   :  { %8402 = sst [smem:[#allocation157_spill]] %s7441_s5 }
  0x82   :  { %8403 = sst [smem:[#allocation158_spill]] %s7446_s8 }
  0x83   :  { %s7456_s27 = sld [smem:[%s8274_s0 + %s7020_s7]]   ;;  %s7024_s7 = smov 74  }
  0x84   :  { %8404 = sst [smem:[#allocation159_spill]] %s7451_s24 }
  0x85   :  { %s7461_s5 = sld [smem:[%s8274_s0 + %s7021_s15]]   ;;  %s7025_s15 = smov 75  }
  0x86   :  { %s7466_s8 = sld [smem:[%s8274_s0 + %s7022_s22]]   ;;  %s7026_s22 = smov 76  }
  0x87   :  { %s7471_s24 = sld [smem:[%s8274_s0 + %s7023_s28]]   ;;  %s7027_s28 = smov 77  }
  0x89   :  { %8405 = sst [smem:[#allocation160_spill]] %s7456_s27 }
  0x8a   :  { %s7476_s27 = sld [smem:[%s8274_s0 + %s7024_s7]]   ;;  %s7028_s7 = smov 78  }
  0x8b   :  { %8406 = sst [smem:[#allocation161_spill]] %s7461_s5 }
  0x8c   :  { %8407 = sst [smem:[#allocation162_spill]] %s7466_s8 }
  0x8d   :  { %8408 = sst [smem:[#allocation163_spill]] %s7471_s24 }
  0x8e   :  { %s7481_s5 = sld [smem:[%s8274_s0 + %s7025_s15]]   ;;  %s7029_s15 = smov 79  }
  0x8f   :  { %s7486_s8 = sld [smem:[%s8274_s0 + %s7026_s22]]   ;;  %s7030_s22 = smov 80  }
  0x90   :  { %8409 = sst [smem:[#allocation164_spill]] %s7476_s27 }
  0x91   :  { %s7491_s24 = sld [smem:[%s8274_s0 + %s7027_s28]]   ;;  %s7031_s28 = smov 81  }
  0x92   :  { %s7496_s27 = sld [smem:[%s8274_s0 + %s7028_s7]]   ;;  %s7032_s7 = smov 82  }
  0x94   :  { %8410 = sst [smem:[#allocation165_spill]] %s7481_s5 }
  0x95   :  { %8411 = sst [smem:[#allocation166_spill]] %s7486_s8 }
  0x96   :  { %s7501_s5 = sld [smem:[%s8274_s0 + %s7029_s15]]   ;;  %s7033_s15 = smov 83  }
  0x97   :  { %8412 = sst [smem:[#allocation167_spill]] %s7491_s24 }
  0x98   :  { %8413 = sst [smem:[#allocation168_spill]] %s7496_s27 }
  0x99   :  { %s7506_s8 = sld [smem:[%s8274_s0 + %s7030_s22]]   ;;  %s7034_s22 = smov 84  }
  0x9a   :  { %s7511_s24 = sld [smem:[%s8274_s0 + %s7031_s28]]   ;;  %s7035_s28 = smov 85  }
  0x9b   :  { %s7516_s27 = sld [smem:[%s8274_s0 + %s7032_s7]]   ;;  %s7036_s7 = smov 86  }
  0x9c   :  { %8414 = sst [smem:[#allocation169_spill]] %s7501_s5 }
  0x9d   :  { %s7521_s5 = sld [smem:[%s8274_s0 + %s7033_s15]]   ;;  %s7037_s15 = smov 87  }
  0x9f   :  { %8415 = sst [smem:[#allocation170_spill]] %s7506_s8 }
  0xa0   :  { %8416 = sst [smem:[#allocation171_spill]] %s7511_s24 }
  0xa1   :  { %8417 = sst [smem:[#allocation172_spill]] %s7516_s27 }
  0xa2   :  { %s7526_s8 = sld [smem:[%s8274_s0 + %s7034_s22]]   ;;  %s7038_s22 = smov 88  }
  0xa3   :  { %8418 = sst [smem:[#allocation173_spill]] %s7521_s5 }
  0xa4   :  { %s7531_s24 = sld [smem:[%s8274_s0 + %s7035_s28]]   ;;  %s7039_s28 = smov 89  }
  0xa5   :  { %s7536_s27 = sld [smem:[%s8274_s0 + %s7036_s7]]   ;;  %s7040_s7 = smov 90  }
  0xa6   :  { %s7541_s5 = sld [smem:[%s8274_s0 + %s7037_s15]]   ;;  %s7041_s15 = smov 91  }
  0xa8   :  { %8419 = sst [smem:[#allocation174_spill]] %s7526_s8 }
  0xa9   :  { %s7546_s8 = sld [smem:[%s8274_s0 + %s7038_s22]]   ;;  %s7042_s22 = smov 92  }
  0xaa   :  { %8420 = sst [smem:[#allocation175_spill]] %s7531_s24 }
  0xab   :  { %8421 = sst [smem:[#allocation176_spill]] %s7536_s27 }
  0xac   :  { %8422 = sst [smem:[#allocation177_spill]] %s7541_s5 }
  0xad   :  { %s7551_s24 = sld [smem:[%s8274_s0 + %s7039_s28]]   ;;  %s7043_s28 = smov 93  }
  0xae   :  { %s7556_s27 = sld [smem:[%s8274_s0 + %s7040_s7]]  }
  0xaf   :  { %8423 = sst [smem:[#allocation178_spill]] %s7546_s8 }
  0xb0   :  { %s7561_s5 = sld [smem:[%s8274_s0 + %s7041_s15]]  }
  0xb1   :  { %s7566_s8 = sld [smem:[%s8274_s0 + %s7042_s22]]  }
  0xb3   :  { %8424 = sst [smem:[#allocation179_spill]] %s7551_s24 }
  0xb4   :  { %s7571_s24 = sld [smem:[%s8274_s0 + %s7043_s28]]  }
  0xb5   :  { %192 = vsyncpa [#allocation3], 0 }
  0xb6   :  { %193 = vsyncpa [#allocation5], 0 }
  0xb7   :  { %194 = vsyncpa [#allocation8], 0 }
  0xb8   :  { %195 = vsyncpa [#allocation11], 0 }
  0xb9   :  { %196 = vsyncpa [#allocation14], 0 }
  0xba   :  { %197 = vsyncpa [#allocation17], 0 }
  0xbb   :  { %198 = vsyncpa [#allocation20], 0 }
  0xbc   :  { %199 = vsyncpa [#allocation23], 0 }
  0xbd   :  { %200 = vsyncpa [#allocation26], 0 }
  0xbe   :  { %201 = vsyncpa [#allocation29], 0 }
  0xbf   :  { %202 = vsyncpa [#allocation32], 0 }
  0xc0   :  { %203 = vsyncpa [#allocation35], 0 }
  0xc1   :  { %204 = vsyncpa [#allocation38], 0 }
  0xc2   :  { %205 = vsyncpa [#allocation41], 0 }
  0xc3   :  { %206 = vsyncpa [#allocation44], 0 }
  0xc4   :  { %207 = vsyncpa [#allocation47], 0 }
  0xc5   :  { %208 = vsyncpa [#allocation50], 0 }
  0xc6   :  { %209 = vsyncpa [#allocation53], 0 }
  0xc7   :  { %210 = vsyncpa [#allocation56], 0 }
  0xc8   :  { %211 = vsyncpa [#allocation59], 0 }
  0xc9   :  { %212 = vsyncpa [#allocation62], 0 }
  0xca   :  { %213 = vsyncpa [#allocation65], 0 }
  0xcb   :  { %214 = vsyncpa [#allocation68], 0 }
  0xcc   :  { %215 = vsyncpa [#allocation71], 0 }
  0xcd   :  { %216 = vsyncpa [#allocation74], 0 }
  0xce   :  { %217 = vsyncpa [#allocation77], 0  ;;  %s7044_s0 = smov [#allocation4]   ;;  %s7045_s10 = smov [#allocation7]  }
  0xcf   :  { %s242_s7 = sshll.u32 %s7044_s0, 4  ;;  %s266_s11 = sshll.u32 %s7045_s10, 4  ;;  %s243_s7 = int_to_ptr.vmem [resolvable:$true] %s242_s7  ;;  %s267_s11 = int_to_ptr.vmem [resolvable:$true] %s266_s11 }
  0xd0   :  { %s5799_s15 = scalar_lea.hbm %s7131_s25, 16 }
  0xd1   :  { %p5800_p0 = scmp.ne.s32.totalorder %s7131_s25, %s5799_s15  ;;  %p5803_p1 = scmp.lt.u32.totalorder %s5799_s15, %s7131_s25 }
  0xd3   :  { %p5805_p2 = pnand %p5803_p1, %p5800_p0 }
  0xd5   :  { %5808 = shalt.err (!%p5805_p2)
}
  0xd6   :  { %s5809_s16 = scalar_lea.vmem %s243_s7, 16  ;;  %s5813_s18 = scalar_lea.vmem %s243_s7, 32 }
  0xd7   :  { %p5810_p3 = scmp.ne.s32.totalorder %s243_s7, %s5809_s16  ;;  %p5814_p4 = scmp.lt.s32.totalorder %s243_s7, %s243_s7 }
  0xd8   :  { %p5815_p5 = scmp.lt.s32.totalorder %s5813_s18, %s5809_s16 }
  0xda   :  { %p5816_p6 = por %p5815_p5, %p5814_p4 }
  0xdc   :  { %p5817_p7 = pnand %p5816_p6, %p5810_p3 }
  0xde   :  { %5820 = shalt.err (!%p5817_p7)
}
  0xdf   :  { %245 = dma.hbm_to_vmem [thread:$0]  %s7131_s25, 16, %s243_s7, [#allocation5]  }
  0xe0   :  { %s5821_s22 = scalar_lea.hbm %s7151_s14, 16 }
  0xe1   :  { %p5822_p8 = scmp.ne.s32.totalorder %s7151_s14, %s5821_s22  ;;  %p5825_p9 = scmp.lt.u32.totalorder %s5821_s22, %s7151_s14 }
  0xe3   :  { %p5827_p10 = pnand %p5825_p9, %p5822_p8 }
  0xe5   :  { %5830 = shalt.err (!%p5827_p10)
}
  0xe6   :  { %s5831_s23 = scalar_lea.vmem %s267_s11, 16  ;;  %s5835_s26 = scalar_lea.vmem %s267_s11, 32 }
  0xe7   :  { %p5832_p11 = scmp.ne.s32.totalorder %s267_s11, %s5831_s23  ;;  %p5836_p12 = scmp.lt.s32.totalorder %s267_s11, %s267_s11 }
  0xe8   :  { %p5837_p13 = scmp.lt.s32.totalorder %s5835_s26, %s5831_s23 }
  0xea   :  { %p5838_p0 = por %p5837_p13, %p5836_p12 }
  0xec   :  { %p5839_p1 = pnand %p5838_p0, %p5832_p11 }
  0xee   :  { %5842 = shalt.err (!%p5839_p1)
}
  0xef   :  { %269 = dma.hbm_to_vmem [thread:$0]  %s7151_s14, 16, %s267_s11, [#allocation8]  }
  0xf0   :  { %s7046_s28 = smov [#allocation10]   ;;  %s7047_s1 = smov [#allocation13]  }
  0xf1   :  { %s290_s25 = sshll.u32 %s7046_s28, 4  ;;  %s310_s2 = sshll.u32 %s7047_s1, 4  ;;  %s291_s25 = int_to_ptr.vmem [resolvable:$true] %s290_s25  ;;  %s311_s2 = int_to_ptr.vmem [resolvable:$true] %s310_s2 }
  0xf2   :  { %s5843_s0 = scalar_lea.hbm %s7171_s6, 16 }
  0xf3   :  { %p5844_p2 = scmp.ne.s32.totalorder %s7171_s6, %s5843_s0  ;;  %p5847_p3 = scmp.lt.u32.totalorder %s5843_s0, %s7171_s6 }
  0xf5   :  { %p5849_p4 = pnand %p5847_p3, %p5844_p2 }
  0xf7   :  { %5852 = shalt.err (!%p5849_p4)
}
  0xf8   :  { %s5853_s7 = scalar_lea.vmem %s291_s25, 16  ;;  %s5857_s10 = scalar_lea.vmem %s291_s25, 32 }
  0xf9   :  { %p5854_p5 = scmp.ne.s32.totalorder %s291_s25, %s5853_s7  ;;  %p5858_p6 = scmp.lt.s32.totalorder %s291_s25, %s291_s25 }
  0xfa   :  { %p5859_p7 = scmp.lt.s32.totalorder %s5857_s10, %s5853_s7 }
  0xfc   :  { %p5860_p8 = por %p5859_p7, %p5858_p6 }
  0xfe   :  { %p5861_p9 = pnand %p5860_p8, %p5854_p5 }
 0x100   :  { %5864 = shalt.err (!%p5861_p9)
}
 0x101   :  { %293 = dma.hbm_to_vmem [thread:$0]  %s7171_s6, 16, %s291_s25, [#allocation11]  }
 0x102   :  { %s5865_s14 = scalar_lea.hbm %s7181_s20, 16 }
 0x103   :  { %p5866_p10 = scmp.ne.s32.totalorder %s7181_s20, %s5865_s14  ;;  %p5869_p11 = scmp.lt.u32.totalorder %s5865_s14, %s7181_s20 }
 0x105   :  { %p5871_p12 = pnand %p5869_p11, %p5866_p10 }
 0x107   :  { %5874 = shalt.err (!%p5871_p12)
}
 0x108   :  { %s5875_s11 = scalar_lea.vmem %s311_s2, 16  ;;  %s5879_s15 = scalar_lea.vmem %s311_s2, 32 }
 0x109   :  { %p5876_p13 = scmp.ne.s32.totalorder %s311_s2, %s5875_s11  ;;  %p5880_p0 = scmp.lt.s32.totalorder %s311_s2, %s311_s2 }
 0x10a   :  { %p5881_p1 = scmp.lt.s32.totalorder %s5879_s15, %s5875_s11 }
 0x10c   :  { %p5882_p2 = por %p5881_p1, %p5880_p0 }
 0x10e   :  { %p5883_p3 = pnand %p5882_p2, %p5876_p13 }
 0x110   :  { %5886 = shalt.err (!%p5883_p3)
}
 0x111   :  { %313 = dma.hbm_to_vmem [thread:$0]  %s7181_s20, 16, %s311_s2, [#allocation14]  }
 0x112   :  { %s7048_s16 = smov [#allocation16]   ;;  %s7049_s18 = smov [#allocation19]  }
 0x113   :  { %s330_s6 = sshll.u32 %s7048_s16, 4  ;;  %s354_s22 = sshll.u32 %s7049_s18, 4  ;;  %s331_s6 = int_to_ptr.vmem [resolvable:$true] %s330_s6  ;;  %s355_s22 = int_to_ptr.vmem [resolvable:$true] %s354_s22 }
 0x114   :  { %s5887_s23 = scalar_lea.hbm %s7191_s4, 16 }
 0x115   :  { %p5888_p4 = scmp.ne.s32.totalorder %s7191_s4, %s5887_s23  ;;  %p5891_p5 = scmp.lt.u32.totalorder %s5887_s23, %s7191_s4 }
 0x117   :  { %p5893_p6 = pnand %p5891_p5, %p5888_p4 }
 0x119   :  { %5896 = shalt.err (!%p5893_p6)
}
 0x11a   :  { %s5897_s26 = scalar_lea.vmem %s331_s6, 16  ;;  %s5901_s28 = scalar_lea.vmem %s331_s6, 32 }
 0x11b   :  { %p5898_p7 = scmp.ne.s32.totalorder %s331_s6, %s5897_s26  ;;  %p5902_p8 = scmp.lt.s32.totalorder %s331_s6, %s331_s6 }
 0x11c   :  { %p5903_p9 = scmp.lt.s32.totalorder %s5901_s28, %s5897_s26 }
 0x11e   :  { %p5904_p10 = por %p5903_p9, %p5902_p8 }
 0x120   :  { %p5905_p11 = pnand %p5904_p10, %p5898_p7 }
 0x122   :  { %5908 = shalt.err (!%p5905_p11)
}
 0x123   :  { %333 = dma.hbm_to_vmem [thread:$0]  %s7191_s4, 16, %s331_s6, [#allocation17]  }
 0x124   :  { %s5909_s20 = scalar_lea.hbm %s7211_s17, 16 }
 0x125   :  { %p5910_p12 = scmp.ne.s32.totalorder %s7211_s17, %s5909_s20  ;;  %p5913_p13 = scmp.lt.u32.totalorder %s5909_s20, %s7211_s17 }
 0x127   :  { %p5915_p0 = pnand %p5913_p13, %p5910_p12 }
 0x129   :  { %5918 = shalt.err (!%p5915_p0)
}
 0x12a   :  { %s5919_s25 = scalar_lea.vmem %s355_s22, 16  ;;  %s5923_s1 = scalar_lea.vmem %s355_s22, 32 }
 0x12b   :  { %p5920_p1 = scmp.ne.s32.totalorder %s355_s22, %s5919_s25  ;;  %p5924_p2 = scmp.lt.s32.totalorder %s355_s22, %s355_s22 }
 0x12c   :  { %p5925_p3 = scmp.lt.s32.totalorder %s5923_s1, %s5919_s25 }
 0x12e   :  { %p5926_p4 = por %p5925_p3, %p5924_p2 }
 0x130   :  { %p5927_p5 = pnand %p5926_p4, %p5920_p1 }
 0x132   :  { %5930 = shalt.err (!%p5927_p5)
}
 0x133   :  { %357 = dma.hbm_to_vmem [thread:$0]  %s7211_s17, 16, %s355_s22, [#allocation20]  }
 0x134   :  { %s7050_s2 = smov [#allocation22]   ;;  %s7051_s0 = smov [#allocation25]  }
 0x135   :  { %s378_s4 = sshll.u32 %s7050_s2, 4  ;;  %s402_s7 = sshll.u32 %s7051_s0, 4  ;;  %s379_s4 = int_to_ptr.vmem [resolvable:$true] %s378_s4  ;;  %s403_s7 = int_to_ptr.vmem [resolvable:$true] %s402_s7 }
 0x136   :  { %s5931_s10 = scalar_lea.hbm %s7231_s30, 16 }
 0x137   :  { %p5932_p6 = scmp.ne.s32.totalorder %s7231_s30, %s5931_s10  ;;  %p5935_p7 = scmp.lt.u32.totalorder %s5931_s10, %s7231_s30 }
 0x139   :  { %p5937_p8 = pnand %p5935_p7, %p5932_p6 }
 0x13b   :  { %5940 = shalt.err (!%p5937_p8)
}
 0x13c   :  { %s5941_s14 = scalar_lea.vmem %s379_s4, 16  ;;  %s5945_s11 = scalar_lea.vmem %s379_s4, 32 }
 0x13d   :  { %p5942_p9 = scmp.ne.s32.totalorder %s379_s4, %s5941_s14  ;;  %p5946_p10 = scmp.lt.s32.totalorder %s379_s4, %s379_s4 }
 0x13e   :  { %p5947_p11 = scmp.lt.s32.totalorder %s5945_s11, %s5941_s14 }
 0x140   :  { %p5948_p12 = por %p5947_p11, %p5946_p10 }
 0x142   :  { %p5949_p13 = pnand %p5948_p12, %p5942_p9 }
 0x144   :  { %5952 = shalt.err (!%p5949_p13)
}
 0x145   :  { %381 = dma.hbm_to_vmem [thread:$0]  %s7231_s30, 16, %s379_s4, [#allocation23]  }
 0x146   :  { %s5953_s17 = scalar_lea.hbm %s7251_s9, 16 }
 0x147   :  { %p5954_p0 = scmp.ne.s32.totalorder %s7251_s9, %s5953_s17  ;;  %p5957_p1 = scmp.lt.u32.totalorder %s5953_s17, %s7251_s9 }
 0x149   :  { %p5959_p2 = pnand %p5957_p1, %p5954_p0 }
 0x14b   :  { %5962 = shalt.err (!%p5959_p2)
}
 0x14c   :  { %s5963_s15 = scalar_lea.vmem %s403_s7, 16  ;;  %s5967_s16 = scalar_lea.vmem %s403_s7, 32 }
 0x14d   :  { %p5964_p3 = scmp.ne.s32.totalorder %s403_s7, %s5963_s15  ;;  %p5968_p4 = scmp.lt.s32.totalorder %s403_s7, %s403_s7 }
 0x14e   :  { %p5969_p5 = scmp.lt.s32.totalorder %s5967_s16, %s5963_s15 }
 0x150   :  { %p5970_p6 = por %p5969_p5, %p5968_p4 }
 0x152   :  { %p5971_p7 = pnand %p5970_p6, %p5964_p3 }
 0x154   :  { %5974 = shalt.err (!%p5971_p7)
}
 0x155   :  { %405 = dma.hbm_to_vmem [thread:$0]  %s7251_s9, 16, %s403_s7, [#allocation26]  }
 0x156   :  { %s7052_s6 = smov [#allocation28]   ;;  %s7053_s18 = smov [#allocation31]  }
 0x157   :  { %s424_s30 = sshll.u32 %s7052_s6, 4  ;;  %s444_s22 = sshll.u32 %s7053_s18, 4  ;;  %s425_s30 = int_to_ptr.vmem [resolvable:$true] %s424_s30  ;;  %s445_s22 = int_to_ptr.vmem [resolvable:$true] %s444_s22 }
 0x158   :  { %s5975_s23 = scalar_lea.hbm %s7266_s21, 16 }
 0x159   :  { %p5976_p8 = scmp.ne.s32.totalorder %s7266_s21, %s5975_s23  ;;  %p5979_p9 = scmp.lt.u32.totalorder %s5975_s23, %s7266_s21 }
 0x15b   :  { %p5981_p10 = pnand %p5979_p9, %p5976_p8 }
 0x15d   :  { %5984 = shalt.err (!%p5981_p10)
}
 0x15e   :  { %s5985_s26 = scalar_lea.vmem %s425_s30, 16  ;;  %s5989_s28 = scalar_lea.vmem %s425_s30, 32 }
 0x15f   :  { %p5986_p11 = scmp.ne.s32.totalorder %s425_s30, %s5985_s26  ;;  %p5990_p12 = scmp.lt.s32.totalorder %s425_s30, %s425_s30 }
 0x160   :  { %p5991_p13 = scmp.lt.s32.totalorder %s5989_s28, %s5985_s26 }
 0x162   :  { %p5992_p0 = por %p5991_p13, %p5990_p12 }
 0x164   :  { %p5993_p1 = pnand %p5992_p0, %p5986_p11 }
 0x166   :  { %5996 = shalt.err (!%p5993_p1)
}
 0x167   :  { %427 = dma.hbm_to_vmem [thread:$0]  %s7266_s21, 16, %s425_s30, [#allocation29]  }
 0x168   :  { %s5997_s9 = scalar_lea.hbm %s7276_s19, 16 }
 0x169   :  { %p5998_p2 = scmp.ne.s32.totalorder %s7276_s19, %s5997_s9  ;;  %p6001_p3 = scmp.lt.u32.totalorder %s5997_s9, %s7276_s19 }
 0x16b   :  { %p6003_p4 = pnand %p6001_p3, %p5998_p2 }
 0x16d   :  { %6006 = shalt.err (!%p6003_p4)
}
 0x16e   :  { %s6007_s20 = scalar_lea.vmem %s445_s22, 16  ;;  %s6011_s25 = scalar_lea.vmem %s445_s22, 32 }
 0x16f   :  { %p6008_p5 = scmp.ne.s32.totalorder %s445_s22, %s6007_s20  ;;  %p6012_p6 = scmp.lt.s32.totalorder %s445_s22, %s445_s22 }
 0x170   :  { %p6013_p7 = scmp.lt.s32.totalorder %s6011_s25, %s6007_s20 }
 0x172   :  { %p6014_p8 = por %p6013_p7, %p6012_p6 }
 0x174   :  { %p6015_p9 = pnand %p6014_p8, %p6008_p5 }
 0x176   :  { %6018 = shalt.err (!%p6015_p9)
}
 0x177   :  { %447 = dma.hbm_to_vmem [thread:$0]  %s7276_s19, 16, %s445_s22, [#allocation32]  }
 0x178   :  { %s7054_s1 = smov [#allocation34]   ;;  %s7055_s2 = smov [#allocation37]  }
 0x179   :  { %s466_s21 = sshll.u32 %s7054_s1, 4  ;;  %s490_s4 = sshll.u32 %s7055_s2, 4  ;;  %s467_s21 = int_to_ptr.vmem [resolvable:$true] %s466_s21  ;;  %s491_s4 = int_to_ptr.vmem [resolvable:$true] %s490_s4 }
 0x17a   :  { %s6019_s0 = scalar_lea.hbm %s7291_s13, 16 }
 0x17b   :  { %p6020_p10 = scmp.ne.s32.totalorder %s7291_s13, %s6019_s0  ;;  %p6023_p11 = scmp.lt.u32.totalorder %s6019_s0, %s7291_s13 }
 0x17d   :  { %p6025_p12 = pnand %p6023_p11, %p6020_p10 }
 0x17f   :  { %6028 = shalt.err (!%p6025_p12)
}
 0x180   :  { %s6029_s7 = scalar_lea.vmem %s467_s21, 16  ;;  %s6033_s10 = scalar_lea.vmem %s467_s21, 32 }
 0x181   :  { %p6030_p13 = scmp.ne.s32.totalorder %s467_s21, %s6029_s7  ;;  %p6034_p0 = scmp.lt.s32.totalorder %s467_s21, %s467_s21 }
 0x182   :  { %p6035_p1 = scmp.lt.s32.totalorder %s6033_s10, %s6029_s7 }
 0x184   :  { %p6036_p2 = por %p6035_p1, %p6034_p0 }
 0x186   :  { %p6037_p3 = pnand %p6036_p2, %p6030_p13 }
 0x188   :  { %6040 = shalt.err (!%p6037_p3)
}
 0x189   :  { %469 = dma.hbm_to_vmem [thread:$0]  %s7291_s13, 16, %s467_s21, [#allocation35]  }
 0x18a   :  { %s6041_s19 = scalar_lea.hbm %s7311_s12, 16 }
 0x18b   :  { %p6042_p4 = scmp.ne.s32.totalorder %s7311_s12, %s6041_s19  ;;  %p6045_p5 = scmp.lt.u32.totalorder %s6041_s19, %s7311_s12 }
 0x18d   :  { %p6047_p6 = pnand %p6045_p5, %p6042_p4 }
 0x18f   :  { %6050 = shalt.err (!%p6047_p6)
}
 0x190   :  { %s6051_s14 = scalar_lea.vmem %s491_s4, 16  ;;  %s6055_s11 = scalar_lea.vmem %s491_s4, 32 }
 0x191   :  { %p6052_p7 = scmp.ne.s32.totalorder %s491_s4, %s6051_s14  ;;  %p6056_p8 = scmp.lt.s32.totalorder %s491_s4, %s491_s4 }
 0x192   :  { %p6057_p9 = scmp.lt.s32.totalorder %s6055_s11, %s6051_s14 }
 0x194   :  { %p6058_p10 = por %p6057_p9, %p6056_p8 }
 0x196   :  { %p6059_p11 = pnand %p6058_p10, %p6052_p7 }
 0x198   :  { %6062 = shalt.err (!%p6059_p11)
}
 0x199   :  { %493 = dma.hbm_to_vmem [thread:$0]  %s7311_s12, 16, %s491_s4, [#allocation38]  }
 0x19a   :  { %s7056_s17 = smov [#allocation40]   ;;  %s7057_s15 = smov [#allocation43]  }
 0x19b   :  { %s512_s13 = sshll.u32 %s7056_s17, 4  ;;  %s536_s16 = sshll.u32 %s7057_s15, 4  ;;  %s513_s13 = int_to_ptr.vmem [resolvable:$true] %s512_s13  ;;  %s537_s16 = int_to_ptr.vmem [resolvable:$true] %s536_s16 }
 0x19c   :  { %s6063_s6 = scalar_lea.hbm %s7321_s29, 16 }
 0x19d   :  { %p6064_p12 = scmp.ne.s32.totalorder %s7321_s29, %s6063_s6  ;;  %p6067_p13 = scmp.lt.u32.totalorder %s6063_s6, %s7321_s29 }
 0x19f   :  { %p6069_p0 = pnand %p6067_p13, %p6064_p12 }
 0x1a1   :  { %6072 = shalt.err (!%p6069_p0)
}
 0x1a2   :  { %s6073_s30 = scalar_lea.vmem %s513_s13, 16  ;;  %s6077_s18 = scalar_lea.vmem %s513_s13, 32 }
 0x1a3   :  { %p6074_p1 = scmp.ne.s32.totalorder %s513_s13, %s6073_s30  ;;  %p6078_p2 = scmp.lt.s32.totalorder %s513_s13, %s513_s13 }
 0x1a4   :  { %p6079_p3 = scmp.lt.s32.totalorder %s6077_s18, %s6073_s30 }
 0x1a6   :  { %p6080_p4 = por %p6079_p3, %p6078_p2 }
 0x1a8   :  { %p6081_p5 = pnand %p6080_p4, %p6074_p1 }
 0x1aa   :  { %6084 = shalt.err (!%p6081_p5)
}
 0x1ab   :  { %515 = dma.hbm_to_vmem [thread:$0]  %s7321_s29, 16, %s513_s13, [#allocation41]  }
 0x1ac   :  { %s6085_s12 = scalar_lea.hbm %s7341_s3, 16 }
 0x1ad   :  { %p6086_p6 = scmp.ne.s32.totalorder %s7341_s3, %s6085_s12  ;;  %p6089_p7 = scmp.lt.u32.totalorder %s6085_s12, %s7341_s3 }
 0x1af   :  { %p6091_p8 = pnand %p6089_p7, %p6086_p6 }
 0x1b1   :  { %6094 = shalt.err (!%p6091_p8)
}
 0x1b2   :  { %s6095_s22 = scalar_lea.vmem %s537_s16, 16  ;;  %s6099_s23 = scalar_lea.vmem %s537_s16, 32 }
 0x1b3   :  { %p6096_p9 = scmp.ne.s32.totalorder %s537_s16, %s6095_s22  ;;  %p6100_p10 = scmp.lt.s32.totalorder %s537_s16, %s537_s16 }
 0x1b4   :  { %p6101_p11 = scmp.lt.s32.totalorder %s6099_s23, %s6095_s22 }
 0x1b6   :  { %p6102_p12 = por %p6101_p11, %p6100_p10 }
 0x1b8   :  { %p6103_p13 = pnand %p6102_p12, %p6096_p9 }
 0x1ba   :  { %6106 = shalt.err (!%p6103_p13)
}
 0x1bb   :  { %s8425_s26 = sld [smem:[#allocation139_spill]]  ;;  %s7058_s28 = smov [#allocation46]  }
 0x1bc   :  { %539 = dma.hbm_to_vmem [thread:$0]  %s7341_s3, 16, %s537_s16, [#allocation44]  }
 0x1bd   :  { %s556_s29 = sshll.u32 %s7058_s28, 4  ;;  %s7059_s9 = smov [#allocation49]   ;;  %s557_s29 = int_to_ptr.vmem [resolvable:$true] %s556_s29 }
 0x1be   :  { %s576_s20 = sshll.u32 %s7059_s9, 4  ;;  %s577_s20 = int_to_ptr.vmem [resolvable:$true] %s576_s20 }
 0x1c1   :  { %s6107_s25 = scalar_lea.hbm %s8425_s26, 16 }
 0x1c2   :  { %p6108_p0 = scmp.ne.s32.totalorder %s8425_s26, %s6107_s25  ;;  %p6111_p1 = scmp.lt.u32.totalorder %s6107_s25, %s8425_s26 }
 0x1c4   :  { %p6113_p2 = pnand %p6111_p1, %p6108_p0 }
 0x1c6   :  { %6116 = shalt.err (!%p6113_p2)
}
 0x1c7   :  { %s6117_s1 = scalar_lea.vmem %s557_s29, 16  ;;  %s6121_s21 = scalar_lea.vmem %s557_s29, 32 }
 0x1c8   :  { %p6118_p3 = scmp.ne.s32.totalorder %s557_s29, %s6117_s1  ;;  %p6122_p4 = scmp.lt.s32.totalorder %s557_s29, %s557_s29 }
 0x1c9   :  { %p6123_p5 = scmp.lt.s32.totalorder %s6121_s21, %s6117_s1 }
 0x1cb   :  { %p6124_p6 = por %p6123_p5, %p6122_p4 }
 0x1cd   :  { %p6125_p7 = pnand %p6124_p6, %p6118_p3 }
 0x1cf   :  { %6128 = shalt.err (!%p6125_p7)
}
 0x1d0   :  { %s8426_s3 = sld [smem:[#allocation141_spill]] }
 0x1d1   :  { %559 = dma.hbm_to_vmem [thread:$0]  %s8425_s26, 16, %s557_s29, [#allocation47]  }
 0x1d6   :  { %s6129_s2 = scalar_lea.hbm %s8426_s3, 16 }
 0x1d7   :  { %p6130_p8 = scmp.ne.s32.totalorder %s8426_s3, %s6129_s2  ;;  %p6133_p9 = scmp.lt.u32.totalorder %s6129_s2, %s8426_s3 }
 0x1d9   :  { %p6135_p10 = pnand %p6133_p9, %p6130_p8 }
 0x1db   :  { %6138 = shalt.err (!%p6135_p10)
}
 0x1dc   :  { %s6139_s4 = scalar_lea.vmem %s577_s20, 16  ;;  %s6143_s0 = scalar_lea.vmem %s577_s20, 32 }
 0x1dd   :  { %p6140_p11 = scmp.ne.s32.totalorder %s577_s20, %s6139_s4  ;;  %p6144_p12 = scmp.lt.s32.totalorder %s577_s20, %s577_s20 }
 0x1de   :  { %p6145_p13 = scmp.lt.s32.totalorder %s6143_s0, %s6139_s4 }
 0x1e0   :  { %p6146_p0 = por %p6145_p13, %p6144_p12 }
 0x1e2   :  { %p6147_p1 = pnand %p6146_p0, %p6140_p11 }
 0x1e4   :  { %6150 = shalt.err (!%p6147_p1)
}
 0x1e5   :  { %s8427_s7 = sld [smem:[#allocation145_spill]]  ;;  %s7060_s10 = smov [#allocation52]  }
 0x1e6   :  { %579 = dma.hbm_to_vmem [thread:$0]  %s8426_s3, 16, %s577_s20, [#allocation50]  }
 0x1e7   :  { %s600_s19 = sshll.u32 %s7060_s10, 4  ;;  %s7061_s14 = smov [#allocation55]   ;;  %s601_s19 = int_to_ptr.vmem [resolvable:$true] %s600_s19 }
 0x1e8   :  { %s622_s11 = sshll.u32 %s7061_s14, 4  ;;  %s623_s11 = int_to_ptr.vmem [resolvable:$true] %s622_s11 }
 0x1eb   :  { %s6151_s17 = scalar_lea.hbm %s8427_s7, 16 }
 0x1ec   :  { %p6152_p2 = scmp.ne.s32.totalorder %s8427_s7, %s6151_s17  ;;  %p6155_p3 = scmp.lt.u32.totalorder %s6151_s17, %s8427_s7 }
 0x1ee   :  { %p6157_p4 = pnand %p6155_p3, %p6152_p2 }
 0x1f0   :  { %6160 = shalt.err (!%p6157_p4)
}
 0x1f1   :  { %s6161_s13 = scalar_lea.vmem %s601_s19, 16  ;;  %s6165_s15 = scalar_lea.vmem %s601_s19, 32 }
 0x1f2   :  { %p6162_p5 = scmp.ne.s32.totalorder %s601_s19, %s6161_s13  ;;  %p6166_p6 = scmp.lt.s32.totalorder %s601_s19, %s601_s19 }
 0x1f3   :  { %p6167_p7 = scmp.lt.s32.totalorder %s6165_s15, %s6161_s13 }
 0x1f5   :  { %p6168_p8 = por %p6167_p7, %p6166_p6 }
 0x1f7   :  { %p6169_p9 = pnand %p6168_p8, %p6162_p5 }
 0x1f9   :  { %6172 = shalt.err (!%p6169_p9)
}
 0x1fa   :  { %s8428_s16 = sld [smem:[#allocation148_spill]] }
 0x1fb   :  { %603 = dma.hbm_to_vmem [thread:$0]  %s8427_s7, 16, %s601_s19, [#allocation53]  }
 0x200   :  { %s6173_s6 = scalar_lea.hbm %s8428_s16, 16 }
 0x201   :  { %p6174_p10 = scmp.ne.s32.totalorder %s8428_s16, %s6173_s6  ;;  %p6177_p11 = scmp.lt.u32.totalorder %s6173_s6, %s8428_s16 }
 0x203   :  { %p6179_p12 = pnand %p6177_p11, %p6174_p10 }
 0x205   :  { %6182 = shalt.err (!%p6179_p12)
}
 0x206   :  { %s6183_s30 = scalar_lea.vmem %s623_s11, 16  ;;  %s6187_s18 = scalar_lea.vmem %s623_s11, 32 }
 0x207   :  { %p6184_p13 = scmp.ne.s32.totalorder %s623_s11, %s6183_s30  ;;  %p6188_p0 = scmp.lt.s32.totalorder %s623_s11, %s623_s11 }
 0x208   :  { %p6189_p1 = scmp.lt.s32.totalorder %s6187_s18, %s6183_s30 }
 0x20a   :  { %p6190_p2 = por %p6189_p1, %p6188_p0 }
 0x20c   :  { %p6191_p3 = pnand %p6190_p2, %p6184_p13 }
 0x20e   :  { %6194 = shalt.err (!%p6191_p3)
}
 0x20f   :  { %s8429_s12 = sld [smem:[#allocation150_spill]]  ;;  %s7062_s22 = smov [#allocation58]  }
 0x210   :  { %625 = dma.hbm_to_vmem [thread:$0]  %s8428_s16, 16, %s623_s11, [#allocation56]  }
 0x211   :  { %s642_s23 = sshll.u32 %s7062_s22, 4  ;;  %s7063_s26 = smov [#allocation61]   ;;  %s643_s23 = int_to_ptr.vmem [resolvable:$true] %s642_s23 }
 0x212   :  { %s664_s28 = sshll.u32 %s7063_s26, 4  ;;  %s665_s28 = int_to_ptr.vmem [resolvable:$true] %s664_s28 }
 0x215   :  { %s6195_s29 = scalar_lea.hbm %s8429_s12, 16 }
 0x216   :  { %p6196_p4 = scmp.ne.s32.totalorder %s8429_s12, %s6195_s29  ;;  %p6199_p5 = scmp.lt.u32.totalorder %s6195_s29, %s8429_s12 }
 0x218   :  { %p6201_p6 = pnand %p6199_p5, %p6196_p4 }
 0x21a   :  { %6204 = shalt.err (!%p6201_p6)
}
 0x21b   :  { %s6205_s9 = scalar_lea.vmem %s643_s23, 16  ;;  %s6209_s20 = scalar_lea.vmem %s643_s23, 32 }
 0x21c   :  { %p6206_p7 = scmp.ne.s32.totalorder %s643_s23, %s6205_s9  ;;  %p6210_p8 = scmp.lt.s32.totalorder %s643_s23, %s643_s23 }
 0x21d   :  { %p6211_p9 = scmp.lt.s32.totalorder %s6209_s20, %s6205_s9 }
 0x21f   :  { %p6212_p10 = por %p6211_p9, %p6210_p8 }
 0x221   :  { %p6213_p11 = pnand %p6212_p10, %p6206_p7 }
 0x223   :  { %6216 = shalt.err (!%p6213_p11)
}
 0x224   :  { %s8430_s25 = sld [smem:[#allocation153_spill]] }
 0x225   :  { %645 = dma.hbm_to_vmem [thread:$0]  %s8429_s12, 16, %s643_s23, [#allocation59]  }
 0x22a   :  { %s6217_s1 = scalar_lea.hbm %s8430_s25, 16 }
 0x22b   :  { %p6218_p12 = scmp.ne.s32.totalorder %s8430_s25, %s6217_s1  ;;  %p6221_p13 = scmp.lt.u32.totalorder %s6217_s1, %s8430_s25 }
 0x22d   :  { %p6223_p0 = pnand %p6221_p13, %p6218_p12 }
 0x22f   :  { %6226 = shalt.err (!%p6223_p0)
}
 0x230   :  { %s6227_s21 = scalar_lea.vmem %s665_s28, 16  ;;  %s6231_s3 = scalar_lea.vmem %s665_s28, 32 }
 0x231   :  { %p6228_p1 = scmp.ne.s32.totalorder %s665_s28, %s6227_s21  ;;  %p6232_p2 = scmp.lt.s32.totalorder %s665_s28, %s665_s28 }
 0x232   :  { %p6233_p3 = scmp.lt.s32.totalorder %s6231_s3, %s6227_s21 }
 0x234   :  { %p6234_p4 = por %p6233_p3, %p6232_p2 }
 0x236   :  { %p6235_p5 = pnand %p6234_p4, %p6228_p1 }
 0x238   :  { %6238 = shalt.err (!%p6235_p5)
}
 0x239   :  { %s8431_s2 = sld [smem:[#allocation157_spill]]  ;;  %s7064_s4 = smov [#allocation64]  }
 0x23a   :  { %667 = dma.hbm_to_vmem [thread:$0]  %s8430_s25, 16, %s665_s28, [#allocation62]  }
 0x23b   :  { %s688_s0 = sshll.u32 %s7064_s4, 4  ;;  %s7065_s7 = smov [#allocation67]   ;;  %s689_s0 = int_to_ptr.vmem [resolvable:$true] %s688_s0 }
 0x23c   :  { %s710_s10 = sshll.u32 %s7065_s7, 4  ;;  %s711_s10 = int_to_ptr.vmem [resolvable:$true] %s710_s10 }
 0x23f   :  { %s6239_s19 = scalar_lea.hbm %s8431_s2, 16 }
 0x240   :  { %p6240_p6 = scmp.ne.s32.totalorder %s8431_s2, %s6239_s19  ;;  %p6243_p7 = scmp.lt.u32.totalorder %s6239_s19, %s8431_s2 }
 0x242   :  { %p6245_p8 = pnand %p6243_p7, %p6240_p6 }
 0x244   :  { %6248 = shalt.err (!%p6245_p8)
}
 0x245   :  { %s6249_s14 = scalar_lea.vmem %s689_s0, 16  ;;  %s6253_s11 = scalar_lea.vmem %s689_s0, 32 }
 0x246   :  { %p6250_p9 = scmp.ne.s32.totalorder %s689_s0, %s6249_s14  ;;  %p6254_p10 = scmp.lt.s32.totalorder %s689_s0, %s689_s0 }
 0x247   :  { %p6255_p11 = scmp.lt.s32.totalorder %s6253_s11, %s6249_s14 }
 0x249   :  { %p6256_p12 = por %p6255_p11, %p6254_p10 }
 0x24b   :  { %p6257_p13 = pnand %p6256_p12, %p6250_p9 }
 0x24d   :  { %6260 = shalt.err (!%p6257_p13)
}
 0x24e   :  { %s8432_s17 = sld [smem:[#allocation160_spill]] }
 0x24f   :  { %691 = dma.hbm_to_vmem [thread:$0]  %s8431_s2, 16, %s689_s0, [#allocation65]  }
 0x254   :  { %s6261_s13 = scalar_lea.hbm %s8432_s17, 16 }
 0x255   :  { %p6262_p0 = scmp.ne.s32.totalorder %s8432_s17, %s6261_s13  ;;  %p6265_p1 = scmp.lt.u32.totalorder %s6261_s13, %s8432_s17 }
 0x257   :  { %p6267_p2 = pnand %p6265_p1, %p6262_p0 }
 0x259   :  { %6270 = shalt.err (!%p6267_p2)
}
 0x25a   :  { %s6271_s15 = scalar_lea.vmem %s711_s10, 16  ;;  %s6275_s16 = scalar_lea.vmem %s711_s10, 32 }
 0x25b   :  { %p6272_p3 = scmp.ne.s32.totalorder %s711_s10, %s6271_s15  ;;  %p6276_p4 = scmp.lt.s32.totalorder %s711_s10, %s711_s10 }
 0x25c   :  { %p6277_p5 = scmp.lt.s32.totalorder %s6275_s16, %s6271_s15 }
 0x25e   :  { %p6278_p6 = por %p6277_p5, %p6276_p4 }
 0x260   :  { %p6279_p7 = pnand %p6278_p6, %p6272_p3 }
 0x262   :  { %6282 = shalt.err (!%p6279_p7)
}
 0x263   :  { %s8433_s6 = sld [smem:[#allocation162_spill]]  ;;  %s7066_s30 = smov [#allocation70]  }
 0x264   :  { %713 = dma.hbm_to_vmem [thread:$0]  %s8432_s17, 16, %s711_s10, [#allocation68]  }
 0x265   :  { %s730_s18 = sshll.u32 %s7066_s30, 4  ;;  %s7067_s12 = smov [#allocation73]   ;;  %s731_s18 = int_to_ptr.vmem [resolvable:$true] %s730_s18 }
 0x266   :  { %s750_s22 = sshll.u32 %s7067_s12, 4  ;;  %s751_s22 = int_to_ptr.vmem [resolvable:$true] %s750_s22 }
 0x269   :  { %s6283_s23 = scalar_lea.hbm %s8433_s6, 16 }
 0x26a   :  { %p6284_p8 = scmp.ne.s32.totalorder %s8433_s6, %s6283_s23  ;;  %p6287_p9 = scmp.lt.u32.totalorder %s6283_s23, %s8433_s6 }
 0x26c   :  { %p6289_p10 = pnand %p6287_p9, %p6284_p8 }
 0x26e   :  { %6292 = shalt.err (!%p6289_p10)
}
 0x26f   :  { %s6293_s26 = scalar_lea.vmem %s731_s18, 16  ;;  %s6297_s28 = scalar_lea.vmem %s731_s18, 32 }
 0x270   :  { %p6294_p11 = scmp.ne.s32.totalorder %s731_s18, %s6293_s26  ;;  %p6298_p12 = scmp.lt.s32.totalorder %s731_s18, %s731_s18 }
 0x271   :  { %p6299_p13 = scmp.lt.s32.totalorder %s6297_s28, %s6293_s26 }
 0x273   :  { %p6300_p0 = por %p6299_p13, %p6298_p12 }
 0x275   :  { %p6301_p1 = pnand %p6300_p0, %p6294_p11 }
 0x277   :  { %6304 = shalt.err (!%p6301_p1)
}
 0x278   :  { %s8434_s29 = sld [smem:[#allocation164_spill]] }
 0x279   :  { %733 = dma.hbm_to_vmem [thread:$0]  %s8433_s6, 16, %s731_s18, [#allocation71]  }
 0x27e   :  { %s6305_s9 = scalar_lea.hbm %s8434_s29, 16 }
 0x27f   :  { %p6306_p2 = scmp.ne.s32.totalorder %s8434_s29, %s6305_s9  ;;  %p6309_p3 = scmp.lt.u32.totalorder %s6305_s9, %s8434_s29 }
 0x281   :  { %p6311_p4 = pnand %p6309_p3, %p6306_p2 }
 0x283   :  { %6314 = shalt.err (!%p6311_p4)
}
 0x284   :  { %s6315_s20 = scalar_lea.vmem %s751_s22, 16  ;;  %s6319_s25 = scalar_lea.vmem %s751_s22, 32 }
 0x285   :  { %p6316_p5 = scmp.ne.s32.totalorder %s751_s22, %s6315_s20  ;;  %p6320_p6 = scmp.lt.s32.totalorder %s751_s22, %s751_s22 }
 0x286   :  { %p6321_p7 = scmp.lt.s32.totalorder %s6319_s25, %s6315_s20 }
 0x288   :  { %p6322_p8 = por %p6321_p7, %p6320_p6 }
 0x28a   :  { %p6323_p9 = pnand %p6322_p8, %p6316_p5 }
 0x28c   :  { %6326 = shalt.err (!%p6323_p9)
}
 0x28d   :  { %s8435_s1 = sld [smem:[#allocation104_spill]]  ;;  %s7068_s21 = smov [#allocation2]  }
 0x28e   :  { %753 = dma.hbm_to_vmem [thread:$0]  %s8434_s29, 16, %s751_s22, [#allocation74]  }
 0x28f   :  { %s224_s3 = sshll.u32 %s7068_s21, 4  ;;  %s7069_s2 = smov [#allocation6]   ;;  %s225_s3 = int_to_ptr.vmem [resolvable:$true] %s224_s3 }
 0x290   :  { %s254_s4 = sshll.u32 %s7069_s2, 4  ;;  %s255_s4 = int_to_ptr.vmem [resolvable:$true] %s254_s4 }
 0x293   :  { %s6327_s0 = scalar_lea.hbm %s8435_s1, 64 }
 0x294   :  { %p6328_p10 = scmp.ne.s32.totalorder %s8435_s1, %s6327_s0  ;;  %p6331_p11 = scmp.lt.u32.totalorder %s6327_s0, %s8435_s1 }
 0x296   :  { %p6333_p12 = pnand %p6331_p11, %p6328_p10 }
 0x298   :  { %6336 = shalt.err (!%p6333_p12)
}
 0x299   :  { %s6337_s7 = scalar_lea.vmem %s225_s3, 64  ;;  %p6342_p0 = scmp.lt.s32.totalorder %s225_s3, %s225_s3 }
 0x29a   :  { %p6338_p13 = scmp.ne.s32.totalorder %s225_s3, %s6337_s7  ;;  %p6343_p1 = scmp.lt.s32.totalorder %s6337_s7, %s6337_s7 }
 0x29c   :  { %p6344_p2 = por %p6343_p1, %p6342_p0 }
 0x29e   :  { %p6345_p3 = pnand %p6344_p2, %p6338_p13 }
 0x2a0   :  { %6348 = shalt.err (!%p6345_p3)
}
 0x2a1   :  { %s8436_s10 = sld [smem:[#allocation110_spill]] }
 0x2a2   :  { %227 = dma.hbm_to_vmem [thread:$0]  %s8435_s1, 64, %s225_s3, [#allocation3]  }
 0x2a7   :  { %s6349_s19 = scalar_lea.hbm %s8436_s10, 16 }
 0x2a8   :  { %p6350_p4 = scmp.ne.s32.totalorder %s8436_s10, %s6349_s19  ;;  %p6353_p5 = scmp.lt.u32.totalorder %s6349_s19, %s8436_s10 }
 0x2aa   :  { %p6355_p6 = pnand %p6353_p5, %p6350_p4 }
 0x2ac   :  { %6358 = shalt.err (!%p6355_p6)
}
 0x2ad   :  { %s6359_s14 = scalar_lea.vmem %s255_s4, 16  ;;  %s6363_s11 = scalar_lea.vmem %s255_s4, 32 }
 0x2ae   :  { %p6360_p7 = scmp.ne.s32.totalorder %s255_s4, %s6359_s14  ;;  %p6364_p8 = scmp.lt.s32.totalorder %s255_s4, %s255_s4 }
 0x2af   :  { %p6365_p9 = scmp.lt.s32.totalorder %s6363_s11, %s6359_s14 }
 0x2b1   :  { %p6366_p10 = por %p6365_p9, %p6364_p8 }
 0x2b3   :  { %p6367_p11 = pnand %p6366_p10, %p6360_p7 }
 0x2b5   :  { %6370 = shalt.err (!%p6367_p11)
}
 0x2b6   :  { %s8437_s17 = sld [smem:[#allocation113_spill]]  ;;  %s7070_s13 = smov [#allocation9]  }
 0x2b7   :  { %257 = dma.hbm_to_vmem [thread:$0]  %s8436_s10, 16, %s255_s4, [#allocation5]  }
 0x2b8   :  { %s278_s15 = sshll.u32 %s7070_s13, 4  ;;  %s7071_s16 = smov [#allocation12]   ;;  %s279_s15 = int_to_ptr.vmem [resolvable:$true] %s278_s15 }
 0x2b9   :  { %s300_s6 = sshll.u32 %s7071_s16, 4  ;;  %s301_s6 = int_to_ptr.vmem [resolvable:$true] %s300_s6 }
 0x2bc   :  { %s6371_s30 = scalar_lea.hbm %s8437_s17, 16 }
 0x2bd   :  { %p6372_p12 = scmp.ne.s32.totalorder %s8437_s17, %s6371_s30  ;;  %p6375_p13 = scmp.lt.u32.totalorder %s6371_s30, %s8437_s17 }
 0x2bf   :  { %p6377_p0 = pnand %p6375_p13, %p6372_p12 }
 0x2c1   :  { %6380 = shalt.err (!%p6377_p0)
}
 0x2c2   :  { %s6381_s18 = scalar_lea.vmem %s279_s15, 16  ;;  %s6385_s12 = scalar_lea.vmem %s279_s15, 32 }
 0x2c3   :  { %p6382_p1 = scmp.ne.s32.totalorder %s279_s15, %s6381_s18  ;;  %p6386_p2 = scmp.lt.s32.totalorder %s279_s15, %s279_s15 }
 0x2c4   :  { %p6387_p3 = scmp.lt.s32.totalorder %s6385_s12, %s6381_s18 }
 0x2c6   :  { %p6388_p4 = por %p6387_p3, %p6386_p2 }
 0x2c8   :  { %p6389_p5 = pnand %p6388_p4, %p6382_p1 }
 0x2ca   :  { %6392 = shalt.err (!%p6389_p5)
}
 0x2cb   :  { %s8438_s22 = sld [smem:[#allocation115_spill]] }
 0x2cc   :  { %281 = dma.hbm_to_vmem [thread:$0]  %s8437_s17, 16, %s279_s15, [#allocation8]  }
 0x2d1   :  { %s6393_s23 = scalar_lea.hbm %s8438_s22, 16 }
 0x2d2   :  { %p6394_p6 = scmp.ne.s32.totalorder %s8438_s22, %s6393_s23  ;;  %p6397_p7 = scmp.lt.u32.totalorder %s6393_s23, %s8438_s22 }
 0x2d4   :  { %p6399_p8 = pnand %p6397_p7, %p6394_p6 }
 0x2d6   :  { %6402 = shalt.err (!%p6399_p8)
}
 0x2d7   :  { %s6403_s26 = scalar_lea.vmem %s301_s6, 16  ;;  %s6407_s28 = scalar_lea.vmem %s301_s6, 32 }
 0x2d8   :  { %p6404_p9 = scmp.ne.s32.totalorder %s301_s6, %s6403_s26  ;;  %p6408_p10 = scmp.lt.s32.totalorder %s301_s6, %s301_s6 }
 0x2d9   :  { %p6409_p11 = scmp.lt.s32.totalorder %s6407_s28, %s6403_s26 }
 0x2db   :  { %p6410_p12 = por %p6409_p11, %p6408_p10 }
 0x2dd   :  { %p6411_p13 = pnand %p6410_p12, %p6404_p9 }
 0x2df   :  { %6414 = shalt.err (!%p6411_p13)
}
 0x2e0   :  { %s8439_s29 = sld [smem:[#allocation116_spill]]  ;;  %s7072_s9 = smov [#allocation15]  }
 0x2e1   :  { %303 = dma.hbm_to_vmem [thread:$0]  %s8438_s22, 16, %s301_s6, [#allocation11]  }
 0x2e2   :  { %s320_s20 = sshll.u32 %s7072_s9, 4  ;;  %s7073_s25 = smov [#allocation18]   ;;  %s321_s20 = int_to_ptr.vmem [resolvable:$true] %s320_s20 }
 0x2e3   :  { %s342_s1 = sshll.u32 %s7073_s25, 4  ;;  %s343_s1 = int_to_ptr.vmem [resolvable:$true] %s342_s1 }
 0x2e6   :  { %s6415_s21 = scalar_lea.hbm %s8439_s29, 16 }
 0x2e7   :  { %p6416_p0 = scmp.ne.s32.totalorder %s8439_s29, %s6415_s21  ;;  %p6419_p1 = scmp.lt.u32.totalorder %s6415_s21, %s8439_s29 }
 0x2e9   :  { %p6421_p2 = pnand %p6419_p1, %p6416_p0 }
 0x2eb   :  { %6424 = shalt.err (!%p6421_p2)
}
 0x2ec   :  { %s6425_s3 = scalar_lea.vmem %s321_s20, 16  ;;  %s6429_s2 = scalar_lea.vmem %s321_s20, 32 }
 0x2ed   :  { %p6426_p3 = scmp.ne.s32.totalorder %s321_s20, %s6425_s3  ;;  %p6430_p4 = scmp.lt.s32.totalorder %s321_s20, %s321_s20 }
 0x2ee   :  { %p6431_p5 = scmp.lt.s32.totalorder %s6429_s2, %s6425_s3 }
 0x2f0   :  { %p6432_p6 = por %p6431_p5, %p6430_p4 }
 0x2f2   :  { %p6433_p7 = pnand %p6432_p6, %p6426_p3 }
 0x2f4   :  { %6436 = shalt.err (!%p6433_p7)
}
 0x2f5   :  { %s8440_s4 = sld [smem:[#allocation118_spill]] }
 0x2f6   :  { %323 = dma.hbm_to_vmem [thread:$0]  %s8439_s29, 16, %s321_s20, [#allocation14]  }
 0x2fb   :  { %s6437_s0 = scalar_lea.hbm %s8440_s4, 16 }
 0x2fc   :  { %p6438_p8 = scmp.ne.s32.totalorder %s8440_s4, %s6437_s0  ;;  %p6441_p9 = scmp.lt.u32.totalorder %s6437_s0, %s8440_s4 }
 0x2fe   :  { %p6443_p10 = pnand %p6441_p9, %p6438_p8 }
 0x300   :  { %6446 = shalt.err (!%p6443_p10)
}
 0x301   :  { %s6447_s7 = scalar_lea.vmem %s343_s1, 16  ;;  %s6451_s10 = scalar_lea.vmem %s343_s1, 32 }
 0x302   :  { %p6448_p11 = scmp.ne.s32.totalorder %s343_s1, %s6447_s7  ;;  %p6452_p12 = scmp.lt.s32.totalorder %s343_s1, %s343_s1 }
 0x303   :  { %p6453_p13 = scmp.lt.s32.totalorder %s6451_s10, %s6447_s7 }
 0x305   :  { %p6454_p0 = por %p6453_p13, %p6452_p12 }
 0x307   :  { %p6455_p1 = pnand %p6454_p0, %p6448_p11 }
 0x309   :  { %6458 = shalt.err (!%p6455_p1)
}
 0x30a   :  { %s8441_s19 = sld [smem:[#allocation121_spill]]  ;;  %s7074_s14 = smov [#allocation21]  }
 0x30b   :  { %345 = dma.hbm_to_vmem [thread:$0]  %s8440_s4, 16, %s343_s1, [#allocation17]  }
 0x30c   :  { %s366_s11 = sshll.u32 %s7074_s14, 4  ;;  %s7075_s17 = smov [#allocation24]   ;;  %s367_s11 = int_to_ptr.vmem [resolvable:$true] %s366_s11 }
 0x30d   :  { %s390_s13 = sshll.u32 %s7075_s17, 4  ;;  %s391_s13 = int_to_ptr.vmem [resolvable:$true] %s390_s13 }
 0x310   :  { %s6459_s15 = scalar_lea.hbm %s8441_s19, 16 }
 0x311   :  { %p6460_p2 = scmp.ne.s32.totalorder %s8441_s19, %s6459_s15  ;;  %p6463_p3 = scmp.lt.u32.totalorder %s6459_s15, %s8441_s19 }
 0x313   :  { %p6465_p4 = pnand %p6463_p3, %p6460_p2 }
 0x315   :  { %6468 = shalt.err (!%p6465_p4)
}
 0x316   :  { %s6469_s16 = scalar_lea.vmem %s367_s11, 16  ;;  %s6473_s6 = scalar_lea.vmem %s367_s11, 32 }
 0x317   :  { %p6470_p5 = scmp.ne.s32.totalorder %s367_s11, %s6469_s16  ;;  %p6474_p6 = scmp.lt.s32.totalorder %s367_s11, %s367_s11 }
 0x318   :  { %p6475_p7 = scmp.lt.s32.totalorder %s6473_s6, %s6469_s16 }
 0x31a   :  { %p6476_p8 = por %p6475_p7, %p6474_p6 }
 0x31c   :  { %p6477_p9 = pnand %p6476_p8, %p6470_p5 }
 0x31e   :  { %6480 = shalt.err (!%p6477_p9)
}
 0x31f   :  { %s8442_s30 = sld [smem:[#allocation124_spill]] }
 0x320   :  { %369 = dma.hbm_to_vmem [thread:$0]  %s8441_s19, 16, %s367_s11, [#allocation20]  }
 0x325   :  { %s6481_s18 = scalar_lea.hbm %s8442_s30, 16 }
 0x326   :  { %p6482_p10 = scmp.ne.s32.totalorder %s8442_s30, %s6481_s18  ;;  %p6485_p11 = scmp.lt.u32.totalorder %s6481_s18, %s8442_s30 }
 0x328   :  { %p6487_p12 = pnand %p6485_p11, %p6482_p10 }
 0x32a   :  { %6490 = shalt.err (!%p6487_p12)
}
 0x32b   :  { %s6491_s12 = scalar_lea.vmem %s391_s13, 16  ;;  %s6495_s22 = scalar_lea.vmem %s391_s13, 32 }
 0x32c   :  { %p6492_p13 = scmp.ne.s32.totalorder %s391_s13, %s6491_s12  ;;  %p6496_p0 = scmp.lt.s32.totalorder %s391_s13, %s391_s13 }
 0x32d   :  { %p6497_p1 = scmp.lt.s32.totalorder %s6495_s22, %s6491_s12 }
 0x32f   :  { %p6498_p2 = por %p6497_p1, %p6496_p0 }
 0x331   :  { %p6499_p3 = pnand %p6498_p2, %p6492_p13 }
 0x333   :  { %6502 = shalt.err (!%p6499_p3)
}
 0x334   :  { %s8443_s23 = sld [smem:[#allocation127_spill]]  ;;  %s7076_s26 = smov [#allocation27]  }
 0x335   :  { %393 = dma.hbm_to_vmem [thread:$0]  %s8442_s30, 16, %s391_s13, [#allocation23]  }
 0x336   :  { %s414_s28 = sshll.u32 %s7076_s26, 4  ;;  %s7077_s29 = smov [#allocation30]   ;;  %s415_s28 = int_to_ptr.vmem [resolvable:$true] %s414_s28 }
 0x337   :  { %s434_s9 = sshll.u32 %s7077_s29, 4  ;;  %s435_s9 = int_to_ptr.vmem [resolvable:$true] %s434_s9 }
 0x33a   :  { %s6503_s20 = scalar_lea.hbm %s8443_s23, 16 }
 0x33b   :  { %p6504_p4 = scmp.ne.s32.totalorder %s8443_s23, %s6503_s20  ;;  %p6507_p5 = scmp.lt.u32.totalorder %s6503_s20, %s8443_s23 }
 0x33d   :  { %p6509_p6 = pnand %p6507_p5, %p6504_p4 }
 0x33f   :  { %6512 = shalt.err (!%p6509_p6)
}
 0x340   :  { %s6513_s25 = scalar_lea.vmem %s415_s28, 16  ;;  %s6517_s1 = scalar_lea.vmem %s415_s28, 32 }
 0x341   :  { %p6514_p7 = scmp.ne.s32.totalorder %s415_s28, %s6513_s25  ;;  %p6518_p8 = scmp.lt.s32.totalorder %s415_s28, %s415_s28 }
 0x342   :  { %p6519_p9 = scmp.lt.s32.totalorder %s6517_s1, %s6513_s25 }
 0x344   :  { %p6520_p10 = por %p6519_p9, %p6518_p8 }
 0x346   :  { %p6521_p11 = pnand %p6520_p10, %p6514_p7 }
 0x348   :  { %6524 = shalt.err (!%p6521_p11)
}
 0x349   :  { %s8444_s21 = sld [smem:[#allocation128_spill]] }
 0x34a   :  { %417 = dma.hbm_to_vmem [thread:$0]  %s8443_s23, 16, %s415_s28, [#allocation26]  }
 0x34f   :  { %s6525_s3 = scalar_lea.hbm %s8444_s21, 16 }
 0x350   :  { %p6526_p12 = scmp.ne.s32.totalorder %s8444_s21, %s6525_s3  ;;  %p6529_p13 = scmp.lt.u32.totalorder %s6525_s3, %s8444_s21 }
 0x352   :  { %p6531_p0 = pnand %p6529_p13, %p6526_p12 }
 0x354   :  { %6534 = shalt.err (!%p6531_p0)
}
 0x355   :  { %s6535_s2 = scalar_lea.vmem %s435_s9, 16  ;;  %s6539_s4 = scalar_lea.vmem %s435_s9, 32 }
 0x356   :  { %p6536_p1 = scmp.ne.s32.totalorder %s435_s9, %s6535_s2  ;;  %p6540_p2 = scmp.lt.s32.totalorder %s435_s9, %s435_s9 }
 0x357   :  { %p6541_p3 = scmp.lt.s32.totalorder %s6539_s4, %s6535_s2 }
 0x359   :  { %p6542_p4 = por %p6541_p3, %p6540_p2 }
 0x35b   :  { %p6543_p5 = pnand %p6542_p4, %p6536_p1 }
 0x35d   :  { %6546 = shalt.err (!%p6543_p5)
}
 0x35e   :  { %s8445_s0 = sld [smem:[#allocation129_spill]]  ;;  %s7078_s7 = smov [#allocation33]  }
 0x35f   :  { %437 = dma.hbm_to_vmem [thread:$0]  %s8444_s21, 16, %s435_s9, [#allocation29]  }
 0x360   :  { %s454_s10 = sshll.u32 %s7078_s7, 4  ;;  %s7079_s19 = smov [#allocation36]   ;;  %s455_s10 = int_to_ptr.vmem [resolvable:$true] %s454_s10 }
 0x361   :  { %s478_s14 = sshll.u32 %s7079_s19, 4  ;;  %s479_s14 = int_to_ptr.vmem [resolvable:$true] %s478_s14 }
 0x364   :  { %s6547_s11 = scalar_lea.hbm %s8445_s0, 16 }
 0x365   :  { %p6548_p6 = scmp.ne.s32.totalorder %s8445_s0, %s6547_s11  ;;  %p6551_p7 = scmp.lt.u32.totalorder %s6547_s11, %s8445_s0 }
 0x367   :  { %p6553_p8 = pnand %p6551_p7, %p6548_p6 }
 0x369   :  { %6556 = shalt.err (!%p6553_p8)
}
 0x36a   :  { %s6557_s17 = scalar_lea.vmem %s455_s10, 16  ;;  %s6561_s13 = scalar_lea.vmem %s455_s10, 32 }
 0x36b   :  { %p6558_p9 = scmp.ne.s32.totalorder %s455_s10, %s6557_s17  ;;  %p6562_p10 = scmp.lt.s32.totalorder %s455_s10, %s455_s10 }
 0x36c   :  { %p6563_p11 = scmp.lt.s32.totalorder %s6561_s13, %s6557_s17 }
 0x36e   :  { %p6564_p12 = por %p6563_p11, %p6562_p10 }
 0x370   :  { %p6565_p13 = pnand %p6564_p12, %p6558_p9 }
 0x372   :  { %6568 = shalt.err (!%p6565_p13)
}
 0x373   :  { %s8446_s15 = sld [smem:[#allocation132_spill]] }
 0x374   :  { %457 = dma.hbm_to_vmem [thread:$0]  %s8445_s0, 16, %s455_s10, [#allocation32]  }
 0x379   :  { %s6569_s16 = scalar_lea.hbm %s8446_s15, 16 }
 0x37a   :  { %p6570_p0 = scmp.ne.s32.totalorder %s8446_s15, %s6569_s16  ;;  %p6573_p1 = scmp.lt.u32.totalorder %s6569_s16, %s8446_s15 }
 0x37c   :  { %p6575_p2 = pnand %p6573_p1, %p6570_p0 }
 0x37e   :  { %6578 = shalt.err (!%p6575_p2)
}
 0x37f   :  { %s6579_s6 = scalar_lea.vmem %s479_s14, 16  ;;  %s6583_s30 = scalar_lea.vmem %s479_s14, 32 }
 0x380   :  { %p6580_p3 = scmp.ne.s32.totalorder %s479_s14, %s6579_s6  ;;  %p6584_p4 = scmp.lt.s32.totalorder %s479_s14, %s479_s14 }
 0x381   :  { %p6585_p5 = scmp.lt.s32.totalorder %s6583_s30, %s6579_s6 }
 0x383   :  { %p6586_p6 = por %p6585_p5, %p6584_p4 }
 0x385   :  { %p6587_p7 = pnand %p6586_p6, %p6580_p3 }
 0x387   :  { %6590 = shalt.err (!%p6587_p7)
}
 0x388   :  { %s8447_s18 = sld [smem:[#allocation134_spill]]  ;;  %s7080_s12 = smov [#allocation39]  }
 0x389   :  { %481 = dma.hbm_to_vmem [thread:$0]  %s8446_s15, 16, %s479_s14, [#allocation35]  }
 0x38a   :  { %s499_s22 = sshll.u32 %s7080_s12, 4  ;;  %s500_s22 = int_to_ptr.vmem [resolvable:$true] %s499_s22 }
 0x38e   :  { %s6591_s23 = scalar_lea.hbm %s8447_s18, 128 }
 0x38f   :  { %p6592_p8 = scmp.ne.s32.totalorder %s8447_s18, %s6591_s23  ;;  %p6595_p9 = scmp.lt.u32.totalorder %s6591_s23, %s8447_s18 }
 0x391   :  { %p6597_p10 = pnand %p6595_p9, %p6592_p8 }
 0x393   :  { %6600 = shalt.err (!%p6597_p10)
}
 0x394   :  { %s6601_s26 = scalar_lea.vmem %s500_s22, 128  ;;  %p6606_p12 = scmp.lt.s32.totalorder %s500_s22, %s500_s22 }
 0x395   :  { %p6602_p11 = scmp.ne.s32.totalorder %s500_s22, %s6601_s26  ;;  %p6607_p13 = scmp.lt.s32.totalorder %s6601_s26, %s6601_s26 }
 0x397   :  { %p6608_p0 = por %p6607_p13, %p6606_p12 }
 0x399   :  { %p6609_p1 = pnand %p6608_p0, %p6602_p11 }
 0x39b   :  { %6612 = shalt.err (!%p6609_p1)
}
 0x39c   :  { %s7081_s28 = smov 64   ;;  %s8448_s29 = sld [smem:[#allocation136_spill]] }
 0x39d   :  { %s7082_s9 = smov 4   ;;  %s7083_s20 = smov [#allocation42]  }
 0x39e   :  { %505 = dma.hbm_to_vmem [thread:$0]  %s8447_s18, 128, %s500_s22, [#allocation38], %s7081_s28, %s7081_s28, %s7082_s9  }
 0x39f   :  { %s524_s25 = sshll.u32 %s7083_s20, 4  ;;  %s7084_s1 = smov [#allocation45]   ;;  %s525_s25 = int_to_ptr.vmem [resolvable:$true] %s524_s25 }
 0x3a0   :  { %s546_s21 = sshll.u32 %s7084_s1, 4  ;;  %s547_s21 = int_to_ptr.vmem [resolvable:$true] %s546_s21 }
 0x3a2   :  { %s6613_s3 = scalar_lea.hbm %s8448_s29, 16 }
 0x3a3   :  { %p6614_p2 = scmp.ne.s32.totalorder %s8448_s29, %s6613_s3  ;;  %p6617_p3 = scmp.lt.u32.totalorder %s6613_s3, %s8448_s29 }
 0x3a5   :  { %p6619_p4 = pnand %p6617_p3, %p6614_p2 }
 0x3a7   :  { %6622 = shalt.err (!%p6619_p4)
}
 0x3a8   :  { %s6623_s2 = scalar_lea.vmem %s525_s25, 16  ;;  %s6627_s4 = scalar_lea.vmem %s525_s25, 32 }
 0x3a9   :  { %p6624_p5 = scmp.ne.s32.totalorder %s525_s25, %s6623_s2  ;;  %p6628_p6 = scmp.lt.s32.totalorder %s525_s25, %s525_s25 }
 0x3aa   :  { %p6629_p7 = scmp.lt.s32.totalorder %s6627_s4, %s6623_s2 }
 0x3ac   :  { %p6630_p8 = por %p6629_p7, %p6628_p6 }
 0x3ae   :  { %p6631_p9 = pnand %p6630_p8, %p6624_p5 }
 0x3b0   :  { %6634 = shalt.err (!%p6631_p9)
}
 0x3b1   :  { %s8449_s0 = sld [smem:[#allocation138_spill]] }
 0x3b2   :  { %527 = dma.hbm_to_vmem [thread:$0]  %s8448_s29, 16, %s525_s25, [#allocation41]  }
 0x3b7   :  { %s6635_s7 = scalar_lea.hbm %s8449_s0, 16 }
 0x3b8   :  { %p6636_p10 = scmp.ne.s32.totalorder %s8449_s0, %s6635_s7  ;;  %p6639_p11 = scmp.lt.u32.totalorder %s6635_s7, %s8449_s0 }
 0x3ba   :  { %p6641_p12 = pnand %p6639_p11, %p6636_p10 }
 0x3bc   :  { %6644 = shalt.err (!%p6641_p12)
}
 0x3bd   :  { %s6645_s10 = scalar_lea.vmem %s547_s21, 16  ;;  %s6649_s19 = scalar_lea.vmem %s547_s21, 32 }
 0x3be   :  { %p6646_p13 = scmp.ne.s32.totalorder %s547_s21, %s6645_s10  ;;  %p6650_p0 = scmp.lt.s32.totalorder %s547_s21, %s547_s21 }
 0x3bf   :  { %p6651_p1 = scmp.lt.s32.totalorder %s6649_s19, %s6645_s10 }
 0x3c1   :  { %p6652_p2 = por %p6651_p1, %p6650_p0 }
 0x3c3   :  { %p6653_p3 = pnand %p6652_p2, %p6646_p13 }
 0x3c5   :  { %6656 = shalt.err (!%p6653_p3)
}
 0x3c6   :  { %s8450_s14 = sld [smem:[#allocation140_spill]]  ;;  %s7085_s11 = smov [#allocation48]  }
 0x3c7   :  { %549 = dma.hbm_to_vmem [thread:$0]  %s8449_s0, 16, %s547_s21, [#allocation44]  }
 0x3c8   :  { %s566_s17 = sshll.u32 %s7085_s11, 4  ;;  %s7086_s13 = smov [#allocation51]   ;;  %s567_s17 = int_to_ptr.vmem [resolvable:$true] %s566_s17 }
 0x3c9   :  { %s588_s15 = sshll.u32 %s7086_s13, 4  ;;  %s589_s15 = int_to_ptr.vmem [resolvable:$true] %s588_s15 }
 0x3cc   :  { %s6657_s16 = scalar_lea.hbm %s8450_s14, 16 }
 0x3cd   :  { %p6658_p4 = scmp.ne.s32.totalorder %s8450_s14, %s6657_s16  ;;  %p6661_p5 = scmp.lt.u32.totalorder %s6657_s16, %s8450_s14 }
 0x3cf   :  { %p6663_p6 = pnand %p6661_p5, %p6658_p4 }
 0x3d1   :  { %6666 = shalt.err (!%p6663_p6)
}
 0x3d2   :  { %s6667_s6 = scalar_lea.vmem %s567_s17, 16  ;;  %s6671_s30 = scalar_lea.vmem %s567_s17, 32 }
 0x3d3   :  { %p6668_p7 = scmp.ne.s32.totalorder %s567_s17, %s6667_s6  ;;  %p6672_p8 = scmp.lt.s32.totalorder %s567_s17, %s567_s17 }
 0x3d4   :  { %p6673_p9 = scmp.lt.s32.totalorder %s6671_s30, %s6667_s6 }
 0x3d6   :  { %p6674_p10 = por %p6673_p9, %p6672_p8 }
 0x3d8   :  { %p6675_p11 = pnand %p6674_p10, %p6668_p7 }
 0x3da   :  { %6678 = shalt.err (!%p6675_p11)
}
 0x3db   :  { %s8451_s18 = sld [smem:[#allocation143_spill]] }
 0x3dc   :  { %569 = dma.hbm_to_vmem [thread:$0]  %s8450_s14, 16, %s567_s17, [#allocation47]  }
 0x3e1   :  { %s6679_s12 = scalar_lea.hbm %s8451_s18, 16 }
 0x3e2   :  { %p6680_p12 = scmp.ne.s32.totalorder %s8451_s18, %s6679_s12  ;;  %p6683_p13 = scmp.lt.u32.totalorder %s6679_s12, %s8451_s18 }
 0x3e4   :  { %p6685_p0 = pnand %p6683_p13, %p6680_p12 }
 0x3e6   :  { %6688 = shalt.err (!%p6685_p0)
}
 0x3e7   :  { %s6689_s22 = scalar_lea.vmem %s589_s15, 16  ;;  %s6693_s23 = scalar_lea.vmem %s589_s15, 32 }
 0x3e8   :  { %p6690_p1 = scmp.ne.s32.totalorder %s589_s15, %s6689_s22  ;;  %p6694_p2 = scmp.lt.s32.totalorder %s589_s15, %s589_s15 }
 0x3e9   :  { %p6695_p3 = scmp.lt.s32.totalorder %s6693_s23, %s6689_s22 }
 0x3eb   :  { %p6696_p4 = por %p6695_p3, %p6694_p2 }
 0x3ed   :  { %p6697_p5 = pnand %p6696_p4, %p6690_p1 }
 0x3ef   :  { %6700 = shalt.err (!%p6697_p5)
}
 0x3f0   :  { %s8452_s26 = sld [smem:[#allocation147_spill]]  ;;  %s7087_s28 = smov [#allocation54]  }
 0x3f1   :  { %591 = dma.hbm_to_vmem [thread:$0]  %s8451_s18, 16, %s589_s15, [#allocation50]  }
 0x3f2   :  { %s612_s29 = sshll.u32 %s7087_s28, 4  ;;  %s7088_s9 = smov [#allocation57]   ;;  %s613_s29 = int_to_ptr.vmem [resolvable:$true] %s612_s29 }
 0x3f3   :  { %s632_s20 = sshll.u32 %s7088_s9, 4  ;;  %s633_s20 = int_to_ptr.vmem [resolvable:$true] %s632_s20 }
 0x3f6   :  { %s6701_s25 = scalar_lea.hbm %s8452_s26, 16 }
 0x3f7   :  { %p6702_p6 = scmp.ne.s32.totalorder %s8452_s26, %s6701_s25  ;;  %p6705_p7 = scmp.lt.u32.totalorder %s6701_s25, %s8452_s26 }
 0x3f9   :  { %p6707_p8 = pnand %p6705_p7, %p6702_p6 }
 0x3fb   :  { %6710 = shalt.err (!%p6707_p8)
}
 0x3fc   :  { %s6711_s1 = scalar_lea.vmem %s613_s29, 16  ;;  %s6715_s21 = scalar_lea.vmem %s613_s29, 32 }
 0x3fd   :  { %p6712_p9 = scmp.ne.s32.totalorder %s613_s29, %s6711_s1  ;;  %p6716_p10 = scmp.lt.s32.totalorder %s613_s29, %s613_s29 }
 0x3fe   :  { %p6717_p11 = scmp.lt.s32.totalorder %s6715_s21, %s6711_s1 }
 0x400   :  { %p6718_p12 = por %p6717_p11, %p6716_p10 }
 0x402   :  { %p6719_p13 = pnand %p6718_p12, %p6712_p9 }
 0x404   :  { %6722 = shalt.err (!%p6719_p13)
}
 0x405   :  { %s8453_s3 = sld [smem:[#allocation149_spill]] }
 0x406   :  { %615 = dma.hbm_to_vmem [thread:$0]  %s8452_s26, 16, %s613_s29, [#allocation53]  }
 0x40b   :  { %s6723_s2 = scalar_lea.hbm %s8453_s3, 16 }
 0x40c   :  { %p6724_p0 = scmp.ne.s32.totalorder %s8453_s3, %s6723_s2  ;;  %p6727_p1 = scmp.lt.u32.totalorder %s6723_s2, %s8453_s3 }
 0x40e   :  { %p6729_p2 = pnand %p6727_p1, %p6724_p0 }
 0x410   :  { %6732 = shalt.err (!%p6729_p2)
}
 0x411   :  { %s6733_s4 = scalar_lea.vmem %s633_s20, 16  ;;  %s6737_s0 = scalar_lea.vmem %s633_s20, 32 }
 0x412   :  { %p6734_p3 = scmp.ne.s32.totalorder %s633_s20, %s6733_s4  ;;  %p6738_p4 = scmp.lt.s32.totalorder %s633_s20, %s633_s20 }
 0x413   :  { %p6739_p5 = scmp.lt.s32.totalorder %s6737_s0, %s6733_s4 }
 0x415   :  { %p6740_p6 = por %p6739_p5, %p6738_p4 }
 0x417   :  { %p6741_p7 = pnand %p6740_p6, %p6734_p3 }
 0x419   :  { %6744 = shalt.err (!%p6741_p7)
}
 0x41a   :  { %s8454_s7 = sld [smem:[#allocation151_spill]]  ;;  %s7089_s10 = smov [#allocation60]  }
 0x41b   :  { %635 = dma.hbm_to_vmem [thread:$0]  %s8453_s3, 16, %s633_s20, [#allocation56]  }
 0x41c   :  { %s652_s19 = sshll.u32 %s7089_s10, 4  ;;  %s7090_s14 = smov [#allocation63]   ;;  %s653_s19 = int_to_ptr.vmem [resolvable:$true] %s652_s19 }
 0x41d   :  { %s676_s11 = sshll.u32 %s7090_s14, 4  ;;  %s677_s11 = int_to_ptr.vmem [resolvable:$true] %s676_s11 }
 0x420   :  { %s6745_s17 = scalar_lea.hbm %s8454_s7, 16 }
 0x421   :  { %p6746_p8 = scmp.ne.s32.totalorder %s8454_s7, %s6745_s17  ;;  %p6749_p9 = scmp.lt.u32.totalorder %s6745_s17, %s8454_s7 }
 0x423   :  { %p6751_p10 = pnand %p6749_p9, %p6746_p8 }
 0x425   :  { %6754 = shalt.err (!%p6751_p10)
}
 0x426   :  { %s6755_s13 = scalar_lea.vmem %s653_s19, 16  ;;  %s6759_s15 = scalar_lea.vmem %s653_s19, 32 }
 0x427   :  { %p6756_p11 = scmp.ne.s32.totalorder %s653_s19, %s6755_s13  ;;  %p6760_p12 = scmp.lt.s32.totalorder %s653_s19, %s653_s19 }
 0x428   :  { %p6761_p13 = scmp.lt.s32.totalorder %s6759_s15, %s6755_s13 }
 0x42a   :  { %p6762_p0 = por %p6761_p13, %p6760_p12 }
 0x42c   :  { %p6763_p1 = pnand %p6762_p0, %p6756_p11 }
 0x42e   :  { %6766 = shalt.err (!%p6763_p1)
}
 0x42f   :  { %s8455_s16 = sld [smem:[#allocation155_spill]] }
 0x430   :  { %655 = dma.hbm_to_vmem [thread:$0]  %s8454_s7, 16, %s653_s19, [#allocation59]  }
 0x435   :  { %s6767_s6 = scalar_lea.hbm %s8455_s16, 16 }
 0x436   :  { %p6768_p2 = scmp.ne.s32.totalorder %s8455_s16, %s6767_s6  ;;  %p6771_p3 = scmp.lt.u32.totalorder %s6767_s6, %s8455_s16 }
 0x438   :  { %p6773_p4 = pnand %p6771_p3, %p6768_p2 }
 0x43a   :  { %6776 = shalt.err (!%p6773_p4)
}
 0x43b   :  { %s6777_s30 = scalar_lea.vmem %s677_s11, 16  ;;  %s6781_s18 = scalar_lea.vmem %s677_s11, 32 }
 0x43c   :  { %p6778_p5 = scmp.ne.s32.totalorder %s677_s11, %s6777_s30  ;;  %p6782_p6 = scmp.lt.s32.totalorder %s677_s11, %s677_s11 }
 0x43d   :  { %p6783_p7 = scmp.lt.s32.totalorder %s6781_s18, %s6777_s30 }
 0x43f   :  { %p6784_p8 = por %p6783_p7, %p6782_p6 }
 0x441   :  { %p6785_p9 = pnand %p6784_p8, %p6778_p5 }
 0x443   :  { %6788 = shalt.err (!%p6785_p9)
}
 0x444   :  { %s8456_s12 = sld [smem:[#allocation159_spill]]  ;;  %s7091_s22 = smov [#allocation66]  }
 0x445   :  { %679 = dma.hbm_to_vmem [thread:$0]  %s8455_s16, 16, %s677_s11, [#allocation62]  }
 0x446   :  { %s700_s23 = sshll.u32 %s7091_s22, 4  ;;  %s7092_s26 = smov [#allocation69]   ;;  %s701_s23 = int_to_ptr.vmem [resolvable:$true] %s700_s23 }
 0x447   :  { %s720_s28 = sshll.u32 %s7092_s26, 4  ;;  %s721_s28 = int_to_ptr.vmem [resolvable:$true] %s720_s28 }
 0x44a   :  { %s6789_s29 = scalar_lea.hbm %s8456_s12, 16 }
 0x44b   :  { %p6790_p10 = scmp.ne.s32.totalorder %s8456_s12, %s6789_s29  ;;  %p6793_p11 = scmp.lt.u32.totalorder %s6789_s29, %s8456_s12 }
 0x44d   :  { %p6795_p12 = pnand %p6793_p11, %p6790_p10 }
 0x44f   :  { %6798 = shalt.err (!%p6795_p12)
}
 0x450   :  { %s6799_s9 = scalar_lea.vmem %s701_s23, 16  ;;  %s6803_s20 = scalar_lea.vmem %s701_s23, 32 }
 0x451   :  { %p6800_p13 = scmp.ne.s32.totalorder %s701_s23, %s6799_s9  ;;  %p6804_p0 = scmp.lt.s32.totalorder %s701_s23, %s701_s23 }
 0x452   :  { %p6805_p1 = scmp.lt.s32.totalorder %s6803_s20, %s6799_s9 }
 0x454   :  { %p6806_p2 = por %p6805_p1, %p6804_p0 }
 0x456   :  { %p6807_p3 = pnand %p6806_p2, %p6800_p13 }
 0x458   :  { %6810 = shalt.err (!%p6807_p3)
}
 0x459   :  { %s8457_s25 = sld [smem:[#allocation161_spill]] }
 0x45a   :  { %703 = dma.hbm_to_vmem [thread:$0]  %s8456_s12, 16, %s701_s23, [#allocation65]  }
 0x45f   :  { %s6811_s1 = scalar_lea.hbm %s8457_s25, 16 }
 0x460   :  { %p6812_p4 = scmp.ne.s32.totalorder %s8457_s25, %s6811_s1  ;;  %p6815_p5 = scmp.lt.u32.totalorder %s6811_s1, %s8457_s25 }
 0x462   :  { %p6817_p6 = pnand %p6815_p5, %p6812_p4 }
 0x464   :  { %6820 = shalt.err (!%p6817_p6)
}
 0x465   :  { %s6821_s21 = scalar_lea.vmem %s721_s28, 16  ;;  %s6825_s3 = scalar_lea.vmem %s721_s28, 32 }
 0x466   :  { %p6822_p7 = scmp.ne.s32.totalorder %s721_s28, %s6821_s21  ;;  %p6826_p8 = scmp.lt.s32.totalorder %s721_s28, %s721_s28 }
 0x467   :  { %p6827_p9 = scmp.lt.s32.totalorder %s6825_s3, %s6821_s21 }
 0x469   :  { %p6828_p10 = por %p6827_p9, %p6826_p8 }
 0x46b   :  { %p6829_p11 = pnand %p6828_p10, %p6822_p7 }
 0x46d   :  { %6832 = shalt.err (!%p6829_p11)
}
 0x46e   :  { %s8458_s2 = sld [smem:[#allocation163_spill]]  ;;  %s7093_s4 = smov [#allocation72]  }
 0x46f   :  { %723 = dma.hbm_to_vmem [thread:$0]  %s8457_s25, 16, %s721_s28, [#allocation68]  }
 0x470   :  { %s740_s0 = sshll.u32 %s7093_s4, 4  ;;  %s7094_s7 = smov [#allocation75]   ;;  %s741_s0 = int_to_ptr.vmem [resolvable:$true] %s740_s0 }
 0x471   :  { %s760_s10 = sshll.u32 %s7094_s7, 4  ;;  %s761_s10 = int_to_ptr.vmem [resolvable:$true] %s760_s10 }
 0x474   :  { %s6833_s19 = scalar_lea.hbm %s8458_s2, 16 }
 0x475   :  { %p6834_p12 = scmp.ne.s32.totalorder %s8458_s2, %s6833_s19  ;;  %p6837_p13 = scmp.lt.u32.totalorder %s6833_s19, %s8458_s2 }
 0x477   :  { %p6839_p0 = pnand %p6837_p13, %p6834_p12 }
 0x479   :  { %6842 = shalt.err (!%p6839_p0)
}
 0x47a   :  { %s6843_s14 = scalar_lea.vmem %s741_s0, 16  ;;  %s6847_s11 = scalar_lea.vmem %s741_s0, 32 }
 0x47b   :  { %p6844_p1 = scmp.ne.s32.totalorder %s741_s0, %s6843_s14  ;;  %p6848_p2 = scmp.lt.s32.totalorder %s741_s0, %s741_s0 }
 0x47c   :  { %p6849_p3 = scmp.lt.s32.totalorder %s6847_s11, %s6843_s14 }
 0x47e   :  { %p6850_p4 = por %p6849_p3, %p6848_p2 }
 0x480   :  { %p6851_p5 = pnand %p6850_p4, %p6844_p1 }
 0x482   :  { %6854 = shalt.err (!%p6851_p5)
}
 0x483   :  { %s8459_s17 = sld [smem:[#allocation165_spill]] }
 0x484   :  { %743 = dma.hbm_to_vmem [thread:$0]  %s8458_s2, 16, %s741_s0, [#allocation71]  }
 0x489   :  { %s6855_s13 = scalar_lea.hbm %s8459_s17, 16 }
 0x48a   :  { %p6856_p6 = scmp.ne.s32.totalorder %s8459_s17, %s6855_s13  ;;  %p6859_p7 = scmp.lt.u32.totalorder %s6855_s13, %s8459_s17 }
 0x48c   :  { %p6861_p8 = pnand %p6859_p7, %p6856_p6 }
 0x48e   :  { %6864 = shalt.err (!%p6861_p8)
}
 0x48f   :  { %s6865_s15 = scalar_lea.vmem %s761_s10, 16  ;;  %s6869_s16 = scalar_lea.vmem %s761_s10, 32 }
 0x490   :  { %p6866_p9 = scmp.ne.s32.totalorder %s761_s10, %s6865_s15  ;;  %p6870_p10 = scmp.lt.s32.totalorder %s761_s10, %s761_s10 }
 0x491   :  { %p6871_p11 = scmp.lt.s32.totalorder %s6869_s16, %s6865_s15 }
 0x493   :  { %p6872_p12 = por %p6871_p11, %p6870_p10 }
 0x495   :  { %p6873_p13 = pnand %p6872_p12, %p6866_p9 }
 0x497   :  { %6876 = shalt.err (!%p6873_p13)
}
 0x498   :  { %763 = dma.hbm_to_vmem [thread:$0]  %s8459_s17, 16, %s761_s10, [#allocation74]  }
 0x499   :  { %s7095_s6 = smov [#allocation76]   ;;  %s6877_s18 = scalar_lea.hbm %s7561_s5, 32 }
 0x49a   :  { %s800_s30 = sshll.u32 %s7095_s6, 4  ;;  %p6878_p0 = scmp.ne.s32.totalorder %s7561_s5, %s6877_s18  ;;  %s801_s30 = int_to_ptr.vmem [resolvable:$true] %s800_s30 }
 0x49b   :  { %p6881_p1 = scmp.lt.u32.totalorder %s6877_s18, %s7561_s5 }
 0x49d   :  { %p6883_p2 = pnand %p6881_p1, %p6878_p0 }
 0x49f   :  { %6886 = shalt.err (!%p6883_p2)
}
 0x4a0   :  { %s6887_s12 = scalar_lea.vmem %s801_s30, 32  ;;  %p6892_p4 = scmp.lt.s32.totalorder %s801_s30, %s801_s30 }
 0x4a1   :  { %p6888_p3 = scmp.ne.s32.totalorder %s801_s30, %s6887_s12  ;;  %p6893_p5 = scmp.lt.s32.totalorder %s6887_s12, %s6887_s12 }
 0x4a3   :  { %p6894_p6 = por %p6893_p5, %p6892_p4 }
 0x4a5   :  { %p6895_p7 = pnand %p6894_p6, %p6888_p3 }
 0x4a7   :  { %6898 = shalt.err (!%p6895_p7)
}
 0x4a8   :  { %803 = dma.hbm_to_vmem [thread:$0]  %s7561_s5, 32, %s801_s30, [#allocation77]  }
 0x4a9   :  { %6899 = dma.done.wait [#allocation3], 64  }
 0x4aa   :  { %6900 = vsyncadd [#allocation3], 4294967232 }
 0x4ab   :  { %6901 = dma.done.wait [#allocation5], 32  }
 0x4ac   :  { %6902 = vsyncadd [#allocation5], 4294967264 }
 0x4ad   :  { %6903 = dma.done.wait [#allocation8], 32  }
 0x4ae   :  { %6904 = vsyncadd [#allocation8], 4294967264 }
 0x4af   :  { %6905 = dma.done.wait [#allocation11], 32  }
 0x4b0   :  { %6906 = vsyncadd [#allocation11], 4294967264 }
 0x4b1   :  { %6907 = dma.done.wait [#allocation14], 32  }
 0x4b2   :  { %6908 = vsyncadd [#allocation14], 4294967264 }
 0x4b3   :  { %6909 = dma.done.wait [#allocation17], 32  }
 0x4b4   :  { %6910 = vsyncadd [#allocation17], 4294967264 }
 0x4b5   :  { %6911 = dma.done.wait [#allocation20], 32  }
 0x4b6   :  { %6912 = vsyncadd [#allocation20], 4294967264 }
 0x4b7   :  { %6913 = dma.done.wait [#allocation23], 32  }
 0x4b8   :  { %6914 = vsyncadd [#allocation23], 4294967264 }
 0x4b9   :  { %6915 = dma.done.wait [#allocation26], 32  }
 0x4ba   :  { %6916 = vsyncadd [#allocation26], 4294967264 }
 0x4bb   :  { %6917 = dma.done.wait [#allocation29], 32  }
 0x4bc   :  { %6918 = vsyncadd [#allocation29], 4294967264 }
 0x4bd   :  { %6919 = dma.done.wait [#allocation32], 32  }
 0x4be   :  { %6920 = vsyncadd [#allocation32], 4294967264 }
 0x4bf   :  { %6921 = dma.done.wait [#allocation35], 32  }
 0x4c0   :  { %6922 = vsyncadd [#allocation35], 4294967264 }
 0x4c1   :  { %6923 = dma.done.wait [#allocation38], 144  }
 0x4c2   :  { %6924 = vsyncadd [#allocation38], 4294967152 }
 0x4c3   :  { %6925 = dma.done.wait [#allocation41], 32  }
 0x4c4   :  { %6926 = vsyncadd [#allocation41], 4294967264 }
 0x4c5   :  { %6927 = dma.done.wait [#allocation44], 32  }
 0x4c6   :  { %6928 = vsyncadd [#allocation44], 4294967264 }
 0x4c7   :  { %6929 = dma.done.wait [#allocation47], 32  }
 0x4c8   :  { %6930 = vsyncadd [#allocation47], 4294967264 }
 0x4c9   :  { %6931 = dma.done.wait [#allocation50], 32  }
 0x4ca   :  { %6932 = vsyncadd [#allocation50], 4294967264 }
 0x4cb   :  { %6933 = dma.done.wait [#allocation53], 32  }
 0x4cc   :  { %6934 = vsyncadd [#allocation53], 4294967264 }
 0x4cd   :  { %6935 = dma.done.wait [#allocation56], 32  }
 0x4ce   :  { %6936 = vsyncadd [#allocation56], 4294967264 }
 0x4cf   :  { %6937 = dma.done.wait [#allocation59], 32  }
 0x4d0   :  { %6938 = vsyncadd [#allocation59], 4294967264 }
 0x4d1   :  { %6939 = dma.done.wait [#allocation62], 32  }
 0x4d2   :  { %6940 = vsyncadd [#allocation62], 4294967264 }
 0x4d3   :  { %6941 = dma.done.wait [#allocation65], 32  }
 0x4d4   :  { %6942 = vsyncadd [#allocation65], 4294967264 }
 0x4d5   :  { %6943 = dma.done.wait [#allocation68], 32  }
 0x4d6   :  { %6944 = vsyncadd [#allocation68], 4294967264 }
 0x4d7   :  { %6945 = dma.done.wait [#allocation71], 32  }
 0x4d8   :  { %6946 = vsyncadd [#allocation71], 4294967264 }
 0x4d9   :  { %6947 = dma.done.wait [#allocation74], 32  }
 0x4da   :  { %6948 = vsyncadd [#allocation74], 4294967264 }
 0x4db   :  { %6949 = dma.done.wait [#allocation77], 32  }
 0x4dc   :  { %6950 = vsyncadd [#allocation77], 4294967264  ;;  %s8460_s5 = sld [smem:[#allocation154_spill]]  ;;  %v7096_v0 = vmov 0.0   ;;  %vm7097_vm0 = vmmov 0   ;;  %vm977_vm1 = vcmask 1045504  }
 0x4dd   :  { %5021 = vmatprep.subr.bf16.mxu0 %v7096_v0  ;;  %5023 = vmatprep.mubr.msk.bf16.mxu0 %vm7097_vm0, %v7096_v0  ;;  %v957_v2 = vld [vmem:[#allocation76] sm:$0x3]  ;;  %vm973_vm2 = vcmask 97280   ;;  %s8461_s22 = sld [smem:[#allocation142_spill]]  ;;  %v4653_v5 = vld [vmem:[#allocation61] ss:$0 sm:$0xff] }
 0x4de   :  { %5027 = vmatprep.subr.bf16.mxu1 %v7096_v0  ;;  %5031 = vmatprep.mubr.msk.bf16.mxu1 %vm7097_vm0, %v7096_v0  ;;  %v960_v4 = vpack.c.bf16 %v957_v2, %v957_v2  ;;  %vm1021_vm3 = vcmask 254976   ;;  %v4656_v23 = vld [vmem:[#allocation45] ss:$0 sm:$0xff]  ;;  %v4657_v25 = vld [vmem:[#allocation43] ss:$0 sm:$0xff]  ;;  %vm1076_vm4 = vcmask 261120  }
 0x4df   :  { %s8462_s23 = sld [smem:[#allocation135_spill]]  ;;  %v4658_v29 = vld [vmem:[#allocation49] ss:$0 sm:$0xff]  ;;  %s8463_s26 = sld [smem:[#allocation137_spill]]  ;;  %v4662_v54 = vld [vmem:[#allocation48] ss:$0 sm:$0xff] }
 0x4e0   :  { %v4663_v56 = vld [vmem:[#allocation46] ss:$0 sm:$0xff]  ;;  %v4664_v62 = vld [vmem:[#allocation40] ss:$0 sm:$0xff]  ;;  %s8464_s28 = sld [smem:[#allocation152_spill]]  ;;  %s8466_s9 = sld [smem:[#allocation146_spill]] }
 0x4e1   :  { %s8465_s29 = sld [smem:[#allocation144_spill]]  ;;  %s8467_s20 = sld [smem:[#allocation105_spill]]  ;;  %vm1644_vm5 = vcmask 1040384   ;;  %vm1640_vm6 = vcmask 15360   ;;  %vm1750_vm7 = vcmask 259072   ;;  %vm1985_vm8 = vcmask 48128  }
 0x4e2   :  { %v5651_v1 = vld [vmem:[%s8460_s5] sm:$0x3f]   ;;  %s8468_s25 = sld [smem:[#allocation119_spill]]  ;;  %s8469_s1 = sld [smem:[#allocation114_spill]]  ;;  %vm1992_vm9 = vcmask 1042432   ;;  %vm2207_vm10 = vcmask 1043456  }
 0x4e3   :  { %v979_v3 = vsel %vm977_vm1, %v5651_v1, 0  ;;  %v5652_v17 = vld [vmem:[%s8461_s22] sm:$0xff]   ;;  %v5653_v18 = vld [vmem:[%s8461_s22 + $0x8] sm:$0xff]   ;;  %s8471_s21 = sld [smem:[#allocation108_spill]]  ;;  %s8472_s3 = sld [smem:[#allocation106_spill]]  ;;  %vm2203_vm11 = vcmask 195584  }
 0x4e4   :  { %5022 = vmatpush3.bf16.msra.mxu0 %v979_v3  ;;  %5028 = vmatpush3.bf16.msra.mxu1 %v5652_v17  ;;  %s8473_s2 = sld [smem:[#allocation107_spill]]  ;;  %s8474_s4 = sld [smem:[#allocation117_spill]]  ;;  %vm4328_vm12 = vcmask 517120   ;;  %vm4320_vm13 = vcmask 1041408   ;;  %vm4324_vm14 = vcmask 523264   ;;  %vm4528_vm15 = vcmask 91136  }
 0x4e5   :  { %5035 = vmatprep.subr.bf16.mxu0 %v7096_v0  ;;  %5029 = vmatprep.subr.bf16.mxu1 %v7096_v0  ;;  %v5654_v42 = vld [vmem:[%s8462_s23] sm:$0xff]   ;;  %v5655_v43 = vld [vmem:[%s8462_s23 + $0x8] sm:$0xff]   ;;  %v5658_v46 = vld [vmem:[%s8463_s26 + $0x10] sm:$0xff]   ;;  %s8475_s0 = sld [smem:[#allocation109_spill]]  ;;  %s8476_s7 = sld [smem:[#allocation111_spill]] }
 0x4e6   :  { %v5656_v44 = vld [vmem:[%s8463_s26] sm:$0xff]   ;;  %v5657_v45 = vld [vmem:[%s8463_s26 + $0x8] sm:$0xff]   ;;  %v5659_v47 = vld [vmem:[%s8463_s26 + $0x18] sm:$0xff]   ;;  %s8477_s10 = sld [smem:[#allocation112_spill]]  ;;  %s8478_s19 = sld [smem:[#allocation131_spill]] }
 0x4e7   :  { %5024 = vmatmul.mubr.msk.bf16.vlgmr.msra.gmra.mrb[0].mxu0 %vm973_vm2, %v960_v4  ;;  %v5660_v48 = vld [vmem:[%s8463_s26 + $0x20] sm:$0xff]   ;;  %v5661_v49 = vld [vmem:[%s8463_s26 + $0x28] sm:$0xff]   ;;  %v5662_v60 = vld [vmem:[%s8463_s26 + $0x30] sm:$0xff]   ;;  %s8479_s14 = sld [smem:[#allocation126_spill]]  ;;  %s8480_s11 = sld [smem:[#allocation133_spill]] }
 0x4e8   :  { %5039 = vmatprep.mubr.msk.bf16.mxu0 %vm7097_vm0, %v7096_v0  ;;  %5030 = vmatpush3.bf16.msra.mxu1 %v5653_v18  ;;  %v5663_v61 = vld [vmem:[%s8463_s26 + $0x38] sm:$0xff]   ;;  %s8481_s17 = sld [smem:[#allocation130_spill]]  ;;  %s8483_s15 = sld [smem:[#allocation123_spill]] }
 0x4e9   :  { %5043 = vmatprep.subr.bf16.mxu1 %v7096_v0  ;;  %5036 = vmatpush3.bf16.msra.mxu0 %v5654_v42  ;;  %s8482_s13 = sld [smem:[#allocation122_spill]]  ;;  %s8484_s16 = sld [smem:[#allocation125_spill]] }
 0x4ea   :  { %5037 = vmatprep.subr.bf16.mxu0 %v7096_v0  ;;  %s8485_s6 = sld [smem:[#allocation166_spill]]  ;;  %s8486_s30 = sld [smem:[#allocation168_spill]] }
 0x4eb   :  { %s8487_s18 = sld [smem:[#allocation171_spill]]  ;;  %s8488_s12 = sld [smem:[#allocation173_spill]] }
 0x4ec   :  { %s8489_s5 = sld [smem:[#allocation176_spill]]  ;;  %s8490_s22 = sld [smem:[#allocation178_spill]] }
 0x4ed   :  { %5038 = vmatpush3.bf16.msra.mxu0 %v5655_v43  ;;  %s8491_s23 = sld [smem:[#allocation167_spill]]  ;;  %s8492_s26 = sld [smem:[#allocation170_spill]] }
 0x4ee   :  { %5063 = vmatprep.subr.bf16.mxu0 %v7096_v0 }
 0x5ba   :  { %v1015_v6 = vpop.f32.mrb[0].mxu0 }
 0x5bb   :  { %v1016_v7 = vadd.f32 %v4653_v5, %v1015_v6  ;;  %v5025_v8 = vpop.f32.mrb[1].mxu0 }
 0x5bc   :  { %v1018_v9 = vpop.f32.mrb[2].mxu0 }
 0x5bd   :  { %v5026_v10 = vpop.f32.mrb[3].mxu0  ;;  %v1022_v11 = vsel %vm1021_vm3, %v1016_v7, 0.0 }
 0x5be   :  { %1023 = vadd.xlane.f32.xlu0 %v1022_v11 }
 0x64b   :  { %v1024_v12 = vpop.xlane.xlu0 %1023 }
 0x64c   :  { %v1026_v13 = vmul.f32 0.03125, %v1024_v12 }
 0x64e   :  { %v1027_v14 = vsub.f32 %v1016_v7, %v1026_v13 }
 0x650   :  { %v1028_v15 = vmul.f32 %v1027_v14, %v1027_v14 }
 0x652   :  { %v1029_v16 = vsel %vm1021_vm3, %v1028_v15, 0.0 }
 0x653   :  { %1030 = vadd.xlane.f32.xlu0 %v1029_v16 }
 0x6e0   :  { %v1031_v19 = vpop.xlane.xlu0 %1030 }
 0x6e1   :  { %v1032_v20 = vmul.f32 0.03125, %v1031_v19 }
 0x6e3   :  { %v1033_v21 = vadd.f32 1e-05, %v1032_v20  ;;  %v5664_v20 = vld [vmem:[%s8464_s28] sm:$0xff]  }
 0x6e5   :  { %5755 = vrsqrt.f32 %v1033_v21  ;;  %v5665_v21 = vld [vmem:[%s8464_s28 + $0x8] sm:$0xff]   ;;  %s8493_s28 = sld [smem:[#allocation172_spill]] }
 0x6ef   :  { %v5756_v22 = vpop.eup %5755 }
 0x6f0   :  { %v1035_v24 = vmul.f32 %v5756_v22, %v1027_v14 }
 0x6f2   :  { %v1043_v26 = vmul.f32 %v4656_v23, %v1035_v24 }
 0x6f4   :  { %v1051_v27 = vadd.f32 %v4657_v25, %v1043_v26  ;;  %v4677_v26 = vld [vmem:[#allocation55] ss:$0 sm:$0xff] }
 0x6f6   :  { %v1056_v28 = vpack.c.bf16 %v1051_v27, %v1051_v27 }
 0x6f8   :  { %5032 = vmatmul.mubr.msk.bf16.vlgmr.msra.gmra.mrb[0].mxu1 %vm1076_vm4, %v1056_v28  ;;  %v4678_v28 = vld [vmem:[#allocation54] ss:$0 sm:$0xff] }
 0x6f9   :  { %5059 = vmatprep.mubr.msk.bf16.mxu1 %vm7097_vm0, %v7096_v0  ;;  %5044 = vmatpush3.bf16.msra.mxu1 %v5656_v44 }
 0x6fa   :  { %5045 = vmatprep.subr.bf16.mxu1 %v7096_v0 }
 0x6fd   :  { %5046 = vmatpush3.bf16.msra.mxu1 %v5657_v45  ;;  %v5666_v45 = vld [vmem:[%s8465_s29] sm:$0xff]  }
 0x6fe   :  { %5047 = vmatprep.subr.bf16.mxu1 %v7096_v0 }
 0x701   :  { %5048 = vmatpush3.bf16.msra.mxu1 %v5658_v46  ;;  %v5667_v46 = vld [vmem:[%s8465_s29 + $0x8] sm:$0xff]   ;;  %s8494_s29 = sld [smem:[#allocation175_spill]] }
 0x702   :  { %5049 = vmatprep.subr.bf16.mxu1 %v7096_v0 }
 0x705   :  { %5050 = vmatpush3.bf16.msra.mxu1 %v5659_v47 }
 0x706   :  { %5051 = vmatprep.subr.bf16.mxu1 %v7096_v0 }
 0x709   :  { %5052 = vmatpush3.bf16.msra.mxu1 %v5660_v48 }
 0x70a   :  { %5053 = vmatprep.subr.bf16.mxu1 %v7096_v0 }
 0x70d   :  { %5054 = vmatpush3.bf16.msra.mxu1 %v5661_v49 }
 0x70e   :  { %5055 = vmatprep.subr.bf16.mxu1 %v7096_v0 }
 0x711   :  { %5056 = vmatpush3.bf16.msra.mxu1 %v5662_v60  ;;  %v5671_v60 = vld [vmem:[%s8466_s9 + $0x18] sm:$0xff]  }
 0x712   :  { %5057 = vmatprep.subr.bf16.mxu1 %v7096_v0 }
 0x715   :  { %5058 = vmatpush3.bf16.msra.mxu1 %v5663_v61  ;;  %v5672_v61 = vld [vmem:[%s8466_s9 + $0x20] sm:$0xff]  }
 0x716   :  { %5099 = vmatprep.subr.bf16.mxu1 %v7096_v0 }
 0x7cb   :  { %v1114_v30 = vpop.f32.mrb[0].mxu1 }
 0x7cc   :  { %v1115_v31 = vadd.f32 %v4658_v29, %v1114_v30  ;;  %v5033_v32 = vpop.f32.mrb[1].mxu1 }
 0x7cd   :  { %v1117_v33 = vpop.f32.mrb[2].mxu1  ;;  %v4679_v32 = vld [vmem:[#allocation60] ss:$0 sm:$0xff] }
 0x7ce   :  { %v7794_v34 = vadd.f32 %v1115_v31, %v1016_v7  ;;  %v5034_v35 = vpop.f32.mrb[3].mxu1  ;;  %v4668_v7 = vld [vmem:[#allocation42] ss:$0 sm:$0xff] }
 0x7d0   :  { %v1121_v36 = vsel %vm1021_vm3, %v7794_v34, 0.0 }
 0x7d1   :  { %1122 = vadd.xlane.f32.xlu1 %v1121_v36 }
 0x85e   :  { %v1123_v37 = vpop.xlane.xlu1 %1122 }
 0x85f   :  { %v1124_v38 = vmul.f32 0.03125, %v1123_v37 }
 0x861   :  { %v1125_v39 = vsub.f32 %v7794_v34, %v1124_v38 }
 0x863   :  { %v1126_v40 = vmul.f32 %v1125_v39, %v1125_v39 }
 0x865   :  { %v1127_v41 = vsel %vm1021_vm3, %v1126_v40, 0.0 }
 0x866   :  { %1128 = vadd.xlane.f32.xlu1 %v1127_v41 }
 0x8f3   :  { %v1129_v50 = vpop.xlane.xlu1 %1128 }
 0x8f4   :  { %v1130_v51 = vmul.f32 0.03125, %v1129_v50 }
 0x8f6   :  { %v1131_v52 = vadd.f32 1e-05, %v1130_v51  ;;  %v4683_v51 = vld [vmem:[#allocation58] ss:$0 sm:$0xff] }
 0x8f8   :  { %5757 = vrsqrt.f32 %v1131_v52 }
 0x902   :  { %v5758_v53 = vpop.eup %5757 }
 0x903   :  { %v1133_v55 = vmul.f32 %v5758_v53, %v1125_v39  ;;  %v4684_v53 = vld [vmem:[#allocation57] ss:$0 sm:$0xff] }
 0x905   :  { %v1141_v57 = vmul.f32 %v4662_v54, %v1133_v55 }
 0x907   :  { %v1149_v58 = vadd.f32 %v4663_v56, %v1141_v57  ;;  %v5668_v56 = vld [vmem:[%s8466_s9] sm:$0xff]  }
 0x909   :  { %v1154_v59 = vpack.c.bf16 %v1149_v58, %v1149_v58  ;;  %v5669_v58 = vld [vmem:[%s8466_s9 + $0x8] sm:$0xff]  }
 0x90b   :  { %5040 = vmatmul.mubr.msk.bf16.vlgmr.msra.gmra.mrb[4].mxu0 %vm1076_vm4, %v1154_v59  ;;  %v5670_v59 = vld [vmem:[%s8466_s9 + $0x10] sm:$0xff]  }
 0x90c   :  { %5067 = vmatprep.mubr.msk.bf16.mxu0 %vm7097_vm0, %v7096_v0  ;;  %5064 = vmatpush3.bf16.msra.mxu0 %v5664_v20  ;;  %v1638_v20 = vld [vmem:[%s8467_s20] sm:$0x7]  ;;  %s8496_s20 = sld [smem:[#allocation169_spill]] }
 0x90d   :  { %5065 = vmatprep.subr.bf16.mxu0 %v7096_v0 }
 0x910   :  { %5066 = vmatpush3.bf16.msra.mxu0 %v5665_v21 }
 0x911   :  { %5071 = vmatprep.subr.bf16.mxu0 %v7096_v0 }
 0x9de   :  { %v1211_v63 = vpop.f32.mrb[4].mxu0 }
 0x9df   :  { %v1212_v1 = vadd.f32 %v4664_v62, %v1211_v63  ;;  %v5041_v2 = vpop.f32.mrb[5].mxu0  ;;  %v5673_v62 = vld [vmem:[%s8466_s9 + $0x28] sm:$0xff]   ;;  %v5674_v63 = vld [vmem:[%s8466_s9 + $0x30] sm:$0xff]  }
 0x9e0   :  { %v1214_v3 = vpop.f32.mrb[6].mxu0  ;;  %v4685_v2 = vld [vmem:[#allocation51] ss:$0 sm:$0xff] }
 0x9e1   :  { %v1217_v4 = vmax.f32 %v1212_v1, 0.0  ;;  %v5042_v5 = vpop.f32.mrb[7].mxu0  ;;  %v5675_v1 = vld [vmem:[%s8466_s9 + $0x38] sm:$0xff]   ;;  %s8495_s9 = sld [smem:[#allocation177_spill]] }
 0x9e3   :  { %v1234_v6 = vpack.c.bf16 %v1217_v4, %v1217_v4 }
 0x9e5   :  { %5060 = vmatmul.mubr.bf16.vlgmr.msra.gmra.mrb[4].mxu1 %v1234_v6 }
 0x9e6   :  { %5101 = vmatprep.mubr.msk.bf16.mxu1 %vm7097_vm0, %v7096_v0 }
 0xab8   :  { %v1324_v8 = vpop.f32.mrb[4].mxu1 }
 0xab9   :  { %v1325_v9 = vadd.f32 %v4668_v7, %v1324_v8  ;;  %v5061_v10 = vpop.f32.mrb[5].mxu1 }
 0xaba   :  { %v1327_v11 = vpop.f32.mrb[6].mxu1  ;;  %v4689_v10 = vld [vmem:[#allocation52] ss:$0 sm:$0xff] }
 0xabb   :  { %v1330_v12 = vadd.f32 %v1325_v9, %v7794_v34  ;;  %v5062_v13 = vpop.f32.mrb[7].mxu1 }
 0xabd   :  { %v1331_v14 = vsel %vm1021_vm3, %v1330_v12, 0.0 }
 0xabe   :  { %1332 = vadd.xlane.f32.xlu0 %v1331_v14 }
 0xb4b   :  { %v1333_v15 = vpop.xlane.xlu0 %1332 }
 0xb4c   :  { %v1334_v16 = vmul.f32 0.03125, %v1333_v15 }
 0xb4e   :  { %v1335_v17 = vsub.f32 %v1330_v12, %v1334_v16 }
 0xb50   :  { %v1336_v18 = vmul.f32 %v1335_v17, %v1335_v17 }
 0xb52   :  { %v1337_v19 = vsel %vm1021_vm3, %v1336_v18, 0.0  ;;  %v5676_v18 = vld [vmem:[#allocation39] sm:$0x3f]  }
 0xb53   :  { %1338 = vadd.xlane.f32.xlu1 %v1337_v19  ;;  %v1708_v21 = vsel %vm977_vm1, %v5676_v18, 0 }
 0xbe0   :  { %v1339_v22 = vpop.xlane.xlu1 %1338 }
 0xbe1   :  { %v1340_v23 = vmul.f32 0.03125, %v1339_v22  ;;  %v1688_v22 = vld [vmem:[%s7566_s8] sm:$0x3f]  ;;  %s8470_s8 = sld [smem:[#allocation120_spill]] }
 0xbe3   :  { %v1341_v24 = vadd.f32 1e-05, %v1340_v23  ;;  %v1691_v23 = vpack.c.bf16 %v1688_v22, %v1688_v22  ;;  %v7922_v22 = vld [vmem:[%s8472_s3] sm:$0xff] }
 0xbe5   :  { %5759 = vrsqrt.f32 %v1341_v24 }
 0xbef   :  { %v5760_v25 = vpop.eup %5759 }
 0xbf0   :  { %v1343_v27 = vmul.f32 %v5760_v25, %v1335_v17 }
 0xbf2   :  { %v1351_v29 = vmul.f32 %v4677_v26, %v1343_v27 }
 0xbf4   :  { %v1359_v30 = vadd.f32 %v4678_v28, %v1351_v29  ;;  %v4699_v28 = vld [vmem:[#allocation37] ss:$0 sm:$0xff] }
 0xbf6   :  { %v1364_v31 = vpack.c.bf16 %v1359_v30, %v1359_v30 }
 0xbf8   :  { %5068 = vmatmul.mubr.msk.bf16.vlgmr.msra.gmra.mrb[8].mxu0 %vm1076_vm4, %v1364_v31 }
 0xbf9   :  { %5075 = vmatprep.mubr.msk.bf16.mxu0 %vm7097_vm0, %v7096_v0  ;;  %5072 = vmatpush3.bf16.msra.mxu0 %v5666_v45 }
 0xbfa   :  { %5073 = vmatprep.subr.bf16.mxu0 %v7096_v0 }
 0xbfd   :  { %5074 = vmatpush3.bf16.msra.mxu0 %v5667_v46 }
 0xbfe   :  { %5079 = vmatprep.subr.bf16.mxu0 %v7096_v0 }
 0xccb   :  { %v1421_v33 = vpop.f32.mrb[8].mxu0 }
 0xccc   :  { %v1422_v34 = vadd.f32 %v4679_v32, %v1421_v33  ;;  %v5069_v35 = vpop.f32.mrb[9].mxu0 }
 0xccd   :  { %v1424_v36 = vpop.f32.mrb[10].mxu0 }
 0xcce   :  { %v7835_v37 = vadd.f32 %v1422_v34, %v1330_v12  ;;  %v5070_v38 = vpop.f32.mrb[11].mxu0 }
 0xcd0   :  { %v1428_v39 = vsel %vm1021_vm3, %v7835_v37, 0.0 }
 0xcd1   :  { %1429 = vadd.xlane.f32.xlu0 %v1428_v39 }
 0xd5e   :  { %v1430_v40 = vpop.xlane.xlu0 %1429 }
 0xd5f   :  { %v1431_v41 = vmul.f32 0.03125, %v1430_v40  ;;  %v5677_v40 = vld [vmem:[%s8468_s25] sm:$0xff]  }
 0xd61   :  { %v1432_v42 = vsub.f32 %v7835_v37, %v1431_v41  ;;  %v5678_v41 = vld [vmem:[%s8469_s1] sm:$0xff]  }
 0xd63   :  { %v1433_v43 = vmul.f32 %v1432_v42, %v1432_v42 }
 0xd65   :  { %v1434_v44 = vsel %vm1021_vm3, %v1433_v43, 0.0  ;;  %v5680_v43 = vld [vmem:[%s8469_s1 + $0x8] sm:$0xff]   ;;  %s8499_s1 = sld [smem:[#allocation156_spill]] }
 0xd66   :  { %1435 = vadd.xlane.f32.xlu1 %v1434_v44 }
 0xdf3   :  { %v1436_v47 = vpop.xlane.xlu1 %1435 }
 0xdf4   :  { %v1437_v48 = vmul.f32 0.03125, %v1436_v47 }
 0xdf6   :  { %v1438_v49 = vadd.f32 1e-05, %v1437_v48  ;;  %v4702_v48 = vld [vmem:[#allocation12] ss:$0 sm:$0xff] }
 0xdf8   :  { %5761 = vrsqrt.f32 %v1438_v49 }
 0xe02   :  { %v5762_v50 = vpop.eup %5761 }
 0xe03   :  { %v1440_v52 = vmul.f32 %v5762_v50, %v1432_v42  ;;  %v5679_v42 = vld [vmem:[%s8468_s25 + $0x8] sm:$0xff]   ;;  %s8497_s25 = sld [smem:[#allocation174_spill]] }
 0xe04   :  { %v4703_v50 = vld [vmem:[#allocation10] ss:$0 sm:$0xff] }
 0xe05   :  { %v1448_v54 = vmul.f32 %v4683_v51, %v1440_v52 }
 0xe07   :  { %v1456_v55 = vadd.f32 %v4684_v53, %v1448_v54  ;;  %v5681_v53 = vld [vmem:[%s8470_s8] sm:$0xff]  }
 0xe09   :  { %v1461_v57 = vpack.c.bf16 %v1456_v55, %v1456_v55  ;;  %v5682_v55 = vld [vmem:[%s8470_s8 + $0x8] sm:$0xff]   ;;  %s8500_s8 = sld [smem:[#allocation158_spill]] }
 0xe0b   :  { %5076 = vmatmul.mubr.msk.bf16.vlgmr.msra.gmra.mrb[12].mxu0 %vm1076_vm4, %v1461_v57  ;;  %v4704_v57 = vld [vmem:[#allocation18] ss:$0 sm:$0xff] }
 0xe0c   :  { %5080 = vmatpush3.bf16.msra.mxu0 %v5668_v56  ;;  %5095 = vmatprep.mubr.msk.bf16.mxu0 %vm7097_vm0, %v7096_v0  ;;  %v7901_v56 = vld [vmem:[%s8471_s21] sm:$0xff]  }
 0xe0d   :  { %5081 = vmatprep.subr.bf16.mxu0 %v7096_v0 }
 0xe10   :  { %5082 = vmatpush3.bf16.msra.mxu0 %v5669_v58  ;;  %v4708_v58 = vld [vmem:[#allocation9] ss:$0 sm:$0xff] }
 0xe11   :  { %5083 = vmatprep.subr.bf16.mxu0 %v7096_v0 }
 0xe14   :  { %5084 = vmatpush3.bf16.msra.mxu0 %v5670_v59 }
 0xe15   :  { %5085 = vmatprep.subr.bf16.mxu0 %v7096_v0 }
 0xe18   :  { %5086 = vmatpush3.bf16.msra.mxu0 %v5671_v60 }
 0xe19   :  { %5087 = vmatprep.subr.bf16.mxu0 %v7096_v0 }
 0xe1c   :  { %5088 = vmatpush3.bf16.msra.mxu0 %v5672_v61 }
 0xe1d   :  { %5089 = vmatprep.subr.bf16.mxu0 %v7096_v0 }
 0xe20   :  { %5090 = vmatpush3.bf16.msra.mxu0 %v5673_v62 }
 0xe21   :  { %5091 = vmatprep.subr.bf16.mxu0 %v7096_v0 }
 0xe24   :  { %5092 = vmatpush3.bf16.msra.mxu0 %v5674_v63 }
 0xe25   :  { %5093 = vmatprep.subr.bf16.mxu0 %v7096_v0 }
 0xe28   :  { %5094 = vmatpush3.bf16.msra.mxu0 %v5675_v1 }
 0xe29   :  { %5119 = vmatprep.subr.bf16.mxu0 %v7096_v0 }
 0xede   :  { %v1518_v3 = vpop.f32.mrb[12].mxu0 }
 0xedf   :  { %v1519_v4 = vadd.f32 %v4685_v2, %v1518_v3  ;;  %v5077_v5 = vpop.f32.mrb[13].mxu0 }
 0xee0   :  { %v1521_v6 = vpop.f32.mrb[14].mxu0 }
 0xee1   :  { %v1524_v7 = vmax.f32 %v1519_v4, 0.0  ;;  %v5078_v8 = vpop.f32.mrb[15].mxu0 }
 0xee3   :  { %v1541_v9 = vpack.c.bf16 %v1524_v7, %v1524_v7 }
 0xee5   :  { %5096 = vmatmul.mubr.bf16.vlgmr.msra.gmra.mrb[16].mxu0 %v1541_v9 }
 0xee6   :  { %5123 = vmatprep.mubr.msk.bf16.mxu0 %vm7097_vm0, %v7096_v0  ;;  %5120 = vmatpush3.bf16.msra.mxu0 %v5678_v41 }
 0xee7   :  { %5121 = vmatprep.subr.bf16.mxu0 %v7096_v0 }
 0xeea   :  { %5122 = vmatpush3.bf16.msra.mxu0 %v5680_v43  ;;  %v7938_v43 = vld [vmem:[%s8473_s2 + $0x8] sm:$0xff] }
 0xfb8   :  { %v1631_v11 = vpop.f32.mrb[16].mxu0 }
 0xfb9   :  { %v1632_v12 = vadd.f32 %v4689_v10, %v1631_v11  ;;  %v5097_v13 = vpop.f32.mrb[17].mxu0  ;;  %v7910_v10 = vld [vmem:[%s8471_s21 + $0x8] ss:$0 sps:$4 sm:$0xff]   ;;  %v4712_v11 = vld [vmem:[#allocation19] ss:$0 sm:$0xff] }
 0xfba   :  { %v1634_v14 = vpop.f32.mrb[18].mxu0 }
 0xfbb   :  { %v1637_v15 = vadd.f32 %v1632_v12, %v7835_v37  ;;  %v5098_v16 = vpop.f32.mrb[19].mxu0 }
 0xfbd   :  { %v1639_v17 = vpack.c.bf16 %v1637_v15, %v1637_v15 }
 0xfbf   :  { %v1646_v19 = vsel %vm1644_vm5, %v1639_v17, 0 }
 0xfc0   :  { %5100 = vmatpush3.bf16.msra.mxu1 %v1646_v19 }
 0xfc1   :  { %5105 = vmatprep.subr.bf16.mxu1 %v7096_v0 }
 0xfc3   :  { %5102 = vmatmul.mubr.msk.bf16.vlgmr.msra.gmra.mrb[8].mxu1 %vm1640_vm6, %v1638_v20  ;;  %v7919_v20 = vld [vmem:[%s8472_s3 + $0x10] sm:$0xff] }
 0xfc4   :  { %5106 = vmatpush3.bf16.msra.mxu1 %v1708_v21  ;;  %5107 = vmatprep.mubr.msk.bf16.mxu1 %vm7097_vm0, %v7096_v0 }
 0xfc5   :  { %5111 = vmatprep.subr.bf16.mxu1 %v7096_v0 }
 0xfcb   :  { %5108 = vmatmul.mubr.msk.bf16.vlgmr.msra.gmra.mrb[12].mxu1 %vm973_vm2, %v1691_v23  ;;  %v7925_v23 = vld [vmem:[%s8472_s3 + $0x8] sm:$0xff] }
 0xfcc   :  { %5115 = vmatprep.mubr.msk.bf16.mxu1 %vm7097_vm0, %v7096_v0  ;;  %5112 = vmatpush3.bf16.msra.mxu1 %v5677_v40  ;;  %v7935_v40 = vld [vmem:[%s8473_s2] sm:$0xff] }
 0xfcd   :  { %5113 = vmatprep.subr.bf16.mxu1 %v7096_v0 }
 0xfd0   :  { %5114 = vmatpush3.bf16.msra.mxu1 %v5679_v42 }
 0xfd1   :  { %5127 = vmatprep.subr.bf16.mxu1 %v7096_v0 }
0x1096   :  { %v7877_v24 = vpop.f32.mrb[8].mxu1 }
0x1097   :  { %v5103_v25 = vpop.f32.mrb[9].mxu1 }
0x1098   :  { %v1685_v26 = vpop.f32.mrb[10].mxu1 }
0x1099   :  { %v5104_v27 = vpop.f32.mrb[11].mxu1 }
0x109e   :  { %v1744_v29 = vpop.f32.mrb[12].mxu1 }
0x109f   :  { %v7879_v30 = vadd.f32 %v4699_v28, %v1744_v29  ;;  %v5109_v31 = vpop.f32.mrb[13].mxu1 }
0x10a0   :  { %v1747_v32 = vpop.f32.mrb[14].mxu1 }
0x10a1   :  { %v5110_v33 = vpop.f32.mrb[15].mxu1  ;;  %v1751_v34 = vsel %vm1750_vm7, %v7879_v30, 0.0 }
0x10a2   :  { %1752 = vadd.xlane.f32.xlu0 %v1751_v34 }
0x112f   :  { %v1753_v35 = vpop.xlane.xlu0 %1752 }
0x1130   :  { %v1754_v36 = vmul.f32 0.03125, %v1753_v35 }
0x1132   :  { %v1755_v37 = vsub.f32 %v7879_v30, %v1754_v36 }
0x1134   :  { %v1756_v38 = vmul.f32 %v1755_v37, %v1755_v37 }
0x1136   :  { %v1757_v39 = vsel %vm1750_vm7, %v1756_v38, 0.0 }
0x1137   :  { %1758 = vadd.xlane.f32.xlu1 %v1757_v39 }
0x11c4   :  { %v1759_v44 = vpop.xlane.xlu1 %1758 }
0x11c5   :  { %v1760_v45 = vmul.f32 0.03125, %v1759_v44  ;;  %v7941_v44 = vld [vmem:[%s8473_s2 + $0x10] sm:$0xff] }
0x11c7   :  { %v1761_v46 = vadd.f32 1e-05, %v1760_v45 }
0x11c9   :  { %5763 = vrsqrt.f32 %v1761_v46 }
0x11d3   :  { %v5764_v47 = vpop.eup %5763 }
0x11d4   :  { %v1763_v49 = vmul.f32 %v5764_v47, %v1755_v37 }
0x11d6   :  { %v1771_v51 = vmul.f32 %v4702_v48, %v1763_v49 }
0x11d8   :  { %v1779_v52 = vadd.f32 %v4703_v50, %v1771_v51 }
0x11da   :  { %v1784_v54 = vpack.c.bf16 %v1779_v52, %v1779_v52 }
0x11dc   :  { %5116 = vmatmul.mubr.msk.bf16.vlgmr.msra.gmra.mrb[16].mxu1 %vm1076_vm4, %v1784_v54  ;;  %5124 = vmatmul.mubr.msk.bf16.vlgmr.msra.gmra.mrb[20].mxu0 %vm1076_vm4, %v1784_v54 }
0x11dd   :  { %5128 = vmatpush3.bf16.msra.mxu1 %v5681_v53  ;;  %5131 = vmatprep.mubr.msk.bf16.mxu1 %vm7097_vm0, %v7096_v0 }
0x11de   :  { %5129 = vmatprep.subr.bf16.mxu1 %v7096_v0  ;;  %5137 = vmatprep.mubr.msk.bf16.mxu0 %vm1985_vm8, %v7901_v56 }
0x11e1   :  { %5130 = vmatpush3.bf16.msra.mxu1 %v5682_v55 }
0x11e4   :  { %5132 = vmatmul.mubr.msk.bf16.vlgmr.msra.gmra.mrb[20].mxu1 %vm1076_vm4, %v1784_v54 }
0x12af   :  { %v1841_v59 = vpop.f32.mrb[16].mxu1  ;;  %v1904_v60 = vpop.f32.mrb[20].mxu0 }
0x12b0   :  { %v1842_v61 = vadd.f32 %v4704_v57, %v1841_v59  ;;  %v1905_v62 = vadd.f32 %v4708_v58, %v1904_v60  ;;  %v5117_v63 = vpop.f32.mrb[17].mxu1  ;;  %v5125_v1 = vpop.f32.mrb[21].mxu0 }
0x12b1   :  { %v1844_v2 = vpop.f32.mrb[18].mxu1  ;;  %v1907_v3 = vpop.f32.mrb[22].mxu0  ;;  %v5685_v1 = vld [vmem:[%s8474_s4] sm:$0xff]  }
0x12b2   :  { %v1976_v4 = vpack.c.bf16 %v1842_v61, %v1842_v61  ;;  %v2052_v5 = vpack.c.bf16 %v1905_v62, %v1905_v62  ;;  %v5118_v6 = vpop.f32.mrb[19].mxu1  ;;  %v5126_v7 = vpop.f32.mrb[23].mxu0 }
0x12b4   :  { %v1994_v8 = vsel %vm1992_vm9, %v1976_v4, 0  ;;  %v2060_v9 = vsel %vm1076_vm4, %v2052_v5, 0  ;;  %5498 = vmatprep.subr.msk.bf16.mxu0 %vm1992_vm9, %v1976_v4  ;;  %5499 = vmatprep.subr.msk.bf16.mxu1 %vm1076_vm4, %v2052_v5 }
0x12b5   :  { %5136 = vmatpush3.bf16.msra.mxu0 %v1994_v8  ;;  %5142 = vmatpush3.bf16.xpose.msra.mxu1 %v2060_v9 }
0x12b6   :  { %5153 = vmatprep.subr.bf16.mxu1 %v7096_v0 }
0x12b7   :  { %v1967_v12 = vpop.f32.mrb[20].mxu1 }
0x12b8   :  { %v1968_v13 = vadd.f32 %v4712_v11, %v1967_v12  ;;  %v5133_v14 = vpop.f32.mrb[21].mxu1  ;;  %5138 = vmatmul.mubr.msk.bf16.vlgmr.msra.gmra.mrb[24].mxu0 %vm1985_vm8, %v7910_v10 }
0x12b9   :  { %v1970_v15 = vpop.f32.mrb[22].mxu1  ;;  %v5686_v14 = vld [vmem:[%s8474_s4 + $0x8] sm:$0xff]  }
0x12ba   :  { %v2139_v16 = vpack.c.bf16 %v1968_v13, %v1968_v13  ;;  %v5134_v17 = vpop.f32.mrb[23].mxu1  ;;  %v7960_v13 = vld [vmem:[#allocation2] sm:$0x7] }
0x12bc   :  { %v2147_v18 = vsel %vm1992_vm9, %v2139_v16, 0  ;;  %5500 = vmatprep.subr.msk.bf16.mxu0 %vm1992_vm9, %v2139_v16  ;;  %v5687_v16 = vld [vmem:[%s8475_s0] sm:$0xff]  }
0x12bd   :  { %5148 = vmatpush3.bf16.msra.mxu0 %v2147_v18 }
0x12be   :  { %5161 = vmatprep.subr.bf16.mxu0 %v7096_v0 }
0x138b   :  { %v5139_v19 = vpop.f32.mrb[24].mxu0 }
0x138c   :  { %v2030_v21 = vpop.f32.mrb[25].mxu0  ;;  %v2049_v26 = vmul.f32 %v5139_v19, %v7919_v20 }
0x138d   :  { %v5140_v25 = vpop.f32.mrb[26].mxu0  ;;  %v2047_v28 = vmul.f32 %v7922_v22, %v2030_v21 }
0x138e   :  { %v2033_v27 = vpop.f32.mrb[27].mxu0  ;;  %v2051_v32 = vpack.c.bf16 %v2049_v26, %v2049_v26  ;;  %v5688_v25 = vld [vmem:[%s8475_s0 + $0x8] sm:$0xff]   ;;  %v7978_v26 = vpack.c.bf16 %v7877_v24, %v7877_v24 }
0x138f   :  { %v2048_v29 = vmul.f32 %v7925_v23, %v2033_v27  ;;  %v4725_v27 = vld [vmem:[#allocation16] ss:$0 sm:$0xff] }
0x1391   :  { %v2050_v31 = vpack.c.bf16 %v2048_v29, %v2047_v28  ;;  %v5439_v28 = vadd.f32 %v4725_v27, %v7879_v30  ;;  %v4729_v29 = vld [vmem:[#allocation4] ss:$0 sm:$0xff] }
0x1393   :  { %5143 = vmatprep.mubr.msk.bf16.mxu1 %vm1076_vm4, %v2050_v31  ;;  %v5440_v31 = vadd.f32 %v5439_v28, %v4729_v29 }
0x1394   :  { %5144 = vmatmul.mubr.msk.bf16.vlgmr.msra.gmra.mrb[24].mxu1 %vm1076_vm4, %v2051_v32 }
0x1395   :  { %5157 = vmatprep.mubr.msk.bf16.mxu1 %vm7097_vm0, %v7096_v0 }
0x1467   :  { %v5145_v33 = vpop.f32.mrb[24].mxu1 }
0x1468   :  { %v2114_v34 = vmul.f32 1.442695, %v5145_v33  ;;  %v2096_v35 = vpop.f32.mrb[25].mxu1 }
0x1469   :  { %v2110_v36 = vmul.f32 1.442695, %v2096_v35  ;;  %v5146_v37 = vpop.f32.mrb[26].mxu1 }
0x146a   :  { %5765 = vpow2.f32 %v2114_v34  ;;  %v2099_v38 = vpop.f32.mrb[27].mxu1 }
0x146b   :  { %5767 = vpow2.f32 %v2110_v36  ;;  %v2112_v39 = vmul.f32 1.442695, %v2099_v38 }
0x146d   :  { %5769 = vpow2.f32 %v2112_v39 }
0x1474   :  { %v5766_v41 = vpop.eup %5765 }
0x1475   :  { %v5768_v42 = vpop.eup %5767  ;;  %v2121_v49 = vmul.f32 %v5766_v41, %v7941_v44 }
0x1476   :  { %v2119_v45 = vmul.f32 %v5768_v42, %v7935_v40  ;;  %v5689_v42 = vld [vmem:[%s8476_s7] sm:$0xff]  }
0x1477   :  { %v5770_v46 = vpop.eup %5769  ;;  %v2128_v51 = vsel %vm1985_vm8, %v2121_v49, 0.0 }
0x1478   :  { %v2122_v47 = vsel %vm1985_vm8, %v2119_v45, 0.0  ;;  %v2120_v48 = vmul.f32 %v5770_v46, %v7938_v43 }
0x1479   :  { %2123 = vadd.xlane.f32.xlu0 %v2122_v47 }
0x147a   :  { %v2125_v50 = vsel %vm1985_vm8, %v2120_v48, 0.0 }
0x147b   :  { %2126 = vadd.xlane.f32.xlu1 %v2125_v50  ;;  %v4733_v50 = vld [vmem:[#allocation15] ss:$0 sm:$0xff] }
0x147d   :  { %2129 = vadd.xlane.f32.xlu0 %v2128_v51 }
0x1506   :  { %v2124_v52 = vpop.xlane.xlu0 %2123 }
0x1507   :  { %5771 = vrcp.f32 %v2124_v52  ;;  %v4734_v52 = vld [vmem:[#allocation13] ss:$0 sm:$0xff] }
0x1508   :  { %v2127_v53 = vpop.xlane.xlu1 %2126 }
0x1509   :  { %5773 = vrcp.f32 %v2127_v53 }
0x150a   :  { %v2130_v54 = vpop.xlane.xlu0 %2129 }
0x150b   :  { %5775 = vrcp.f32 %v2130_v54 }
0x1511   :  { %v5772_v55 = vpop.eup %5771 }
0x1512   :  { %v2134_v58 = vmul.f32 %v5772_v55, %v2119_v45  ;;  %v5690_v45 = vld [vmem:[%s8476_s7 + $0x8] sm:$0xff]   ;;  %v5691_v55 = vld [vmem:[%s8477_s10] sm:$0xff]  }
0x1513   :  { %v5774_v57 = vpop.eup %5773 }
0x1514   :  { %v2135_v59 = vmul.f32 %v5774_v57, %v2120_v48 }
0x1515   :  { %v5776_v60 = vpop.eup %5775 }
0x1516   :  { %v2136_v61 = vmul.f32 %v5776_v60, %v2121_v49  ;;  %v2137_v62 = vpack.c.bf16 %v2135_v59, %v2134_v58  ;;  %v5692_v58 = vld [vmem:[%s8477_s10 + $0x8] sm:$0xff]   ;;  %v5693_v59 = vld [vmem:[%s8477_s10 + $0x10] sm:$0xff]   ;;  %v5694_v60 = vld [vmem:[%s8477_s10 + $0x18] sm:$0xff]  }
0x1518   :  { %5149 = vmatprep.mubr.msk.bf16.mxu0 %vm1985_vm8, %v2137_v62  ;;  %v2138_v63 = vpack.c.bf16 %v2136_v61, %v2136_v61  ;;  %v5695_v61 = vld [vmem:[%s8477_s10 + $0x20] sm:$0xff]   ;;  %v5696_v62 = vld [vmem:[%s8477_s10 + $0x28] sm:$0xff]  }
0x151a   :  { %5150 = vmatmul.mubr.msk.bf16.vlgmr.msra.gmra.mrb[28].mxu0 %vm1985_vm8, %v2138_v63  ;;  %v5697_v63 = vld [vmem:[%s8477_s10 + $0x30] sm:$0xff]  }
0x151b   :  { %5165 = vmatprep.mubr.msk.bf16.mxu0 %vm7097_vm0, %v7096_v0  ;;  %5162 = vmatpush3.bf16.msra.mxu0 %v5685_v1  ;;  %v5698_v1 = vld [vmem:[%s8477_s10 + $0x38] sm:$0xff]  }
0x151c   :  { %5163 = vmatprep.subr.bf16.mxu0 %v7096_v0 }
0x151f   :  { %5164 = vmatpush3.bf16.msra.mxu0 %v5686_v14 }
0x1520   :  { %5169 = vmatprep.subr.bf16.mxu0 %v7096_v0 }
0x15ed   :  { %v5151_v2 = vpop.f32.mrb[28].mxu0 }
0x15ee   :  { %v2183_v3 = vpop.f32.mrb[29].mxu0  ;;  %v2199_v5 = vmul.f32 %v5151_v2, %v7919_v20  ;;  %v4735_v2 = vld [vmem:[#allocation6] ss:$0 sm:$0xff] }
0x15ef   :  { %v5152_v4 = vpop.f32.mrb[30].mxu0  ;;  %v2197_v7 = vmul.f32 %v2183_v3, %v7922_v22 }
0x15f0   :  { %v2186_v6 = vpop.f32.mrb[31].mxu0  ;;  %v2202_v11 = vpack.c.bf16 %v2199_v5, %v2199_v5 }
0x15f1   :  { %v2198_v8 = vmul.f32 %v2186_v6, %v7925_v23 }
0x15f2   :  { %v2209_v12 = vsel %vm2207_vm10, %v2202_v11, 0  ;;  %v4739_v11 = vld [vmem:[#allocation7] ss:$0 sm:$0xff] }
0x15f3   :  { %v2201_v9 = vpack.c.bf16 %v2198_v8, %v2197_v7 }
0x15f5   :  { %5154 = vmatpush3.bf16.msra.mxu1 %v2201_v9 }
0x15f6   :  { %5155 = vmatprep.subr.bf16.mxu1 %v7096_v0 }
0x15f9   :  { %5156 = vmatpush3.bf16.msra.mxu1 %v2209_v12 }
0x15fa   :  { %5177 = vmatprep.subr.bf16.mxu1 %v7096_v0 }
0x15fc   :  { %5158 = vmatmul.mubr.msk.bf16.vlgmr.msra.gmra.mrb[28].mxu1 %vm2203_vm11, %v7960_v13 }
0x15fd   :  { %5181 = vmatprep.mubr.msk.bf16.mxu1 %vm7097_vm0, %v7096_v0  ;;  %5178 = vmatpush3.bf16.msra.mxu1 %v5689_v42 }
0x15fe   :  { %5179 = vmatprep.subr.bf16.mxu1 %v7096_v0 }
0x1601   :  { %5180 = vmatpush3.bf16.msra.mxu1 %v5690_v45  ;;  %v5702_v45 = vld [vmem:[%s8479_s14 + $0x8] sm:$0xff]  }
0x1602   :  { %5185 = vmatprep.subr.bf16.mxu1 %v7096_v0 }
0x16cf   :  { %v2245_v15 = vpop.f32.mrb[28].mxu1 }
0x16d0   :  { %v2255_v17 = vpack.c.bf16 %v2245_v15, %v2245_v15  ;;  %v5159_v18 = vpop.f32.mrb[29].mxu1 }
0x16d1   :  { %v2248_v19 = vpop.f32.mrb[30].mxu1 }
0x16d2   :  { %v5160_v21 = vpop.f32.mrb[31].mxu1  ;;  %5166 = vmatmul.mubr.msk.bf16.vlgmr.msra.gmra.mrb[32].mxu0 %vm1076_vm4, %v2255_v17 }
0x16d3   :  { %5170 = vmatpush3.bf16.msra.mxu0 %v5687_v16  ;;  %5173 = vmatprep.mubr.msk.bf16.mxu0 %vm7097_vm0, %v7096_v0 }
0x16d4   :  { %5171 = vmatprep.subr.bf16.mxu0 %v7096_v0 }
0x16d7   :  { %5172 = vmatpush3.bf16.msra.mxu0 %v5688_v25 }
0x16d8   :  { %5205 = vmatprep.subr.bf16.mxu0 %v7096_v0 }
0x16de   :  { %5174 = vmatmul.mubr.msk.bf16.vlgmr.msra.gmra.mrb[32].mxu0 %vm1076_vm4, %v7978_v26 }
0x16df   :  { %5209 = vmatprep.mubr.msk.bf16.mxu0 %vm7097_vm0, %v7096_v0 }
0x17b1   :  { %v2380_v32 = vpop.f32.mrb[32].mxu0 }
0x17b2   :  { %v7985_v33 = vadd.f32 %v5440_v31, %v2380_v32  ;;  %v5175_v34 = vpop.f32.mrb[33].mxu0  ;;  %v5699_v31 = vld [vmem:[%s8478_s19] sm:$0xff]   ;;  %v5700_v32 = vld [vmem:[%s8478_s19 + $0x8] sm:$0xff]  }
0x17b3   :  { %v2383_v35 = vpop.f32.mrb[34].mxu0  ;;  %5206 = vmatpush3.bf16.msra.mxu0 %v5699_v31 }
0x17b4   :  { %v5176_v24 = vpop.f32.mrb[35].mxu0  ;;  %v2387_v36 = vsel %vm1750_vm7, %v7985_v33, 0.0  ;;  %5207 = vmatprep.subr.bf16.mxu0 %v7096_v0 }
0x17b5   :  { %2388 = vadd.xlane.f32.xlu1 %v2387_v36  ;;  %v4748_v36 = vld [vmem:[#allocation28] ss:$0 sm:$0xff] }
0x17b7   :  { %5208 = vmatpush3.bf16.msra.mxu0 %v5700_v32 }
0x17b8   :  { %5213 = vmatprep.subr.bf16.mxu0 %v7096_v0 }
0x1842   :  { %v2389_v37 = vpop.xlane.xlu1 %2388 }
0x1843   :  { %v2390_v38 = vmul.f32 0.03125, %v2389_v37 }
0x1845   :  { %v2391_v39 = vsub.f32 %v7985_v33, %v2390_v38  ;;  %v4749_v38 = vld [vmem:[#allocation27] ss:$0 sm:$0xff] }
0x1847   :  { %v2392_v41 = vmul.f32 %v2391_v39, %v2391_v39 }
0x1849   :  { %v2393_v30 = vsel %vm1750_vm7, %v2392_v41, 0.0 }
0x184a   :  { %2394 = vadd.xlane.f32.xlu0 %v2393_v30  ;;  %v5701_v30 = vld [vmem:[%s8479_s14] sm:$0xff]  }
0x18d7   :  { %v2395_v46 = vpop.xlane.xlu0 %2394 }
0x18d8   :  { %v2396_v47 = vmul.f32 0.03125, %v2395_v46  ;;  %v5703_v46 = vld [vmem:[%s8480_s11] sm:$0xff]  }
0x18da   :  { %v2397_v48 = vadd.f32 1e-05, %v2396_v47  ;;  %v5704_v47 = vld [vmem:[%s8480_s11 + $0x8] sm:$0xff]  }
0x18dc   :  { %5777 = vrsqrt.f32 %v2397_v48  ;;  %v4750_v48 = vld [vmem:[#allocation34] ss:$0 sm:$0xff] }
0x18e6   :  { %v5778_v49 = vpop.eup %5777 }
0x18e7   :  { %v2399_v51 = vmul.f32 %v5778_v49, %v2391_v39 }
0x18e9   :  { %v2407_v53 = vmul.f32 %v4733_v50, %v2399_v51 }
0x18eb   :  { %v2415_v54 = vadd.f32 %v4734_v52, %v2407_v53 }
0x18ed   :  { %v2420_v57 = vpack.c.bf16 %v2415_v54, %v2415_v54 }
0x18ef   :  { %5182 = vmatmul.mubr.msk.bf16.vlgmr.msra.gmra.mrb[32].mxu1 %vm1076_vm4, %v2420_v57  ;;  %v4754_v57 = vld [vmem:[#allocation25] ss:$0 sm:$0xff] }
0x18f0   :  { %5186 = vmatpush3.bf16.msra.mxu1 %v5691_v55  ;;  %5201 = vmatprep.mubr.msk.bf16.mxu1 %vm7097_vm0, %v7096_v0 }
0x18f1   :  { %5187 = vmatprep.subr.bf16.mxu1 %v7096_v0 }
0x18f4   :  { %5188 = vmatpush3.bf16.msra.mxu1 %v5692_v58 }
0x18f5   :  { %5189 = vmatprep.subr.bf16.mxu1 %v7096_v0 }
0x18f8   :  { %5190 = vmatpush3.bf16.msra.mxu1 %v5693_v59 }
0x18f9   :  { %5191 = vmatprep.subr.bf16.mxu1 %v7096_v0 }
0x18fc   :  { %5192 = vmatpush3.bf16.msra.mxu1 %v5694_v60 }
0x18fd   :  { %5193 = vmatprep.subr.bf16.mxu1 %v7096_v0 }
0x1900   :  { %5194 = vmatpush3.bf16.msra.mxu1 %v5695_v61 }
0x1901   :  { %5195 = vmatprep.subr.bf16.mxu1 %v7096_v0 }
0x1904   :  { %5196 = vmatpush3.bf16.msra.mxu1 %v5696_v62 }
0x1905   :  { %5197 = vmatprep.subr.bf16.mxu1 %v7096_v0 }
0x1908   :  { %5198 = vmatpush3.bf16.msra.mxu1 %v5697_v63 }
0x1909   :  { %5199 = vmatprep.subr.bf16.mxu1 %v7096_v0 }
0x190c   :  { %5200 = vmatpush3.bf16.msra.mxu1 %v5698_v1  ;;  %v4758_v1 = vld [vmem:[#allocation36] ss:$0 sm:$0xff] }
0x19c2   :  { %v2477_v3 = vpop.f32.mrb[32].mxu1 }
0x19c3   :  { %v2478_v4 = vadd.f32 %v4735_v2, %v2477_v3  ;;  %v5183_v5 = vpop.f32.mrb[33].mxu1 }
0x19c4   :  { %v2480_v6 = vpop.f32.mrb[34].mxu1 }
0x19c5   :  { %v2483_v7 = vmax.f32 %v2478_v4, 0.0  ;;  %v5184_v8 = vpop.f32.mrb[35].mxu1 }
0x19c7   :  { %v2500_v9 = vpack.c.bf16 %v2483_v7, %v2483_v7 }
0x19c9   :  { %5202 = vmatmul.mubr.bf16.vlgmr.msra.gmra.mrb[36].mxu1 %v2500_v9 }
0x1a9c   :  { %v2590_v12 = vpop.f32.mrb[36].mxu1 }
0x1a9d   :  { %v2591_v14 = vadd.f32 %v4739_v11, %v2590_v12  ;;  %v5203_v15 = vpop.f32.mrb[37].mxu1 }
0x1a9e   :  { %v2593_v16 = vpop.f32.mrb[38].mxu1 }
0x1a9f   :  { %v8014_v17 = vadd.f32 %v7985_v33, %v2591_v14  ;;  %v5204_v18 = vpop.f32.mrb[39].mxu1 }
0x1aa1   :  { %v2597_v19 = vsel %vm1750_vm7, %v8014_v17, 0.0 }
0x1aa2   :  { %2598 = vadd.xlane.f32.xlu1 %v2597_v19 }
0x1b2f   :  { %v2599_v21 = vpop.xlane.xlu1 %2598 }
0x1b30   :  { %v2600_v25 = vmul.f32 0.03125, %v2599_v21 }
0x1b32   :  { %v2601_v27 = vsub.f32 %v8014_v17, %v2600_v25 }
0x1b34   :  { %v2602_v28 = vmul.f32 %v2601_v27, %v2601_v27 }
0x1b36   :  { %v2603_v29 = vsel %vm1750_vm7, %v2602_v28, 0.0 }
0x1b37   :  { %2604 = vadd.xlane.f32.xlu0 %v2603_v29 }
0x1bc4   :  { %v2605_v33 = vpop.xlane.xlu0 %2604 }
0x1bc5   :  { %v2606_v34 = vmul.f32 0.03125, %v2605_v33 }
0x1bc7   :  { %v2607_v35 = vadd.f32 1e-05, %v2606_v34 }
0x1bc9   :  { %5779 = vrsqrt.f32 %v2607_v35 }
0x1bd3   :  { %v5780_v24 = vpop.eup %5779 }
0x1bd4   :  { %v2609_v37 = vmul.f32 %v5780_v24, %v2601_v27 }
0x1bd6   :  { %v2617_v39 = vmul.f32 %v4748_v36, %v2609_v37 }
0x1bd8   :  { %v2625_v41 = vadd.f32 %v4749_v38, %v2617_v39 }
0x1bda   :  { %v2630_v42 = vpack.c.bf16 %v2625_v41, %v2625_v41 }
0x1bdc   :  { %5210 = vmatmul.mubr.msk.bf16.vlgmr.msra.gmra.mrb[36].mxu0 %vm1076_vm4, %v2630_v42 }
0x1bdd   :  { %5214 = vmatpush3.bf16.msra.mxu0 %v5701_v30  ;;  %5217 = vmatprep.mubr.msk.bf16.mxu0 %vm7097_vm0, %v7096_v0 }
0x1bde   :  { %5215 = vmatprep.subr.bf16.mxu0 %v7096_v0 }
0x1be1   :  { %5216 = vmatpush3.bf16.msra.mxu0 %v5702_v45 }
0x1be2   :  { %5221 = vmatprep.subr.bf16.mxu0 %v7096_v0 }
0x1be4   :  { %5218 = vmatmul.mubr.msk.bf16.vlgmr.msra.gmra.mrb[40].mxu0 %vm1076_vm4, %v2630_v42 }
0x1be5   :  { %5222 = vmatpush3.bf16.msra.mxu0 %v5703_v46  ;;  %5225 = vmatprep.mubr.msk.bf16.mxu0 %vm7097_vm0, %v7096_v0 }
0x1be6   :  { %5223 = vmatprep.subr.bf16.mxu0 %v7096_v0 }
0x1be9   :  { %5224 = vmatpush3.bf16.msra.mxu0 %v5704_v47 }
0x1bec   :  { %5226 = vmatmul.mubr.msk.bf16.vlgmr.msra.gmra.mrb[44].mxu0 %vm1076_vm4, %v2630_v42 }
0x1bed   :  { %5231 = vmatprep.mubr.msk.bf16.mxu0 %vm1985_vm8, %v7901_v56 }
0x1caf   :  { %v2687_v49 = vpop.f32.mrb[36].mxu0 }
0x1cb0   :  { %v2688_v50 = vadd.f32 %v4750_v48, %v2687_v49  ;;  %v5211_v51 = vpop.f32.mrb[37].mxu0 }
0x1cb1   :  { %v2690_v52 = vpop.f32.mrb[38].mxu0  ;;  %v5705_v51 = vld [vmem:[%s8481_s17] sm:$0xff]  }
0x1cb2   :  { %v2819_v53 = vpack.c.bf16 %v2688_v50, %v2688_v50  ;;  %v5212_v54 = vpop.f32.mrb[39].mxu0 }
0x1cb4   :  { %v2821_v55 = vsel %vm1992_vm9, %v2819_v53, 0  ;;  %5501 = vmatprep.subr.msk.bf16.mxu0 %vm1992_vm9, %v2819_v53 }
0x1cb5   :  { %5230 = vmatpush3.bf16.msra.mxu0 %v2821_v55 }
0x1cb7   :  { %v2750_v58 = vpop.f32.mrb[40].mxu0 }
0x1cb8   :  { %v2751_v59 = vadd.f32 %v4754_v57, %v2750_v58  ;;  %v5219_v60 = vpop.f32.mrb[41].mxu0  ;;  %5232 = vmatmul.mubr.msk.bf16.vlgmr.msra.gmra.mrb[48].mxu0 %vm1985_vm8, %v7910_v10 }
0x1cb9   :  { %v2753_v56 = vpop.f32.mrb[42].mxu0 }
0x1cba   :  { %v2876_v61 = vpack.c.bf16 %v2751_v59, %v2751_v59  ;;  %v5220_v62 = vpop.f32.mrb[43].mxu0 }
0x1cbc   :  { %v2884_v63 = vsel %vm1076_vm4, %v2876_v61, 0  ;;  %5502 = vmatprep.subr.msk.bf16.mxu1 %vm1076_vm4, %v2876_v61 }
0x1cbd   :  { %5236 = vmatpush3.bf16.xpose.msra.mxu1 %v2884_v63 }
0x1cbe   :  { %5247 = vmatprep.subr.bf16.mxu1 %v7096_v0 }
0x1cbf   :  { %v2813_v2 = vpop.f32.mrb[44].mxu0 }
0x1cc0   :  { %v2814_v3 = vadd.f32 %v4758_v1, %v2813_v2  ;;  %v5227_v4 = vpop.f32.mrb[45].mxu0 }
0x1cc1   :  { %v2816_v5 = vpop.f32.mrb[46].mxu0 }
0x1cc2   :  { %v2960_v6 = vpack.c.bf16 %v2814_v3, %v2814_v3  ;;  %v5228_v7 = vpop.f32.mrb[47].mxu0  ;;  %v5708_v3 = vld [vmem:[%s8482_s13 + $0x8] sm:$0xff]   ;;  %v4773_v5 = vld [vmem:[#allocation21] ss:$0 sm:$0xff] }
0x1cc4   :  { %v2968_v8 = vsel %vm1992_vm9, %v2960_v6, 0  ;;  %5503 = vmatprep.subr.msk.bf16.mxu0 %vm1992_vm9, %v2960_v6 }
0x1cc5   :  { %5242 = vmatpush3.bf16.msra.mxu0 %v2968_v8 }
0x1cc6   :  { %5255 = vmatprep.subr.bf16.mxu0 %v7096_v0 }
0x1d8b   :  { %v5233_v10 = vpop.f32.mrb[48].mxu0 }
0x1d8c   :  { %v2857_v9 = vpop.f32.mrb[49].mxu0  ;;  %v2873_v12 = vmul.f32 %v5233_v10, %v7919_v20 }
0x1d8d   :  { %v5234_v11 = vpop.f32.mrb[50].mxu0  ;;  %v2871_v15 = vmul.f32 %v2857_v9, %v7922_v22 }
0x1d8e   :  { %v2860_v14 = vpop.f32.mrb[51].mxu0  ;;  %v2875_v19 = vpack.c.bf16 %v2873_v12, %v2873_v12 }
0x1d8f   :  { %v2872_v16 = vmul.f32 %v2860_v14, %v7925_v23 }
0x1d91   :  { %v2874_v18 = vpack.c.bf16 %v2872_v16, %v2871_v15 }
0x1d93   :  { %5237 = vmatprep.mubr.msk.bf16.mxu1 %vm1076_vm4, %v2874_v18  ;;  %v5709_v18 = vld [vmem:[%s8483_s15] sm:$0xff]  }
0x1d94   :  { %5238 = vmatmul.mubr.msk.bf16.vlgmr.msra.gmra.mrb[40].mxu1 %vm1076_vm4, %v2875_v19  ;;  %v5710_v19 = vld [vmem:[%s8483_s15 + $0x8] sm:$0xff]  }
0x1d95   :  { %5251 = vmatprep.mubr.msk.bf16.mxu1 %vm7097_vm0, %v7096_v0 }
0x1e67   :  { %v5239_v21 = vpop.f32.mrb[40].mxu1 }
0x1e68   :  { %v2938_v25 = vmul.f32 1.442695, %v5239_v21  ;;  %v2920_v27 = vpop.f32.mrb[41].mxu1 }
0x1e69   :  { %v2934_v28 = vmul.f32 1.442695, %v2920_v27  ;;  %v5240_v29 = vpop.f32.mrb[42].mxu1 }
0x1e6a   :  { %5781 = vpow2.f32 %v2938_v25  ;;  %v2923_v31 = vpop.f32.mrb[43].mxu1  ;;  %v4777_v29 = vld [vmem:[#allocation31] ss:$0 sm:$0xff] }
0x1e6b   :  { %5783 = vpow2.f32 %v2934_v28  ;;  %v2936_v32 = vmul.f32 1.442695, %v2923_v31 }
0x1e6d   :  { %5785 = vpow2.f32 %v2936_v32  ;;  %v4778_v32 = vld [vmem:[#allocation30] ss:$0 sm:$0xff] }
0x1e74   :  { %v5782_v33 = vpop.eup %5781 }
0x1e75   :  { %v5784_v34 = vpop.eup %5783  ;;  %v2942_v38 = vmul.f32 %v5782_v33, %v7941_v44 }
0x1e76   :  { %v2940_v35 = vmul.f32 %v5784_v34, %v7935_v40 }
0x1e77   :  { %v5786_v24 = vpop.eup %5785  ;;  %v2949_v41 = vsel %vm1985_vm8, %v2942_v38, 0.0 }
0x1e78   :  { %v2943_v36 = vsel %vm1985_vm8, %v2940_v35, 0.0  ;;  %v2941_v37 = vmul.f32 %v5786_v24, %v7938_v43 }
0x1e79   :  { %2944 = vadd.xlane.f32.xlu1 %v2943_v36  ;;  %v5712_v36 = vld [vmem:[%s8484_s16 + $0x8] sm:$0xff]  }
0x1e7a   :  { %v2946_v39 = vsel %vm1985_vm8, %v2941_v37, 0.0 }
0x1e7b   :  { %2947 = vadd.xlane.f32.xlu0 %v2946_v39  ;;  %v5715_v39 = vld [vmem:[%s8484_s16 + $0x20] sm:$0xff]  }
0x1e7d   :  { %2950 = vadd.xlane.f32.xlu1 %v2949_v41  ;;  %v5716_v41 = vld [vmem:[%s8484_s16 + $0x28] sm:$0xff]  }
0x1f06   :  { %v2945_v30 = vpop.xlane.xlu1 %2944 }
0x1f07   :  { %5787 = vrcp.f32 %v2945_v30  ;;  %v5717_v30 = vld [vmem:[%s8484_s16 + $0x30] sm:$0xff]  }
0x1f08   :  { %v2948_v42 = vpop.xlane.xlu0 %2947 }
0x1f09   :  { %5789 = vrcp.f32 %v2948_v42  ;;  %v5718_v42 = vld [vmem:[%s8484_s16 + $0x38] sm:$0xff]  }
0x1f0a   :  { %v2951_v40 = vpop.xlane.xlu1 %2950 }
0x1f0b   :  { %5791 = vrcp.f32 %v2951_v40  ;;  %v4779_v40 = vld [vmem:[#allocation22] ss:$0 sm:$0xff] }
0x1f11   :  { %v5788_v45 = vpop.eup %5787 }
0x1f12   :  { %v2955_v47 = vmul.f32 %v5788_v45, %v2940_v35  ;;  %v5711_v35 = vld [vmem:[%s8484_s16] sm:$0xff]  }
0x1f13   :  { %v5790_v46 = vpop.eup %5789 }
0x1f14   :  { %v2956_v43 = vmul.f32 %v5790_v46, %v2941_v37  ;;  %v5713_v37 = vld [vmem:[%s8484_s16 + $0x10] sm:$0xff]  }
0x1f15   :  { %v5792_v48 = vpop.eup %5791 }
0x1f16   :  { %v2957_v44 = vmul.f32 %v5792_v48, %v2942_v38  ;;  %v2958_v49 = vpack.c.bf16 %v2956_v43, %v2955_v47  ;;  %v5714_v38 = vld [vmem:[%s8484_s16 + $0x18] sm:$0xff]  }
0x1f18   :  { %5243 = vmatprep.mubr.msk.bf16.mxu0 %vm1985_vm8, %v2958_v49  ;;  %v2959_v50 = vpack.c.bf16 %v2957_v44, %v2957_v44 }
0x1f1a   :  { %5244 = vmatmul.mubr.msk.bf16.vlgmr.msra.gmra.mrb[52].mxu0 %vm1985_vm8, %v2959_v50  ;;  %v5719_v50 = vld [vmem:[%s8485_s6] sm:$0xff]  }
0x1f1b   :  { %5259 = vmatprep.mubr.msk.bf16.mxu0 %vm7097_vm0, %v7096_v0  ;;  %5256 = vmatpush3.bf16.msra.mxu0 %v5705_v51  ;;  %v5720_v51 = vld [vmem:[%s8486_s30] sm:$0xff]  }
0x1f1c   :  { %5257 = vmatprep.subr.bf16.mxu0 %v7096_v0 }
0x1fed   :  { %v5245_v52 = vpop.f32.mrb[52].mxu0 }
0x1fee   :  { %v3004_v53 = vpop.f32.mrb[53].mxu0  ;;  %v3020_v55 = vmul.f32 %v5245_v52, %v7919_v20  ;;  %v5706_v20 = vld [vmem:[%s8481_s17 + $0x8] sm:$0xff]  }
0x1fef   :  { %v5246_v54 = vpop.f32.mrb[54].mxu0  ;;  %v3018_v58 = vmul.f32 %v3004_v53, %v7922_v22  ;;  %5258 = vmatpush3.bf16.msra.mxu0 %v5706_v20  ;;  %v5721_v52 = vld [vmem:[%s8485_s6 + $0x8] sm:$0xff]   ;;  %v5724_v20 = vld [vmem:[%s8488_s12] sm:$0xff]  }
0x1ff0   :  { %v3007_v57 = vpop.f32.mrb[55].mxu0  ;;  %v3022_v56 = vpack.c.bf16 %v3020_v55, %v3020_v55  ;;  %5263 = vmatprep.subr.bf16.mxu0 %v7096_v0  ;;  %v5722_v53 = vld [vmem:[%s8486_s30 + $0x8] sm:$0xff]   ;;  %v4783_v54 = vld [vmem:[#allocation24] ss:$0 sm:$0xff] }
0x1ff1   :  { %v3019_v59 = vmul.f32 %v3007_v57, %v7925_v23  ;;  %v5707_v23 = vld [vmem:[%s8482_s13] sm:$0xff]  }
0x1ff2   :  { %v3024_v61 = vsel %vm2207_vm10, %v3022_v56, 0 }
0x1ff3   :  { %v3021_v60 = vpack.c.bf16 %v3019_v59, %v3018_v58 }
0x1ff5   :  { %5248 = vmatpush3.bf16.msra.mxu1 %v3021_v60 }
0x1ff6   :  { %5249 = vmatprep.subr.bf16.mxu1 %v7096_v0 }
0x1ff9   :  { %5250 = vmatpush3.bf16.msra.mxu1 %v3024_v61  ;;  %v5723_v61 = vld [vmem:[%s8487_s18] sm:$0xff]  }
0x1ffa   :  { %5271 = vmatprep.subr.bf16.mxu1 %v7096_v0 }
0x1ffc   :  { %5252 = vmatmul.mubr.msk.bf16.vlgmr.msra.gmra.mrb[44].mxu1 %vm2203_vm11, %v7960_v13  ;;  %v4769_v13 = vld [vmem:[#allocation33] ss:$0 sm:$0xff] }
0x1ffd   :  { %5275 = vmatprep.mubr.msk.bf16.mxu1 %vm7097_vm0, %v7096_v0  ;;  %v5442_v4 = vadd.f32 %v4769_v13, %v8014_v17  ;;  %5272 = vmatpush3.bf16.msra.mxu1 %v5709_v18  ;;  %v5730_v13 = vld [vmem:[%s8490_s22 + $0x8] sm:$0xff]  }
0x1ffe   :  { %5273 = vmatprep.subr.bf16.mxu1 %v7096_v0  ;;  %v5744_v18 = vld [vmem:[%s8496_s20 + $0x8] sm:$0xff]  }
0x1fff   :  { %v5443_v6 = vadd.f32 %v5442_v4, %v4773_v5  ;;  %v5731_v4 = vld [vmem:[%s8491_s23] sm:$0xff]  }
0x2000   :  { %v5732_v5 = vld [vmem:[%s8492_s26] sm:$0xff]  }
0x2001   :  { %5274 = vmatpush3.bf16.msra.mxu1 %v5710_v19  ;;  %v5745_v19 = vld [vmem:[%s8497_s25] sm:$0xff]  }
0x2002   :  { %5279 = vmatprep.subr.bf16.mxu1 %v7096_v0 }
0x20cf   :  { %v3060_v22 = vpop.f32.mrb[44].mxu1 }
0x20d0   :  { %v3070_v62 = vpack.c.bf16 %v3060_v22, %v3060_v22  ;;  %v5253_v63 = vpop.f32.mrb[45].mxu1 }
0x20d1   :  { %v3063_v1 = vpop.f32.mrb[46].mxu1  ;;  %v5727_v63 = vld [vmem:[%s8489_s5] sm:$0xff]  }
0x20d2   :  { %5260 = vmatmul.mubr.msk.bf16.vlgmr.msra.gmra.mrb[56].mxu0 %vm1076_vm4, %v3070_v62  ;;  %v5254_v2 = vpop.f32.mrb[47].mxu1  ;;  %v5726_v62 = vld [vmem:[%s8488_s12 + $0x8] sm:$0xff]   ;;  %v5728_v1 = vld [vmem:[%s8490_s22] sm:$0xff]  }
0x20d3   :  { %5264 = vmatpush3.bf16.msra.mxu0 %v5707_v23  ;;  %5267 = vmatprep.mubr.msk.bf16.mxu0 %vm7097_vm0, %v7096_v0  ;;  %v5725_v23 = vld [vmem:[%s8487_s18 + $0x8] sm:$0xff]  }
0x20d4   :  { %5265 = vmatprep.subr.bf16.mxu0 %v7096_v0 }
0x20d7   :  { %5266 = vmatpush3.bf16.msra.mxu0 %v5708_v3  ;;  %v5729_v3 = vld [vmem:[%s8489_s5 + $0x8] sm:$0xff]  }
0x20d8   :  { %5299 = vmatprep.subr.bf16.mxu0 %v7096_v0 }
0x20de   :  { %5268 = vmatmul.mubr.msk.bf16.vlgmr.msra.gmra.mrb[56].mxu0 %vm1076_vm4, %v7978_v26 }
0x20df   :  { %5303 = vmatprep.mubr.msk.bf16.mxu0 %vm7097_vm0, %v7096_v0  ;;  %5300 = vmatpush3.bf16.msra.mxu0 %v5719_v50 }
0x20e0   :  { %5301 = vmatprep.subr.bf16.mxu0 %v7096_v0 }
0x20e3   :  { %5302 = vmatpush3.bf16.msra.mxu0 %v5721_v52 }
0x20e4   :  { %5307 = vmatprep.subr.bf16.mxu0 %v7096_v0 }
0x21b1   :  { %v3191_v7 = vpop.f32.mrb[56].mxu0 }
0x21b2   :  { %v8093_v8 = vadd.f32 %v5443_v6, %v3191_v7  ;;  %v5269_v10 = vpop.f32.mrb[57].mxu0  ;;  %v5733_v7 = vld [vmem:[%s8491_s23 + $0x8] sm:$0xff]  }
0x21b3   :  { %v3194_v9 = vpop.f32.mrb[58].mxu0  ;;  %v5735_v10 = vld [vmem:[%s8493_s28] sm:$0xff]  }
0x21b4   :  { %v5270_v11 = vpop.f32.mrb[59].mxu0  ;;  %v3198_v12 = vsel %vm1750_vm7, %v8093_v8, 0.0  ;;  %v5736_v9 = vld [vmem:[%s8494_s29] sm:$0xff]  }
0x21b5   :  { %3199 = vadd.xlane.f32.xlu0 %v3198_v12  ;;  %v5737_v11 = vld [vmem:[%s8493_s28 + $0x8] sm:$0xff]  }
0x21b6   :  { %v5738_v12 = vld [vmem:[%s8494_s29 + $0x8] sm:$0xff]  }
0x2242   :  { %v3200_v26 = vpop.xlane.xlu0 %3199 }
0x2243   :  { %v3201_v14 = vmul.f32 0.03125, %v3200_v26  ;;  %v5739_v26 = vld [vmem:[%s8495_s9] sm:$0xff]  }
0x2245   :  { %v3202_v15 = vsub.f32 %v8093_v8, %v3201_v14  ;;  %v5740_v14 = vld [vmem:[%s7556_s27] sm:$0xff]  }
0x2247   :  { %v3203_v16 = vmul.f32 %v3202_v15, %v3202_v15 }
0x2249   :  { %v3204_v17 = vsel %vm1750_vm7, %v3203_v16, 0.0  ;;  %v5742_v16 = vld [vmem:[%s7556_s27 + $0x8] sm:$0xff]   ;;  %s8498_s27 = sld [smem:[#allocation179_spill]] }
0x224a   :  { %3205 = vadd.xlane.f32.xlu1 %v3204_v17  ;;  %v5743_v17 = vld [vmem:[%s8496_s20] sm:$0xff]  }
0x22d7   :  { %v3206_v21 = vpop.xlane.xlu1 %3205 }
0x22d8   :  { %v3207_v25 = vmul.f32 0.03125, %v3206_v21  ;;  %v5746_v21 = vld [vmem:[%s8497_s25 + $0x8] sm:$0xff]  }
0x22da   :  { %v3208_v27 = vadd.f32 1e-05, %v3207_v25  ;;  %v5747_v25 = vld [vmem:[%s8498_s27] sm:$0xff]  }
0x22dc   :  { %5793 = vrsqrt.f32 %v3208_v27  ;;  %v5748_v27 = vld [vmem:[%s8498_s27 + $0x8] sm:$0xff]  }
0x22e6   :  { %v5794_v28 = vpop.eup %5793 }
0x22e7   :  { %v3210_v31 = vmul.f32 %v5794_v28, %v3202_v15  ;;  %v5741_v15 = vld [vmem:[%s8495_s9 + $0x8] sm:$0xff]  }
0x22e9   :  { %v3218_v33 = vmul.f32 %v4777_v29, %v3210_v31 }
0x22eb   :  { %v3226_v34 = vadd.f32 %v4778_v32, %v3218_v33 }
0x22ed   :  { %v3231_v24 = vpack.c.bf16 %v3226_v34, %v3226_v34 }
0x22ef   :  { %5276 = vmatmul.mubr.msk.bf16.vlgmr.msra.gmra.mrb[48].mxu1 %vm1076_vm4, %v3231_v24 }
0x22f0   :  { %5280 = vmatpush3.bf16.msra.mxu1 %v5711_v35  ;;  %5295 = vmatprep.mubr.msk.bf16.mxu1 %vm7097_vm0, %v7096_v0 }
0x22f1   :  { %5281 = vmatprep.subr.bf16.mxu1 %v7096_v0 }
0x22f4   :  { %5282 = vmatpush3.bf16.msra.mxu1 %v5712_v36  ;;  %v4815_v36 = vld [vmem:[#allocation72] ss:$0 sm:$0xff] }
0x22f5   :  { %5283 = vmatprep.subr.bf16.mxu1 %v7096_v0 }
0x22f8   :  { %5284 = vmatpush3.bf16.msra.mxu1 %v5713_v37  ;;  %v4805_v37 = vld [vmem:[#allocation70] ss:$0 sm:$0xff] }
0x22f9   :  { %5285 = vmatprep.subr.bf16.mxu1 %v7096_v0 }
0x22fc   :  { %5286 = vmatpush3.bf16.msra.mxu1 %v5714_v38  ;;  %v4835_v38 = vld [vmem:[#allocation75] ss:$0 sm:$0xff] }
0x22fd   :  { %5287 = vmatprep.subr.bf16.mxu1 %v7096_v0 }
0x2300   :  { %5288 = vmatpush3.bf16.msra.mxu1 %v5715_v39  ;;  %v4795_v39 = vld [vmem:[#allocation69] ss:$0 sm:$0xff] }
0x2301   :  { %5289 = vmatprep.subr.bf16.mxu1 %v7096_v0 }
0x2304   :  { %5290 = vmatpush3.bf16.msra.mxu1 %v5716_v41 }
0x2305   :  { %5291 = vmatprep.subr.bf16.mxu1 %v7096_v0 }
0x2308   :  { %5292 = vmatpush3.bf16.msra.mxu1 %v5717_v30 }
0x2309   :  { %5293 = vmatprep.subr.bf16.mxu1 %v7096_v0 }
0x230c   :  { %5294 = vmatpush3.bf16.msra.mxu1 %v5718_v42 }
0x230d   :  { %5347 = vmatprep.subr.bf16.mxu1 %v7096_v0 }
0x23c2   :  { %v3288_v45 = vpop.f32.mrb[48].mxu1 }
0x23c3   :  { %v3289_v46 = vadd.f32 %v4779_v40, %v3288_v45  ;;  %v5277_v47 = vpop.f32.mrb[49].mxu1 }
0x23c4   :  { %v3291_v43 = vpop.f32.mrb[50].mxu1 }
0x23c5   :  { %v3294_v48 = vmax.f32 %v3289_v46, 0.0  ;;  %v5278_v44 = vpop.f32.mrb[51].mxu1 }
0x23c7   :  { %v3311_v49 = vpack.c.bf16 %v3294_v48, %v3294_v48 }
0x23c9   :  { %5296 = vmatmul.mubr.bf16.vlgmr.msra.gmra.mrb[52].mxu1 %v3311_v49 }
0x23ca   :  { %5351 = vmatprep.mubr.msk.bf16.mxu1 %vm7097_vm0, %v7096_v0  ;;  %5348 = vmatpush3.bf16.msra.mxu1 %v5720_v51 }
0x23cb   :  { %5349 = vmatprep.subr.bf16.mxu1 %v7096_v0 }
0x23ce   :  { %5350 = vmatpush3.bf16.msra.mxu1 %v5722_v53 }
0x23cf   :  { %5355 = vmatprep.subr.bf16.mxu1 %v7096_v0 }
0x249c   :  { %v3401_v55 = vpop.f32.mrb[52].mxu1 }
0x249d   :  { %v3402_v57 = vadd.f32 %v4783_v54, %v3401_v55  ;;  %v5297_v58 = vpop.f32.mrb[53].mxu1 }
0x249e   :  { %v3404_v59 = vpop.f32.mrb[54].mxu1 }
0x249f   :  { %v3407_v60 = vadd.f32 %v8093_v8, %v3402_v57  ;;  %v5298_v56 = vpop.f32.mrb[55].mxu1  ;;  %v5734_v8 = vld [vmem:[%s8492_s26 + $0x8] sm:$0xff]   ;;  %v4825_v57 = vld [vmem:[#allocation73] ss:$0 sm:$0xff] }
0x24a1   :  { %v8135_v22 = vpack.c.bf16 %v3407_v60, %v3407_v60 }
0x24a3   :  { %5304 = vmatmul.mubr.msk.bf16.vlgmr.msra.gmra.mrb[60].mxu0 %vm1076_vm4, %v8135_v22  ;;  %5352 = vmatmul.mubr.msk.bf16.vlgmr.msra.gmra.mrb[56].mxu1 %vm1076_vm4, %v8135_v22  ;;  %v8154_v2 = vrot.slane %v8135_v22, 1  ;;  %v8173_v6 = vrot.slane %v8135_v22, 2 }
0x24a4   :  { %5308 = vmatpush3.bf16.msra.mxu0 %v5723_v61  ;;  %5356 = vmatpush3.bf16.msra.mxu1 %v5724_v20 }
0x24a5   :  { %5309 = vmatprep.subr.bf16.mxu0 %v7096_v0  ;;  %5357 = vmatprep.subr.bf16.mxu1 %v7096_v0 }
0x24a6   :  { %5311 = vmatprep.mubr.msk.bf16.mxu0 %vm7097_vm0, %v7096_v0  ;;  %5359 = vmatprep.mubr.msk.bf16.mxu1 %vm7097_vm0, %v7096_v0 }
0x24a8   :  { %5310 = vmatpush3.bf16.msra.mxu0 %v5725_v23  ;;  %5358 = vmatpush3.bf16.msra.mxu1 %v5726_v62 }
0x24a9   :  { %5315 = vmatprep.subr.bf16.mxu0 %v7096_v0  ;;  %5363 = vmatprep.subr.bf16.mxu1 %v7096_v0 }
0x24af   :  { %5312 = vmatmul.mubr.msk.bf16.vlgmr.msra.gmra.mrb[60].mxu0 %vm1076_vm4, %v8154_v2  ;;  %5360 = vmatmul.mubr.msk.bf16.vlgmr.msra.gmra.mrb[56].mxu1 %vm1076_vm4, %v8154_v2 }
0x24b0   :  { %5316 = vmatpush3.bf16.msra.mxu0 %v5727_v63  ;;  %5364 = vmatpush3.bf16.msra.mxu1 %v5728_v1 }
0x24b1   :  { %5317 = vmatprep.subr.bf16.mxu0 %v7096_v0  ;;  %5365 = vmatprep.subr.bf16.mxu1 %v7096_v0 }
0x24b2   :  { %5319 = vmatprep.mubr.msk.bf16.mxu0 %vm7097_vm0, %v7096_v0  ;;  %5367 = vmatprep.mubr.msk.bf16.mxu1 %vm7097_vm0, %v7096_v0 }
0x24b4   :  { %5318 = vmatpush3.bf16.msra.mxu0 %v5729_v3  ;;  %5366 = vmatpush3.bf16.msra.mxu1 %v5730_v13 }
0x24b5   :  { %5323 = vmatprep.subr.bf16.mxu0 %v7096_v0  ;;  %5395 = vmatprep.subr.bf16.mxu1 %v7096_v0 }
0x24bb   :  { %5320 = vmatmul.mubr.msk.bf16.vlgmr.msra.gmra.mrb[60].mxu0 %vm1076_vm4, %v8173_v6  ;;  %5368 = vmatmul.mubr.msk.bf16.vlgmr.msra.gmra.mrb[56].mxu1 %vm1076_vm4, %v8173_v6 }
0x24bc   :  { %5324 = vmatpush3.bf16.msra.mxu0 %v5731_v4  ;;  %5396 = vmatpush3.bf16.msra.mxu1 %v5732_v5 }
0x24bd   :  { %5325 = vmatprep.subr.bf16.mxu0 %v7096_v0  ;;  %5397 = vmatprep.subr.bf16.mxu1 %v7096_v0 }
0x24be   :  { %5327 = vmatprep.mubr.msk.bf16.mxu0 %vm7097_vm0, %v7096_v0  ;;  %5399 = vmatprep.mubr.msk.bf16.mxu1 %vm7097_vm0, %v7096_v0 }
0x24c0   :  { %5326 = vmatpush3.bf16.msra.mxu0 %v5733_v7  ;;  %5398 = vmatpush3.bf16.msra.mxu1 %v5734_v8  ;;  %v5749_v8 = vld [vmem:[%s8499_s1] sm:$0xff]  }
0x24c1   :  { %5331 = vmatprep.subr.bf16.mxu0 %v7096_v0  ;;  %5403 = vmatprep.subr.bf16.mxu1 %v7096_v0 }
0x24c3   :  { %5328 = vmatmul.mubr.msk.bf16.vlgmr.msra.gmra.mrb[64].mxu0 %vm1076_vm4, %v8135_v22  ;;  %5400 = vmatmul.mubr.msk.bf16.vlgmr.msra.gmra.mrb[60].mxu1 %vm1076_vm4, %v8135_v22 }
0x24c4   :  { %5332 = vmatpush3.bf16.msra.mxu0 %v5735_v10  ;;  %5404 = vmatpush3.bf16.msra.mxu1 %v5736_v9  ;;  %v5750_v10 = vld [vmem:[%s8499_s1 + $0x8] sm:$0xff]   ;;  %v5751_v9 = vld [vmem:[%s8499_s1 + $0x10] sm:$0xff]  }
0x24c5   :  { %5333 = vmatprep.subr.bf16.mxu0 %v7096_v0  ;;  %5405 = vmatprep.subr.bf16.mxu1 %v7096_v0 }
0x24c6   :  { %5335 = vmatprep.mubr.msk.bf16.mxu0 %vm7097_vm0, %v7096_v0  ;;  %5407 = vmatprep.mubr.msk.bf16.mxu1 %vm7097_vm0, %v7096_v0 }
0x24c8   :  { %5334 = vmatpush3.bf16.msra.mxu0 %v5737_v11  ;;  %5406 = vmatpush3.bf16.msra.mxu1 %v5738_v12  ;;  %v5752_v11 = vld [vmem:[%s8499_s1 + $0x18] sm:$0xff]  }
0x24c9   :  { %5339 = vmatprep.subr.bf16.mxu0 %v7096_v0  ;;  %5411 = vmatprep.subr.bf16.mxu1 %v7096_v0 }
0x24cf   :  { %5336 = vmatmul.mubr.msk.bf16.vlgmr.msra.gmra.mrb[64].mxu0 %vm1076_vm4, %v8154_v2  ;;  %5408 = vmatmul.mubr.msk.bf16.vlgmr.msra.gmra.mrb[60].mxu1 %vm1076_vm4, %v8154_v2 }
0x24d0   :  { %5340 = vmatpush3.bf16.msra.mxu0 %v5739_v26  ;;  %5412 = vmatpush3.bf16.msra.mxu1 %v5740_v14 }
0x24d1   :  { %5341 = vmatprep.subr.bf16.mxu0 %v7096_v0  ;;  %5413 = vmatprep.subr.bf16.mxu1 %v7096_v0 }
0x24d2   :  { %5343 = vmatprep.mubr.msk.bf16.mxu0 %vm7097_vm0, %v7096_v0  ;;  %5415 = vmatprep.mubr.msk.bf16.mxu1 %vm7097_vm0, %v7096_v0 }
0x24d4   :  { %5342 = vmatpush3.bf16.msra.mxu0 %v5741_v15  ;;  %5414 = vmatpush3.bf16.msra.mxu1 %v5742_v16 }
0x24d5   :  { %5371 = vmatprep.subr.bf16.mxu0 %v7096_v0  ;;  %5431 = vmatprep.subr.bf16.mxu1 %v7096_v0 }
0x24db   :  { %5344 = vmatmul.mubr.msk.bf16.vlgmr.msra.gmra.mrb[64].mxu0 %vm1076_vm4, %v8173_v6  ;;  %5416 = vmatmul.mubr.msk.bf16.vlgmr.msra.gmra.mrb[60].mxu1 %vm1076_vm4, %v8173_v6 }
0x24dc   :  { %5372 = vmatpush3.bf16.msra.mxu0 %v5743_v17  ;;  %5375 = vmatprep.mubr.msk.bf16.mxu0 %vm7097_vm0, %v7096_v0 }
0x24dd   :  { %5373 = vmatprep.subr.bf16.mxu0 %v7096_v0  ;;  %5435 = vmatprep.mubr.msk.bf16.mxu1 %vm7097_vm0, %v7096_v0 }
0x24e0   :  { %5374 = vmatpush3.bf16.msra.mxu0 %v5744_v18 }
0x24e1   :  { %5379 = vmatprep.subr.bf16.mxu0 %v7096_v0 }
0x24e3   :  { %5376 = vmatmul.mubr.msk.bf16.vlgmr.msra.gmra.mrb[68].mxu0 %vm1076_vm4, %v8135_v22 }
0x24e4   :  { %5380 = vmatpush3.bf16.msra.mxu0 %v5745_v19  ;;  %5383 = vmatprep.mubr.msk.bf16.mxu0 %vm7097_vm0, %v7096_v0 }
0x24e5   :  { %5381 = vmatprep.subr.bf16.mxu0 %v7096_v0 }
0x24e8   :  { %5382 = vmatpush3.bf16.msra.mxu0 %v5746_v21  ;;  %v4842_v21 = vld [vmem:[#allocation67] ss:$0 sm:$0xff] }
0x24e9   :  { %5387 = vmatprep.subr.bf16.mxu0 %v7096_v0 }
0x24ef   :  { %5384 = vmatmul.mubr.msk.bf16.vlgmr.msra.gmra.mrb[68].mxu0 %vm1076_vm4, %v8154_v2 }
0x24f0   :  { %5388 = vmatpush3.bf16.msra.mxu0 %v5747_v25  ;;  %5391 = vmatprep.mubr.msk.bf16.mxu0 %vm7097_vm0, %v7096_v0 }
0x24f1   :  { %5389 = vmatprep.subr.bf16.mxu0 %v7096_v0 }
0x24f4   :  { %5390 = vmatpush3.bf16.msra.mxu0 %v5748_v27 }
0x24f5   :  { %5419 = vmatprep.subr.bf16.mxu0 %v7096_v0 }
0x24fb   :  { %5392 = vmatmul.mubr.msk.bf16.vlgmr.msra.gmra.mrb[68].mxu0 %vm1076_vm4, %v8173_v6 }
0x24fc   :  { %5427 = vmatprep.mubr.msk.bf16.mxu0 %vm7097_vm0, %v7096_v0  ;;  %5420 = vmatpush3.bf16.msra.mxu0 %v5749_v8 }
0x24fd   :  { %5421 = vmatprep.subr.bf16.mxu0 %v7096_v0 }
0x2500   :  { %5422 = vmatpush3.bf16.msra.mxu0 %v5750_v10 }
0x2501   :  { %5423 = vmatprep.subr.bf16.mxu0 %v7096_v0 }
0x2504   :  { %5424 = vmatpush3.bf16.msra.mxu0 %v5751_v9 }
0x2505   :  { %5425 = vmatprep.subr.bf16.mxu0 %v7096_v0 }
0x2508   :  { %5426 = vmatpush3.bf16.msra.mxu0 %v5752_v11 }
0x258e   :  { %v3592_v28 = vpop.f32.mrb[60].mxu0  ;;  %v3948_v29 = vpop.f32.mrb[56].mxu1 }
0x258f   :  { %v5321_v31 = vpop.f32.mrb[61].mxu0  ;;  %v5369_v32 = vpop.f32.mrb[57].mxu1  ;;  %v5447_v41 = vadd.f32 %v4815_v36, %v3948_v29  ;;  %v5445_v44 = vadd.f32 %v4795_v39, %v3592_v28  ;;  %v4843_v28 = vld [vmem:[#allocation66] ss:$0 sm:$0xff]  ;;  %v5753_v36 = vld [vmem:[%s8500_s8] sm:$0xff]  }
0x2590   :  { %v3595_v33 = vpop.f32.mrb[62].mxu0  ;;  %v3951_v34 = vpop.f32.mrb[58].mxu1  ;;  %5432 = vmatpush3.bf16.msra.mxu1 %v5753_v36 }
0x2591   :  { %v5322_v35 = vpop.f32.mrb[63].mxu0  ;;  %v5370_v24 = vpop.f32.mrb[59].mxu1  ;;  %v4315_v53 = vrot.slane %v5447_v41, 4  ;;  %5433 = vmatprep.subr.bf16.mxu1 %v7096_v0 }
0x25ae   :  { %v3770_v30 = vpop.f32.mrb[64].mxu0  ;;  %v4304_v42 = vpop.f32.mrb[60].mxu1 }
0x25af   :  { %v5446_v40 = vadd.f32 %v4805_v37, %v3770_v30  ;;  %v5449_v45 = vadd.f32 %v4835_v38, %v4304_v42  ;;  %v5345_v46 = vpop.f32.mrb[65].mxu0  ;;  %v5417_v47 = vpop.f32.mrb[61].mxu1  ;;  %v5754_v37 = vld [vmem:[%s8500_s8 + $0x8] sm:$0xff]   ;;  %v4844_v38 = vld [vmem:[#allocation63] ss:$0 sm:$0xff] }
0x25b0   :  { %v3773_v43 = vpop.f32.mrb[66].mxu0  ;;  %v4307_v48 = vpop.f32.mrb[62].mxu1  ;;  %5434 = vmatpush3.bf16.msra.mxu1 %v5754_v37 }
0x25b1   :  { %v4312_v49 = vrot.slane %v5446_v40, 6  ;;  %v5346_v50 = vpop.f32.mrb[67].mxu0  ;;  %v5418_v51 = vpop.f32.mrb[63].mxu1  ;;  %v4329_v52 = vsel %vm4328_vm12, %v5449_v45, 0.0  ;;  %v4850_v48 = vld [vmem:[#allocation64] ss:$0 sm:$0xff] }
0x25b2   :  { %4330 = vadd.xlane.f32.xlu1 %v4329_v52 }
0x25b3   :  { %v4321_v54 = vsel %vm4320_vm13, %v5445_v44, %v4312_v49 }
0x25b4   :  { %v4322_v55 = vsel %vm2207_vm10, %v4321_v54, %v4315_v53 }
0x25ce   :  { %v4126_v58 = vpop.f32.mrb[68].mxu0 }
0x25cf   :  { %v5448_v59 = vadd.f32 %v4825_v57, %v4126_v58  ;;  %v5393_v60 = vpop.f32.mrb[69].mxu0 }
0x25d0   :  { %v4129_v56 = vpop.f32.mrb[70].mxu0 }
0x25d1   :  { %v4318_v61 = vrot.slane %v5448_v59, 2  ;;  %v5394_v20 = vpop.f32.mrb[71].mxu0 }
0x25d3   :  { %v4323_v22 = vsel %vm977_vm1, %v4322_v55, %v4318_v61 }
0x25d4   :  { %v4325_v23 = vsel %vm4324_vm14, %v4323_v22, 0.0 }
0x25d5   :  { %4326 = vadd.xlane.f32.xlu0 %v4325_v23 }
0x263f   :  { %v4331_v62 = vpop.xlane.xlu1 %4330 }
0x2640   :  { %v4334_v63 = vmul.f32 0.015625, %v4331_v62 }
0x2642   :  { %v4336_v1 = vsub.f32 %v5449_v45, %v4334_v63 }
0x2644   :  { %v4338_v2 = vmul.f32 %v4336_v1, %v4336_v1 }
0x2646   :  { %v4342_v3 = vsel %vm4328_vm12, %v4338_v2, 0.0 }
0x2647   :  { %4343 = vadd.xlane.f32.xlu1 %v4342_v3 }
0x2662   :  { %v4327_v13 = vpop.xlane.xlu0 %4326 }
0x2663   :  { %v4333_v4 = vmul.f32 0.015625, %v4327_v13 }
0x2665   :  { %v4335_v5 = vsub.f32 %v4323_v22, %v4333_v4 }
0x2667   :  { %v4337_v6 = vmul.f32 %v4335_v5, %v4335_v5 }
0x2669   :  { %v4339_v7 = vsel %vm4324_vm14, %v4337_v6, 0.0 }
0x266a   :  { %4340 = vadd.xlane.f32.xlu0 %v4339_v7 }
0x26d4   :  { %v4344_v12 = vpop.xlane.xlu1 %4343 }
0x26d5   :  { %v4346_v26 = vmul.f32 0.015625, %v4344_v12 }
0x26d7   :  { %v4348_v14 = vadd.f32 1e-05, %v4346_v26 }
0x26d9   :  { %5795 = vrsqrt.f32 %v4348_v14 }
0x26e3   :  { %v5796_v18 = vpop.eup %5795 }
0x26e4   :  { %v4352_v19 = vmul.f32 %v5796_v18, %v4336_v1 }
0x26e6   :  { %v4361_v25 = vmul.f32 %v4842_v21, %v4352_v19 }
0x26e8   :  { %v4370_v32 = vadd.f32 %v4843_v28, %v4361_v25 }
0x26ea   :  { %v4372_v35 = vmax.f32 %v4370_v32, 0.0 }
0x26f7   :  { %v4341_v15 = vpop.xlane.xlu0 %4340 }
0x26f8   :  { %v4345_v16 = vmul.f32 0.015625, %v4341_v15 }
0x26fa   :  { %v4347_v17 = vadd.f32 1e-05, %v4345_v16 }
0x26fc   :  { %5797 = vrsqrt.f32 %v4347_v17 }
0x2706   :  { %v5798_v27 = vpop.eup %5797 }
0x2707   :  { %v4351_v29 = vmul.f32 %v5798_v27, %v4335_v5 }
0x2709   :  { %v4360_v31 = vmul.f32 %v4842_v21, %v4351_v29 }
0x270b   :  { %v4369_v33 = vadd.f32 %v4843_v28, %v4360_v31 }
0x270d   :  { %v4371_v34 = vmax.f32 %v4369_v33, 0.0 }
0x270f   :  { %v4381_v24 = vpack.c.bf16 %v4372_v35, %v4371_v34 }
0x2711   :  { %5428 = vmatmul.mubr.msk.bf16.vlgmr.msra.gmra.mrb[72].mxu0 %vm4324_vm14, %v4381_v24 }
0x27e4   :  { %v4450_v39 = vpop.f32.mrb[72].mxu0 }
0x27e5   :  { %v4451_v41 = vadd.f32 %v4844_v38, %v4450_v39  ;;  %v5429_v30 = vpop.f32.mrb[73].mxu0 }
0x27e6   :  { %v4453_v42 = vpop.f32.mrb[74].mxu0 }
0x27e7   :  { %v4454_v40 = vadd.f32 %v4844_v38, %v4453_v42  ;;  %v5430_v45 = vpop.f32.mrb[75].mxu0  ;;  %v4457_v46 = vmax.f32 %v4451_v41, 0.0 }
0x27e9   :  { %v4458_v47 = vmax.f32 %v4454_v40, 0.0 }
0x27eb   :  { %v4463_v43 = vpack.c.bf16 %v4458_v47, %v4457_v46 }
0x27ed   :  { %5436 = vmatmul.mubr.msk.bf16.vlgmr.msra.gmra.mrb[64].mxu1 %vm1076_vm4, %v4463_v43 }
0x28c0   :  { %v4520_v44 = vpop.f32.mrb[64].mxu1 }
0x28c1   :  { %v4521_v49 = vadd.f32 %v4850_v48, %v4520_v44  ;;  %v5437_v0 = vpop.f32.mrb[65].mxu1 }
0x28c2   :  { %v4523_v50 = vpop.f32.mrb[66].mxu1 }
0x28c3   :  { %4527 = vst.msk [vmem:[%s7571_s24] sm:$0xff] %vm973_vm2, %v4521_v49  ;;  %v4524_v51 = vadd.f32 %v4850_v48, %v4523_v50  ;;  %v5438_v52 = vpop.f32.mrb[67].mxu1 }
0x28c5   :  { %4529 = vst.msk [vmem:[%s7571_s24 + $0x8] sm:$0x3] %vm4528_vm15, %v4524_v51 }
0x28c6   :  { %4534 = vsyncpa [#allocation3], 1 }
0x28c7   :  { %4535 = vsyncpa [#allocation5], 1 }
0x28c8   :  { %4536 = vsyncpa [#allocation8], 1 }
0x28c9   :  { %4537 = vsyncpa [#allocation11], 1 }
0x28ca   :  { %4538 = vsyncpa [#allocation14], 1 }
0x28cb   :  { %4539 = vsyncpa [#allocation17], 1 }
0x28cc   :  { %4540 = vsyncpa [#allocation20], 1 }
0x28cd   :  { %4541 = vsyncpa [#allocation23], 1 }
0x28ce   :  { %4542 = vsyncpa [#allocation26], 1 }
0x28cf   :  { %4543 = vsyncpa [#allocation29], 1 }
0x28d0   :  { %4544 = vsyncpa [#allocation32], 1 }
0x28d1   :  { %4545 = vsyncpa [#allocation35], 1 }
0x28d2   :  { %4546 = vsyncpa [#allocation38], 1 }
0x28d3   :  { %4547 = vsyncpa [#allocation41], 1 }
0x28d4   :  { %4548 = vsyncpa [#allocation44], 1 }
0x28d5   :  { %4549 = vsyncpa [#allocation47], 1 }
0x28d6   :  { %4550 = vsyncpa [#allocation50], 1 }
0x28d7   :  { %4551 = vsyncpa [#allocation53], 1 }
0x28d8   :  { %4552 = vsyncpa [#allocation56], 1 }
0x28d9   :  { %4553 = vsyncpa [#allocation59], 1 }
0x28da   :  { %4554 = vsyncpa [#allocation62], 1 }
0x28db   :  { %4555 = vsyncpa [#allocation65], 1 }
0x28dc   :  { %4556 = vsyncpa [#allocation68], 1 }
0x28dd   :  { %4557 = vsyncpa [#allocation71], 1 }
0x28de   :  { %4558 = vsyncpa [#allocation74], 1 }
0x28df   :  { %4559 = vsyncpa [#allocation77], 1 }

</bundles_post_ra>
